<compile_context>
chip_gen: v6e
topology: v6e:2x2x1
jax: 0.10.0
libtpu: 0.0.40
codegen_flags: <defaults>
</compile_context>

<pallas_src>
import functools

import jax
import jax.numpy as jnp
from jax.experimental import pallas as pl
from jax.experimental.pallas import tpu as pltpu


def _decoder_kernel(x_ref,
                    w1_ref, b1_ref,
                    w2_ref, b2_ref,
                    w3_ref, b3_ref,
                    w4t_ref, b4_ref,
                    o_ref):
    """One batch tile: four chained affine layers + sigmoid.

    x_ref  : (block_b, d_in)   f32 VMEM tile of the encoding
    w1..w3 : full weights, pre-transposed to [in, out]; b1..b3: [1, out]
    w4t    : final weight in PyTorch-native [out, in] layout; b4: [out, 1]
    o_ref  : (d_out, block_b)  lane-dense output tile (d_out = 1)
    """
    x = x_ref[...]  # already f32; no redundant cast
    h1 = jnp.dot(x,  w1_ref[...], preferred_element_type=jnp.float32) + b1_ref[...]
    h2 = jnp.dot(h1, w2_ref[...], preferred_element_type=jnp.float32) + b2_ref[...]
    h3 = jnp.dot(h2, w3_ref[...], preferred_element_type=jnp.float32) + b3_ref[...]
    # Final layer as w4 @ h3^T so the result lands as (d_out, block_b):
    # block_b sits on the 128-lane axis -> contiguous (unmasked) stores and a
    # dense HBM writeback instead of a 1-lane-wide masked column.
    p = jnp.dot(w4t_ref[...], h3.T, preferred_element_type=jnp.float32) + b4_ref[...]
    o_ref[...] = jax.nn.sigmoid(p).astype(o_ref.dtype)


@functools.partial(jax.jit, static_argnames=("block_b",))
def decoder_forward(x, params, block_b=256):
    """x: [B, lstm_hidden_size] float32. Returns [B, output_size] sigmoid probs."""
    B, d_in = x.shape
    w1, b1 = params["w1"], params["b1"]    # [d_in, h1], [1, h1]
    w2, b2 = params["w2"], params["b2"]    # [h1, h2],   [1, h2]
    w3, b3 = params["w3"], params["b3"]    # [h2, h3],   [1, h3]
    w4t, b4 = params["w4t"], params["b4"]  # [d_out, h3], [d_out, 1]
    d_out = w4t.shape[0]

    block_b = min(block_b, B)
    if block_b < B:
        # multi-step grid: batch tile must be lane/sublane aligned
        assert block_b % 128 == 0, "block_b must be a multiple of 128 when B > block_b"
    num_blocks = pl.cdiv(B, block_b)

    def batch_map(i):
        return (i, 0)

    def out_map(i):
        return (0, i)

    def whole_map(i):
        return (0, 0)

    full_spec = lambda arr: pl.BlockSpec(arr.shape, whole_map)

    out = pl.pallas_call(
        _decoder_kernel,
        out_shape=jax.ShapeDtypeStruct((d_out, B), x.dtype),
        grid_spec=pltpu.PrefetchScalarGridSpec(
            num_scalar_prefetch=0,
            grid=(num_blocks,),
            in_specs=[
                pl.BlockSpec((block_b, d_in), batch_map),
                full_spec(w1), full_spec(b1),
                full_spec(w2), full_spec(b2),
                full_spec(w3), full_spec(b3),
                full_spec(w4t), full_spec(b4),
            ],
            out_specs=pl.BlockSpec((d_out, block_b), out_map),
        ),
        compiler_params=pltpu.CompilerParams(
            dimension_semantics=("parallel",)),
    )(x, w1, b1, w2, b2, w3, b3, w4t, b4)
    return out.T  # (B, d_out), cheap layout fixup outside the kernel


def init_params(key,
                lstm_hidden_size=388,
                linear_hidden1_size=776,
                linear_hidden2_size=28,
                linear_hidden3_size=12,
                output_size=1):
    """Deterministic synthetic parameters (PyTorch nn.Linear-style uniform init)."""
    dims = [(lstm_hidden_size, linear_hidden1_size),
            (linear_hidden1_size, linear_hidden2_size),
            (linear_hidden2_size, linear_hidden3_size),
            (linear_hidden3_size, output_size)]
    params = {}
    for idx, (fan_in, fan_out) in enumerate(dims, start=1):
        key, kw, kb = jax.random.split(key, 3)
        bound = 1.0 / jnp.sqrt(jnp.float32(fan_in))
        if idx < 4:
            # stored transposed: [in, out]  ->  kernel computes x @ W + b
            params[f"w{idx}"] = jax.random.uniform(
                kw, (fan_in, fan_out), jnp.float32, -bound, bound)
            params[f"b{idx}"] = jax.random.uniform(
                kb, (1, fan_out), jnp.float32, -bound, bound)
        else:
            # final layer kept in PyTorch-native [out, in] layout so the kernel
            # can emit a lane-dense (d_out, block_b) output tile.
            params["w4t"] = jax.random.uniform(
                kw, (fan_out, fan_in), jnp.float32, -bound, bound)
            params["b4"] = jax.random.uniform(
                kb, (fan_out, 1), jnp.float32, -bound, bound)
    return params


def reference_forward(x, params):
    h = x @ params["w1"] + params["b1"]
    h = h @ params["w2"] + params["b2"]
    h = h @ params["w3"] + params["b3"]
    p = h @ params["w4t"].T + params["b4"].T
    return jax.nn.sigmoid(p)


if __name__ == "__main__":
    key = jax.random.PRNGKey(0)
    key, kx = jax.random.split(key)

    # Small but representative: B=256 with block_b=128 gives a 2-step grid, so
    # the x-tile pipeline is active and both TensorCores are busy on v7x.
    B = 256
    LSTM_HIDDEN = 388  # module default

    params = init_params(key, lstm_hidden_size=LSTM_HIDDEN)
    x = jax.random.normal(kx, (B, LSTM_HIDDEN), jnp.float32)

    out = decoder_forward(x, params, block_b=128)
    out = jax.block_until_ready(out)

    ref = reference_forward(x, params)
    assert out.shape == (B, 1), out.shape
    max_err = float(jnp.max(jnp.abs(out - ref)))
    assert jnp.allclose(out, ref, atol=3e-5, rtol=3e-5), max_err

    print("KERNEL_OK")
</pallas_src>

<mosaic_0001>
module attributes {stable_mosaic.version = 11 : i64} {
  func.func @_decoder_kernel(%arg0: i32, %arg1: memref<128x388xf32, #tpu.memory_space<vmem>>, %arg2: memref<388x776xf32, #tpu.memory_space<vmem>>, %arg3: memref<1x776xf32, #tpu.memory_space<vmem>>, %arg4: memref<776x28xf32, #tpu.memory_space<vmem>>, %arg5: memref<1x28xf32, #tpu.memory_space<vmem>>, %arg6: memref<28x12xf32, #tpu.memory_space<vmem>>, %arg7: memref<1x12xf32, #tpu.memory_space<vmem>>, %arg8: memref<1x12xf32, #tpu.memory_space<vmem>>, %arg9: memref<1x1xf32, #tpu.memory_space<vmem>>, %arg10: memref<1x128xf32, #tpu.memory_space<vmem>>) attributes {dimension_semantics = [#tpu.dimension_semantics<parallel>], iteration_bounds = array<i64: 2>, scalar_prefetch = 0 : i64, scratch_operands = 0 : i64, tpu.core_type = #tpu.core_type<tc>, window_params = [{transform_indices = @transform_0, window_bounds = array<i64: 128, 388>}, {pipeline_mode = #tpu.pipeline_mode<synchronous>, transform_indices = @transform_1, window_bounds = array<i64: 388, 776>}, {pipeline_mode = #tpu.pipeline_mode<synchronous>, transform_indices = @transform_2, window_bounds = array<i64: 1, 776>}, {pipeline_mode = #tpu.pipeline_mode<synchronous>, transform_indices = @transform_3, window_bounds = array<i64: 776, 28>}, {pipeline_mode = #tpu.pipeline_mode<synchronous>, transform_indices = @transform_4, window_bounds = array<i64: 1, 28>}, {pipeline_mode = #tpu.pipeline_mode<synchronous>, transform_indices = @transform_5, window_bounds = array<i64: 28, 12>}, {pipeline_mode = #tpu.pipeline_mode<synchronous>, transform_indices = @transform_6, window_bounds = array<i64: 1, 12>}, {pipeline_mode = #tpu.pipeline_mode<synchronous>, transform_indices = @transform_7, window_bounds = array<i64: 1, 12>}, {pipeline_mode = #tpu.pipeline_mode<synchronous>, transform_indices = @transform_8, window_bounds = array<i64: 1, 1>}, {transform_indices = @transform_9, window_bounds = array<i64: 1, 128>}]} {
    %c0 = arith.constant 0 : index
    %c0_0 = arith.constant 0 : index
    %0 = vector.load %arg1[%c0, %c0_0] : memref<128x388xf32, #tpu.memory_space<vmem>>, vector<128x388xf32>
    %c0_1 = arith.constant 0 : index
    %c0_2 = arith.constant 0 : index
    %1 = vector.load %arg2[%c0_1, %c0_2] : memref<388x776xf32, #tpu.memory_space<vmem>>, vector<388x776xf32>
    %cst = arith.constant dense<0.000000e+00> : vector<128x776xf32>
    %2 = tpu.matmul %0, %1, %cst {dimension_numbers = #tpu.dot_dimension_numbers<[1], [0], [0], [1], [0, 0, 1, 1], [], []>} : vector<128x388xf32>, vector<388x776xf32>, vector<128x776xf32> -> vector<128x776xf32>
    %c0_3 = arith.constant 0 : index
    %c0_4 = arith.constant 0 : index
    %3 = vector.load %arg3[%c0_3, %c0_4] : memref<1x776xf32, #tpu.memory_space<vmem>>, vector<1x776xf32>
    %4 = vector.broadcast %3 : vector<1x776xf32> to vector<128x776xf32>
    %5 = arith.addf %2, %4 : vector<128x776xf32>
    %c0_5 = arith.constant 0 : index
    %c0_6 = arith.constant 0 : index
    %6 = vector.load %arg4[%c0_5, %c0_6] : memref<776x28xf32, #tpu.memory_space<vmem>>, vector<776x28xf32>
    %cst_7 = arith.constant dense<0.000000e+00> : vector<128x28xf32>
    %7 = tpu.matmul %5, %6, %cst_7 {dimension_numbers = #tpu.dot_dimension_numbers<[1], [0], [0], [1], [0, 0, 1, 1], [], []>} : vector<128x776xf32>, vector<776x28xf32>, vector<128x28xf32> -> vector<128x28xf32>
    %c0_8 = arith.constant 0 : index
    %c0_9 = arith.constant 0 : index
    %8 = vector.load %arg5[%c0_8, %c0_9] : memref<1x28xf32, #tpu.memory_space<vmem>>, vector<1x28xf32>
    %9 = vector.broadcast %8 : vector<1x28xf32> to vector<128x28xf32>
    %10 = arith.addf %7, %9 : vector<128x28xf32>
    %c0_10 = arith.constant 0 : index
    %c0_11 = arith.constant 0 : index
    %11 = vector.load %arg6[%c0_10, %c0_11] : memref<28x12xf32, #tpu.memory_space<vmem>>, vector<28x12xf32>
    %cst_12 = arith.constant dense<0.000000e+00> : vector<128x12xf32>
    %12 = tpu.matmul %10, %11, %cst_12 {dimension_numbers = #tpu.dot_dimension_numbers<[1], [0], [0], [1], [0, 0, 1, 1], [], []>} : vector<128x28xf32>, vector<28x12xf32>, vector<128x12xf32> -> vector<128x12xf32>
    %c0_13 = arith.constant 0 : index
    %c0_14 = arith.constant 0 : index
    %13 = vector.load %arg7[%c0_13, %c0_14] : memref<1x12xf32, #tpu.memory_space<vmem>>, vector<1x12xf32>
    %14 = vector.broadcast %13 : vector<1x12xf32> to vector<128x12xf32>
    %15 = arith.addf %12, %14 : vector<128x12xf32>
    %c0_15 = arith.constant 0 : index
    %c0_16 = arith.constant 0 : index
    %16 = vector.load %arg8[%c0_15, %c0_16] : memref<1x12xf32, #tpu.memory_space<vmem>>, vector<1x12xf32>
    %17 = tpu.transpose %15, [1, 0] : vector<128x12xf32> -> vector<12x128xf32>
    %cst_17 = arith.constant dense<0.000000e+00> : vector<1x128xf32>
    %18 = tpu.matmul %16, %17, %cst_17 {dimension_numbers = #tpu.dot_dimension_numbers<[1], [0], [0], [1], [0, 0, 1, 1], [], []>} : vector<1x12xf32>, vector<12x128xf32>, vector<1x128xf32> -> vector<1x128xf32>
    %c0_18 = arith.constant 0 : index
    %c0_19 = arith.constant 0 : index
    %19 = vector.load %arg9[%c0_18, %c0_19] : memref<1x1xf32, #tpu.memory_space<vmem>>, vector<1x1xf32>
    %20 = vector.broadcast %19 : vector<1x1xf32> to vector<1x128xf32>
    %21 = arith.addf %18, %20 : vector<1x128xf32>
    %22 = arith.negf %21 : vector<1x128xf32>
    %23 = math.exp %22 : vector<1x128xf32>
    %cst_20 = arith.constant 1.000000e+00 : f32
    %24 = vector.broadcast %cst_20 : f32 to vector<1x128xf32>
    %25 = arith.addf %24, %23 : vector<1x128xf32>
    %26 = arith.divf %24, %25 : vector<1x128xf32>
    %c0_21 = arith.constant 0 : index
    %c0_22 = arith.constant 0 : index
    %27 = vector.load %arg10[%c0_21, %c0_22] : memref<1x128xf32, #tpu.memory_space<vmem>>, vector<1x128xf32>
    tpu.vector_store %arg10[%c0_21, %c0_22], %26 {strides = array<i32>} : memref<1x128xf32, #tpu.memory_space<vmem>>, vector<1x128xf32>,
    return
  }
  func.func @transform_0(%arg0: i32) -> (i32, i32) {
    %c0_i32 = arith.constant 0 : i32
    %c0_i32_0 = arith.constant 0 : i32
    return %arg0, %c0_i32 : i32, i32
  }
  func.func @transform_1(%arg0: i32) -> (i32, i32) {
    %c0_i32 = arith.constant 0 : i32
    %c0_i32_0 = arith.constant 0 : i32
    %c0_i32_1 = arith.constant 0 : i32
    return %c0_i32, %c0_i32_0 : i32, i32
  }
  func.func @transform_2(%arg0: i32) -> (i32, i32) {
    %c0_i32 = arith.constant 0 : i32
    %c0_i32_0 = arith.constant 0 : i32
    %c0_i32_1 = arith.constant 0 : i32
    return %c0_i32, %c0_i32_0 : i32, i32
  }
  func.func @transform_3(%arg0: i32) -> (i32, i32) {
    %c0_i32 = arith.constant 0 : i32
    %c0_i32_0 = arith.constant 0 : i32
    %c0_i32_1 = arith.constant 0 : i32
    return %c0_i32, %c0_i32_0 : i32, i32
  }
  func.func @transform_4(%arg0: i32) -> (i32, i32) {
    %c0_i32 = arith.constant 0 : i32
    %c0_i32_0 = arith.constant 0 : i32
    %c0_i32_1 = arith.constant 0 : i32
    return %c0_i32, %c0_i32_0 : i32, i32
  }
  func.func @transform_5(%arg0: i32) -> (i32, i32) {
    %c0_i32 = arith.constant 0 : i32
    %c0_i32_0 = arith.constant 0 : i32
    %c0_i32_1 = arith.constant 0 : i32
    return %c0_i32, %c0_i32_0 : i32, i32
  }
  func.func @transform_6(%arg0: i32) -> (i32, i32) {
    %c0_i32 = arith.constant 0 : i32
    %c0_i32_0 = arith.constant 0 : i32
    %c0_i32_1 = arith.constant 0 : i32
    return %c0_i32, %c0_i32_0 : i32, i32
  }
  func.func @transform_7(%arg0: i32) -> (i32, i32) {
    %c0_i32 = arith.constant 0 : i32
    %c0_i32_0 = arith.constant 0 : i32
    %c0_i32_1 = arith.constant 0 : i32
    return %c0_i32, %c0_i32_0 : i32, i32
  }
  func.func @transform_8(%arg0: i32) -> (i32, i32) {
    %c0_i32 = arith.constant 0 : i32
    %c0_i32_0 = arith.constant 0 : i32
    %c0_i32_1 = arith.constant 0 : i32
    return %c0_i32, %c0_i32_0 : i32, i32
  }
  func.func @transform_9(%arg0: i32) -> (i32, i32) {
    %c0_i32 = arith.constant 0 : i32
    %c0_i32_0 = arith.constant 0 : i32
    return %c0_i32, %arg0 : i32, i32
  }
}

</mosaic_0001>

<bundles_post_ra>
// kernel: decoder_forward.1
= control target key start
LH: loop header
LB: loop body
LE: loop exit
PB: predicated region body
PF: predicated region fallthrough
CT: control target
= control target key end

     0   :  { %s7036_s0 = inlined_call_operand.vmem [shape: f32[256,388], index: 0, kind: input, shape index: {}]   ;;  %s7037_s1 = inlined_call_operand.vmem [shape: f32[388,776], index: 1, kind: input, shape index: {}]   ;;  %s7038_s2 = inlined_call_operand.vmem [shape: f32[1,776], index: 2, kind: input, shape index: {}]   ;;  %s7039_s3 = inlined_call_operand.vmem [shape: f32[776,28], index: 3, kind: input, shape index: {}]   ;;  %s7040_s4 = inlined_call_operand.vmem [shape: f32[1,28], index: 4, kind: input, shape index: {}]   ;;  %s7041_s5 = inlined_call_operand.vmem [shape: f32[28,12], index: 5, kind: input, shape index: {}]   ;;  %s7042_s6 = inlined_call_operand.vmem [shape: f32[1,12], index: 6, kind: input, shape index: {}]   ;;  %s7043_s7 = inlined_call_operand.vmem [shape: f32[1,12], index: 7, kind: input, shape index: {}]   ;;  %s7044_s8 = inlined_call_operand.<no memory space> [shape: f32[1,1], index: 8, kind: input, shape index: {}]   ;;  %s7045_s9 = inlined_call_operand.hbm [shape: f32[1,256], index: 9, kind: output, shape index: {}]  }
   0x1   :  { %v14_v0 = vstv %s7044_s8 }
   0x2   :  { %15 = vst [vmem:[#allocation2] sm:$0x1] %v14_v0 }
   0x3   :  { %16 = vsyncpa [#allocation4], 0 }
   0x4   :  { %18 = vsyncpa [#allocation4 + $0x1], 0  ;;  %s4090_s11 = smov 0   ;;  %s4092_s12 = smov 0  }
   0x5   :  { %s4094_s13 = smov 0   ;;  %s4096_s14 = smov 0  }
   0x6 LB: > { %s3256_s8 = sadd.s32 4294967295, %s4031_s14   ;;  %s3257_s15 = sadd.s32 4294967294, %s4031_s14   ;;  %s4031_s14 = sphi %s4096_s14, %s7187_s14   ;;  %s4027_s13 = sphi %s4094_s13, %s7186_s13   ;;  %s4023_s12 = sphi %s4092_s12, %s7185_s12   ;;  %s4019_s11 = sphi %s4090_s11, %s7184_s11  }
   0x7   : > { %s4113_s16 = sadd.s32 1, %s4031_s14   ;;  %s225_s17 = sadd.s32 1, %s4027_s13 }
   0x8   : > { %s222_s18 = ssub.s32 %s4031_s14, %s4113_s16  ;;  %p235_p0 = scmp.ne.s32.totalorder %s4027_s13, %s4023_s12 }
   0x9   : > { %p223_p1 = scmp.eq.s32.totalorder %s222_s18, 0  ;;  %p236_p2 = scmp.eq.s32.totalorder %s3256_s8, 1 }
   0xa   : > { %p241_p3 = scmp.ne.s32.totalorder %s4023_s12, %s4019_s11  ;;  %p242_p4 = scmp.eq.s32.totalorder %s3257_s15, 1 }
   0xb   : > { %s4125_s19 = scalar_select %p223_p1, %s4027_s13, %s225_s17  }
   0xc   : > { %p4127_p5 = por %p236_p2, %p235_p0  ;;  %p4131_p6 = por %p242_p4, %p241_p3 }
   0xd   : > { %p3260_p7 = scmp.ge.s32.totalorder %s4031_s14, 1  ;;  %p294_p8 = scmp.lt.s32.totalorder %s4031_s14, 3 }
   0xf   : > { %p295_p9 = pnand %p3260_p7, %p294_p8 }
  0x11   : > { %298 = sbr.rel (%p295_p9) target bundleno = 1267 (0x4f3), region = 56 }
  0x16   : > { %v507_v1 = vld [vmem:[%s7037_s1 + $0x350] sm:$0xff]  ;;  %v506_v3 = vld [vmem:[%s7037_s1 + $0x348] sm:$0xff]  ;;  %v500_v5 = vld [vmem:[%s7037_s1 + $0x318] sm:$0xff]  ;;  %s4247_s29 = sshll.u32 %s3256_s8, 4  ;;  %vm830_vm0 = vcmask 1043456   ;;  %vm781_vm1 = vcmask 31744  }
  0x17   : > { %v731_v2 = vld [vmem:[%s7037_s1 + $0xa50] sm:$0xff]  ;;  %852 = vmatprep.subr.mxu0 %v507_v1  ;;  %v730_v4 = vld [vmem:[%s7037_s1 + $0xa48] sm:$0xff]  ;;  %v724_v6 = vld [vmem:[%s7037_s1 + $0xa18] sm:$0xff]  ;;  %p331_p10 = scmp.lt.s32.totalorder %s4247_s29, 31  ;;  %vm2212_vm2 = vcmask 64512   ;;  %vm2852_vm3 = vcmask 228352   ;;  %s7001_s23 = scalar_lea.hbm %s7045_s9, %s4247_s29 }
  0x18   : > { %1013 = vmatprep.subr.mxu1 %v731_v2  ;;  %853 = vmatpush1.msra.mxu0 %v506_v3  ;;  %v499_v7 = vld [vmem:[%s7037_s1 + $0x310] sm:$0xff]  ;;  %v493_v9 = vld [vmem:[%s7037_s1 + $0x2e0] sm:$0xff]  ;;  %v492_v11 = vld [vmem:[%s7037_s1 + $0x2d8] sm:$0xff]  ;;  %vm4034_vm4 = vmmov 0   ;;  %vm3060_vm5 = vcmask 97280   ;;  %s4036_s27 = smov [#allocation3]  }
  0x19   : > { %1014 = vmatpush1.msra.mxu1 %v730_v4  ;;  %v723_v8 = vld [vmem:[%s7037_s1 + $0xa10] sm:$0xff]  ;;  %854 = vmatprep.subr.mxu0 %v500_v5  ;;  %v717_v10 = vld [vmem:[%s7037_s1 + $0x9e0] sm:$0xff]  ;;  %v716_v12 = vld [vmem:[%s7037_s1 + $0x9d8] sm:$0xff]  ;;  %s4295_s15 = scalar_select %p331_p10, %s4247_s29, 31 }
  0x1a   : > { %1015 = vmatprep.subr.mxu1 %v724_v6  ;;  %855 = vmatpush1.msra.mxu0 %v499_v7  ;;  %v486_v13 = vld [vmem:[%s7037_s1 + $0x2a8] sm:$0xff]  ;;  %v485_v15 = vld [vmem:[%s7037_s1 + $0x2a0] sm:$0xff]  ;;  %v479_v17 = vld [vmem:[%s7037_s1 + $0x270] sm:$0xff]  ;;  %s3975_s28 = sshll.u32 %s4036_s27, 4  ;;  %s3976_s28 = int_to_ptr.vmem [resolvable:$false] %s3975_s28 }
  0x1b   : > { %1016 = vmatpush1.msra.mxu1 %v723_v8  ;;  %v710_v14 = vld [vmem:[%s7037_s1 + $0x9a8] sm:$0xff]  ;;  %856 = vmatprep.subr.mxu0 %v493_v9  ;;  %v709_v16 = vld [vmem:[%s7037_s1 + $0x9a0] sm:$0xff]  ;;  %v703_v18 = vld [vmem:[%s7037_s1 + $0x970] sm:$0xff]  ;;  %s3391_s8 = sshll.u32 %s4295_s15, 5  ;;  %s328_s15 = sand.u32 1, %s4023_s12  }
  0x1c   : > { %1017 = vmatprep.subr.mxu1 %v717_v10  ;;  %857 = vmatpush1.msra.mxu0 %v492_v11  ;;  %v478_v19 = vld [vmem:[%s7037_s1 + $0x268] sm:$0xff]  ;;  %v472_v21 = vld [vmem:[%s7037_s1 + $0x238] sm:$0xff]  ;;  %v471_v23 = vld [vmem:[%s7037_s1 + $0x230] sm:$0xff]  ;;  %s4343_s26 = scalar_lea.vmem %s7036_s0, %s3391_s8  ;;  %s329_s8 = scalar_lea.vmem [#allocation3], %s328_s15 }
  0x1d   : > { %1018 = vmatpush1.msra.mxu1 %v716_v12  ;;  %858 = vmatprep.subr.mxu0 %v486_v13  ;;  %v702_v20 = vld [vmem:[%s7037_s1 + $0x968] sm:$0xff]  ;;  %v696_v22 = vld [vmem:[%s7037_s1 + $0x938] sm:$0xff]  ;;  %v695_v24 = vld [vmem:[%s7037_s1 + $0x930] sm:$0xff]  ;;  %s3202_s18 = sshll.u32 %s329_s8, 4  ;;  %s3190_s24 = scalar_lea.sflag [#allocation4], %s328_s15  ;;  %s3203_s18 = int_to_ptr.vmem [resolvable:$true] %s3202_s18 }
  0x1e   : > { %1019 = vmatprep.subr.mxu1 %v710_v14  ;;  %859 = vmatpush1.msra.mxu0 %v485_v15  ;;  %v465_v25 = vld [vmem:[%s7037_s1 + $0x200] sm:$0xff]  ;;  %v464_v27 = vld [vmem:[%s7037_s1 + $0x1f8] sm:$0xff]  ;;  %v458_v29 = vld [vmem:[%s7037_s1 + $0x1c8] sm:$0xff]  ;;  %s3971_s25 = scalar_lea.vmem %s3203_s18, 16  ;;  %s3977_s30 = scalar_lea.vmem %s3976_s28, 32 }
  0x1f   : > { %1020 = vmatpush1.msra.mxu1 %v709_v16  ;;  %860 = vmatprep.subr.mxu0 %v479_v17  ;;  %v689_v26 = vld [vmem:[%s7037_s1 + $0x900] sm:$0xff]  ;;  %v688_v28 = vld [vmem:[%s7037_s1 + $0x8f8] sm:$0xff]  ;;  %v682_v30 = vld [vmem:[%s7037_s1 + $0x8c8] sm:$0xff]  ;;  %p3972_p11 = scmp.ne.s32.totalorder %s3203_s18, %s3971_s25  ;;  %p3978_p0 = scmp.lt.s32.totalorder %s3203_s18, %s3976_s28 }
  0x20   : > { %1021 = vmatprep.subr.mxu1 %v703_v18  ;;  %861 = vmatpush1.msra.mxu0 %v478_v19  ;;  %v457_v31 = vld [vmem:[%s7037_s1 + $0x1c0] sm:$0xff]  ;;  %v451_v33 = vld [vmem:[%s7037_s1 + $0x190] sm:$0xff]  ;;  %v450_v35 = vld [vmem:[%s7037_s1 + $0x188] sm:$0xff]  ;;  %p3979_p1 = scmp.lt.s32.totalorder %s3977_s30, %s3971_s25 }
  0x21   : > { %1022 = vmatpush1.msra.mxu1 %v702_v20  ;;  %862 = vmatprep.subr.mxu0 %v472_v21  ;;  %v681_v32 = vld [vmem:[%s7037_s1 + $0x8c0] sm:$0xff]  ;;  %v675_v34 = vld [vmem:[%s7037_s1 + $0x890] sm:$0xff]  ;;  %v674_v36 = vld [vmem:[%s7037_s1 + $0x888] sm:$0xff]  ;;  %p3973_p12 = pnand %p3972_p11, %p4127_p5 }
  0x22   : > { %1023 = vmatprep.subr.mxu1 %v696_v22  ;;  %863 = vmatpush1.msra.mxu0 %v471_v23  ;;  %v444_v37 = vld [vmem:[%s7037_s1 + $0x158] sm:$0xff]  ;;  %v443_v39 = vld [vmem:[%s7037_s1 + $0x150] sm:$0xff]  ;;  %v437_v41 = vld [vmem:[%s7037_s1 + $0x120] sm:$0xff]  ;;  %p3980_p2 = por %p3979_p1, %p3978_p0 }
  0x23   : > { %1024 = vmatpush1.msra.mxu1 %v695_v24  ;;  %864 = vmatprep.subr.mxu0 %v465_v25  ;;  %v668_v38 = vld [vmem:[%s7037_s1 + $0x858] sm:$0xff]  ;;  %v667_v40 = vld [vmem:[%s7037_s1 + $0x850] sm:$0xff]  ;;  %v661_v42 = vld [vmem:[%s7037_s1 + $0x820] sm:$0xff]  ;;  %p3974_p13 = pneg %p3973_p12 }
  0x24   : > { %1025 = vmatprep.subr.mxu1 %v689_v26  ;;  %865 = vmatpush1.msra.mxu0 %v464_v27  ;;  %v436_v43 = vld [vmem:[%s7037_s1 + $0x118] sm:$0xff]  ;;  %v430_v45 = vld [vmem:[%s7037_s1 + $0xe8] sm:$0xff]  ;;  %v429_v47 = vld [vmem:[%s7037_s1 + $0xe0] sm:$0xff] }
  0x25   : > { %1026 = vmatpush1.msra.mxu1 %v688_v28  ;;  %866 = vmatprep.subr.mxu0 %v458_v29  ;;  %v660_v44 = vld [vmem:[%s7037_s1 + $0x818] sm:$0xff]  ;;  %v654_v46 = vld [vmem:[%s7037_s1 + $0x7e8] sm:$0xff]  ;;  %v653_v48 = vld [vmem:[%s7037_s1 + $0x7e0] sm:$0xff]  ;;  %p3981_p3 = pnand %p3980_p2, %p3974_p13 }
  0x26   : > { %1027 = vmatprep.subr.mxu1 %v682_v30  ;;  %867 = vmatpush1.msra.mxu0 %v457_v31  ;;  %v423_v49 = vld [vmem:[%s7037_s1 + $0xb0] sm:$0xff]  ;;  %v422_v51 = vld [vmem:[%s7037_s1 + $0xa8] sm:$0xff]  ;;  %v416_v53 = vld [vmem:[%s7037_s1 + $0x78] sm:$0xff] }
  0x27   : > { %1028 = vmatpush1.msra.mxu1 %v681_v32  ;;  %868 = vmatprep.subr.mxu0 %v451_v33  ;;  %v647_v50 = vld [vmem:[%s7037_s1 + $0x7b0] sm:$0xff]  ;;  %v646_v52 = vld [vmem:[%s7037_s1 + $0x7a8] sm:$0xff]  ;;  %v640_v54 = vld [vmem:[%s7037_s1 + $0x778] sm:$0xff] }
  0x28   : > { %1029 = vmatprep.subr.mxu1 %v675_v34  ;;  %869 = vmatpush1.msra.mxu0 %v450_v35  ;;  %v415_v55 = vld [vmem:[%s7037_s1 + $0x70] sm:$0xff]  ;;  %v409_v57 = vld [vmem:[%s7037_s1 + $0x40] sm:$0xff]  ;;  %v408_v59 = vld [vmem:[%s7037_s1 + $0x38] sm:$0xff] }
  0x29   : > { %1030 = vmatpush1.msra.mxu1 %v674_v36  ;;  %870 = vmatprep.subr.mxu0 %v444_v37  ;;  %v639_v56 = vld [vmem:[%s7037_s1 + $0x770] sm:$0xff]  ;;  %v633_v58 = vld [vmem:[%s7037_s1 + $0x740] sm:$0xff]  ;;  %v632_v60 = vld [vmem:[%s7037_s1 + $0x738] sm:$0xff] }
  0x2a   : > { %1031 = vmatprep.subr.mxu1 %v668_v38  ;;  %871 = vmatpush1.msra.mxu0 %v443_v39  ;;  %v402_v61 = vld [vmem:[%s7037_s1 + $0x8] sm:$0xff]  ;;  %v401_v63 = vld [vmem:[%s7037_s1] sm:$0xff]  ;;  %v619_v1 = vld [vmem:[%s7037_s1 + $0x6d0] sm:$0xff] }
  0x2b   : > { %1032 = vmatpush1.msra.mxu1 %v667_v40  ;;  %872 = vmatprep.subr.mxu0 %v437_v41  ;;  %v626_v62 = vld [vmem:[%s7037_s1 + $0x708] sm:$0xff]  ;;  %v625_v0 = vld [vmem:[%s7037_s1 + $0x700] sm:$0xff]  ;;  %v4358_v5 = vld [vmem:[%s4343_s26 + $0x18] sm:$0xff] }
  0x2c   : > { %1033 = vmatprep.subr.mxu1 %v661_v42  ;;  %873 = vmatpush1.msra.mxu0 %v436_v43  ;;  %v738_v2 = vld [vmem:[%s7037_s1 + $0xa88] sm:$0xf]  ;;  %v737_v4 = vld [vmem:[%s7037_s1 + $0xa80] sm:$0xf]  ;;  %v612_v6 = vld [vmem:[%s7037_s1 + $0x698] sm:$0xff] }
  0x2d   : > { %1034 = vmatpush1.msra.mxu1 %v660_v44  ;;  %874 = vmatprep.subr.mxu0 %v430_v45  ;;  %v618_v3 = vld [vmem:[%s7037_s1 + $0x6c8] sm:$0xff]  ;;  %v4365_v7 = vld [vmem:[%s4343_s26 + $0x10] sm:$0xff]  ;;  %v509_v8 = vld [vmem:[%s7037_s1 + $0x360] sm:$0xff] }
  0x2e   : > { %1035 = vmatprep.subr.mxu1 %v654_v46  ;;  %875 = vmatpush1.msra.mxu0 %v429_v47  ;;  %v611_v9 = vld [vmem:[%s7037_s1 + $0x690] sm:$0xff]  ;;  %v508_v10 = vld [vmem:[%s7037_s1 + $0x358] sm:$0xff]  ;;  %v605_v11 = vld [vmem:[%s7037_s1 + $0x660] sm:$0xff] }
  0x2f   : > { %1036 = vmatpush1.msra.mxu1 %v653_v48  ;;  %876 = vmatprep.subr.mxu0 %v423_v49  ;;  %v502_v12 = vld [vmem:[%s7037_s1 + $0x328] sm:$0xff]  ;;  %v604_v13 = vld [vmem:[%s7037_s1 + $0x658] sm:$0xff]  ;;  %v501_v15 = vld [vmem:[%s7037_s1 + $0x320] sm:$0xff] }
  0x30   : > { %1037 = vmatprep.subr.mxu1 %v647_v50  ;;  %877 = vmatpush1.msra.mxu0 %v422_v51  ;;  %v4390_v14 = vld [vmem:[%s4343_s26 + $0x38] sm:$0xff]  ;;  %v598_v16 = vld [vmem:[%s7037_s1 + $0x628] sm:$0xff]  ;;  %v4399_v17 = vld [vmem:[%s4343_s26 + $0x30] sm:$0xff] }
  0x31   : > { %1038 = vmatpush1.msra.mxu1 %v646_v52  ;;  %878 = vmatprep.subr.mxu0 %v416_v53  ;;  %v495_v18 = vld [vmem:[%s7037_s1 + $0x2f0] sm:$0xff]  ;;  %v597_v19 = vld [vmem:[%s7037_s1 + $0x620] sm:$0xff]  ;;  %v494_v20 = vld [vmem:[%s7037_s1 + $0x2e8] sm:$0xff] }
  0x32   : > { %1039 = vmatprep.subr.mxu1 %v640_v54  ;;  %879 = vmatpush1.msra.mxu0 %v415_v55  ;;  %v591_v21 = vld [vmem:[%s7037_s1 + $0x5f0] sm:$0xff]  ;;  %v488_v22 = vld [vmem:[%s7037_s1 + $0x2b8] sm:$0xff]  ;;  %v590_v23 = vld [vmem:[%s7037_s1 + $0x5e8] sm:$0xff] }
  0x33   : > { %1040 = vmatpush1.msra.mxu1 %v639_v56  ;;  %880 = vmatprep.subr.mxu0 %v409_v57  ;;  %v4423_v24 = vld [vmem:[%s4343_s26 + $0x58] sm:$0xff]  ;;  %v487_v25 = vld [vmem:[%s7037_s1 + $0x2b0] sm:$0xff]  ;;  %v481_v28 = vld [vmem:[%s7037_s1 + $0x280] sm:$0xff] }
  0x34   : > { %1041 = vmatprep.subr.mxu1 %v633_v58  ;;  %881 = vmatpush1.msra.mxu0 %v408_v59  ;;  %v584_v26 = vld [vmem:[%s7037_s1 + $0x5b8] sm:$0xff]  ;;  %v4432_v27 = vld [vmem:[%s4343_s26 + $0x50] sm:$0xff]  ;;  %v577_v31 = vld [vmem:[%s7037_s1 + $0x580] sm:$0xff] }
  0x35   : > { %1042 = vmatpush1.msra.mxu1 %v632_v60  ;;  %882 = vmatprep.subr.mxu0 %v402_v61  ;;  %v583_v29 = vld [vmem:[%s7037_s1 + $0x5b0] sm:$0xff]  ;;  %v480_v30 = vld [vmem:[%s7037_s1 + $0x278] sm:$0xff]  ;;  %v474_v32 = vld [vmem:[%s7037_s1 + $0x248] sm:$0xff] }
  0x36   : > { %1043 = vmatprep.subr.mxu1 %v626_v62  ;;  %883 = vmatpush1.msra.mxu0 %v401_v63  ;;  %v576_v33 = vld [vmem:[%s7037_s1 + $0x578] sm:$0xff]  ;;  %v473_v35 = vld [vmem:[%s7037_s1 + $0x240] sm:$0xff]  ;;  %v570_v36 = vld [vmem:[%s7037_s1 + $0x548] sm:$0xff] }
  0x37   : > { %1044 = vmatpush1.msra.mxu1 %v625_v0  ;;  %884 = vmatprep.subr.mxu0 %v619_v1  ;;  %v4456_v34 = vld [vmem:[%s4343_s26 + $0x78] sm:$0xff]  ;;  %v4465_v37 = vld [vmem:[%s4343_s26 + $0x70] sm:$0xff]  ;;  %v569_v39 = vld [vmem:[%s7037_s1 + $0x540] sm:$0xff] }
  0x38   : > { %3264 = vmatprep.subr.msk.mxu1 %vm830_vm0, %v738_v2  ;;  %885 = vmatpush2.msra.mxu0 %v618_v3  ;;  %v467_v38 = vld [vmem:[%s7037_s1 + $0x210] sm:$0xff]  ;;  %v466_v40 = vld [vmem:[%s7037_s1 + $0x208] sm:$0xff]  ;;  %v460_v42 = vld [vmem:[%s7037_s1 + $0x1d8] sm:$0xff] }
  0x39   : > { %3265 = vmatpush2.msk.msra.mxu1 %vm830_vm0, %v737_v4  ;;  %3266 = vmatprep.mubr.msk.f32.mxu1 %vm781_vm1, %v4358_v5  ;;  %v563_v41 = vld [vmem:[%s7037_s1 + $0x510] sm:$0xff]  ;;  %v562_v43 = vld [vmem:[%s7037_s1 + $0x508] sm:$0xff]  ;;  %v4489_v44 = vld [vmem:[%s4343_s26 + $0x98] sm:$0xff] }
  0x3a   : > { %886 = vmatprep.subr.mxu0 %v612_v6  ;;  %1078 = vmatmul.mubr.f32.vlgmr.msra.gmra.mxu1 %v4365_v7  ;;  %v459_v45 = vld [vmem:[%s7037_s1 + $0x1d0] sm:$0xff]  ;;  %v556_v46 = vld [vmem:[%s7037_s1 + $0x4d8] sm:$0xff]  ;;  %v453_v48 = vld [vmem:[%s7037_s1 + $0x1a0] sm:$0xff] }
  0x3b   : > { %1174 = vmatprep.subr.mxu1 %v509_v8  ;;  %887 = vmatpush2.msra.mxu0 %v611_v9  ;;  %v4498_v47 = vld [vmem:[%s4343_s26 + $0x90] sm:$0xff]  ;;  %v452_v50 = vld [vmem:[%s7037_s1 + $0x198] sm:$0xff]  ;;  %v549_v51 = vld [vmem:[%s7037_s1 + $0x4a0] sm:$0xff] }
  0x3c   : > { %1175 = vmatpush1.msra.mxu1 %v508_v10  ;;  %888 = vmatprep.subr.mxu0 %v605_v11  ;;  %v555_v49 = vld [vmem:[%s7037_s1 + $0x4d0] sm:$0xff]  ;;  %v446_v52 = vld [vmem:[%s7037_s1 + $0x168] sm:$0xff]  ;;  %v548_v53 = vld [vmem:[%s7037_s1 + $0x498] sm:$0xff] }
  0x3d   : > { %1176 = vmatprep.subr.mxu1 %v502_v12  ;;  %889 = vmatpush2.msra.mxu0 %v604_v13  ;;  %v4522_v54 = vld [vmem:[%s4343_s26 + $0xb8] sm:$0xff]  ;;  %v445_v55 = vld [vmem:[%s7037_s1 + $0x160] sm:$0xff]  ;;  %v542_v56 = vld [vmem:[%s7037_s1 + $0x468] sm:$0xff] }
  0x3e   : > { %3267 = vmatprep.mubr.msk.f32.mxu1 %vm781_vm1, %v4390_v14  ;;  %1177 = vmatpush1.msra.mxu1 %v501_v15  ;;  %v4531_v57 = vld [vmem:[%s4343_s26 + $0xb0] sm:$0xff]  ;;  %v541_v59 = vld [vmem:[%s7037_s1 + $0x460] sm:$0xff]  ;;  %v438_v60 = vld [vmem:[%s7037_s1 + $0x128] sm:$0xff] }
  0x3f   : > { %890 = vmatprep.subr.mxu0 %v598_v16  ;;  %1084 = vmatmul.mubr.f32.gmra.mxu1 %v4399_v17  ;;  %v439_v58 = vld [vmem:[%s7037_s1 + $0x130] sm:$0xff]  ;;  %v432_v62 = vld [vmem:[%s7037_s1 + $0xf8] sm:$0xff]  ;;  %v534_v63 = vld [vmem:[%s7037_s1 + $0x428] sm:$0xff] }
  0x40   : > { %1178 = vmatprep.subr.mxu1 %v495_v18  ;;  %891 = vmatpush2.msra.mxu0 %v597_v19  ;;  %v535_v61 = vld [vmem:[%s7037_s1 + $0x430] sm:$0xff]  ;;  %v4555_v0 = vld [vmem:[%s4343_s26 + $0xd8] sm:$0xff]  ;;  %v425_v4 = vld [vmem:[%s7037_s1 + $0xc0] sm:$0xff] }
  0x41   : > { %1179 = vmatpush1.msra.mxu1 %v494_v20  ;;  %892 = vmatprep.subr.mxu0 %v591_v21  ;;  %v431_v1 = vld [vmem:[%s7037_s1 + $0xf0] sm:$0xff]  ;;  %v528_v2 = vld [vmem:[%s7037_s1 + $0x3f8] sm:$0xff]  ;;  %v521_v9 = vld [vmem:[%s7037_s1 + $0x3c0] sm:$0xff] }
  0x42   : > { %1180 = vmatprep.subr.mxu1 %v488_v22  ;;  %893 = vmatpush2.msra.mxu0 %v590_v23  ;;  %v4564_v3 = vld [vmem:[%s4343_s26 + $0xd0] sm:$0xff]  ;;  %v424_v8 = vld [vmem:[%s7037_s1 + $0xb8] sm:$0xff]  ;;  %v418_v10 = vld [vmem:[%s7037_s1 + $0x88] sm:$0xff] }
  0x43   : > { %3268 = vmatprep.mubr.msk.f32.mxu1 %vm781_vm1, %v4423_v24  ;;  %1181 = vmatpush1.msra.mxu1 %v487_v25  ;;  %v527_v6 = vld [vmem:[%s7037_s1 + $0x3f0] sm:$0xff]  ;;  %v520_v11 = vld [vmem:[%s7037_s1 + $0x3b8] sm:$0xff]  ;;  %v417_v13 = vld [vmem:[%s7037_s1 + $0x80] sm:$0xff] }
  0x44   : > { %894 = vmatprep.subr.mxu0 %v584_v26  ;;  %1090 = vmatmul.mubr.f32.gmra.mxu1 %v4432_v27  ;;  %v4588_v12 = vld [vmem:[%s4343_s26 + $0xf8] sm:$0xff]  ;;  %v514_v15 = vld [vmem:[%s7037_s1 + $0x388] sm:$0xff]  ;;  %v4597_v16 = vld [vmem:[%s4343_s26 + $0xf0] sm:$0xff] }
  0x45   : > { %1182 = vmatprep.subr.mxu1 %v481_v28  ;;  %895 = vmatpush2.msra.mxu0 %v583_v29  ;;  %v411_v18 = vld [vmem:[%s7037_s1 + $0x50] sm:$0xff]  ;;  %v513_v19 = vld [vmem:[%s7037_s1 + $0x380] sm:$0xff]  ;;  %v4608_v20 = vld [vmem:[%s4343_s26 + $0x8] sm:$0xff] }
  0x46   : > { %1183 = vmatpush1.msra.mxu1 %v480_v30  ;;  %896 = vmatprep.subr.mxu0 %v577_v31  ;;  %v410_v21 = vld [vmem:[%s7037_s1 + $0x48] sm:$0xff]  ;;  %v4614_v22 = vld [vmem:[%s4343_s26] sm:$0xff]  ;;  %v404_v23 = vld [vmem:[%s7037_s1 + $0x18] sm:$0xff] }
  0x47   : > { %1184 = vmatprep.subr.mxu1 %v474_v32  ;;  %897 = vmatpush2.msra.mxu0 %v576_v33  ;;  %v733_v25 = vld [vmem:[%s7037_s1 + $0xa60] sm:$0xff]  ;;  %v4625_v26 = vld [vmem:[%s4343_s26 + $0x118] sm:$0xff]  ;;  %v403_v28 = vld [vmem:[%s7037_s1 + $0x10] sm:$0xff] }
  0x48   : > { %3269 = vmatprep.mubr.msk.f32.mxu1 %vm781_vm1, %v4456_v34  ;;  %1185 = vmatpush1.msra.mxu1 %v473_v35  ;;  %v732_v29 = vld [vmem:[%s7037_s1 + $0xa58] sm:$0xff]  ;;  %v4635_v30 = vld [vmem:[%s4343_s26 + $0x110] sm:$0xff]  ;;  %v621_v31 = vld [vmem:[%s7037_s1 + $0x6e0] sm:$0xff] }
  0x49   : > { %898 = vmatprep.subr.mxu0 %v570_v36  ;;  %1096 = vmatmul.mubr.f32.gmra.mxu1 %v4465_v37  ;;  %v4641_v32 = vld [vmem:[%s4343_s26 + $0x28] sm:$0xff]  ;;  %v620_v33 = vld [vmem:[%s7037_s1 + $0x6d8] sm:$0xff]  ;;  %v4649_v35 = vld [vmem:[%s4343_s26 + $0x20] sm:$0xff] }
  0x4a   : > { %1186 = vmatprep.subr.mxu1 %v467_v38  ;;  %899 = vmatpush2.msra.mxu0 %v569_v39  ;;  %v614_v36 = vld [vmem:[%s7037_s1 + $0x6a8] sm:$0xff]  ;;  %v4660_v39 = vld [vmem:[%s4343_s26 + $0x138] sm:$0xff] }
  0x4b   : > { %1187 = vmatpush1.msra.mxu1 %v466_v40  ;;  %900 = vmatprep.subr.mxu0 %v563_v41  ;;  %v726_v38 = vld [vmem:[%s7037_s1 + $0xa28] sm:$0xff]  ;;  %v613_v40 = vld [vmem:[%s7037_s1 + $0x6a0] sm:$0xff] }
  0x4c   : > { %1188 = vmatprep.subr.mxu1 %v460_v42  ;;  %901 = vmatpush2.msra.mxu0 %v562_v43  ;;  %v725_v41 = vld [vmem:[%s7037_s1 + $0xa20] sm:$0xff]  ;;  %v4670_v42 = vld [vmem:[%s4343_s26 + $0x130] sm:$0xff] }
  0x4d   : > { %3270 = vmatprep.mubr.msk.f32.mxu1 %vm781_vm1, %v4489_v44  ;;  %1189 = vmatpush1.msra.mxu1 %v459_v45  ;;  %v607_v43 = vld [vmem:[%s7037_s1 + $0x670] sm:$0xff]  ;;  %v4676_v45 = vld [vmem:[%s4343_s26 + $0x48] sm:$0xff] }
  0x4e   : > { %902 = vmatprep.subr.mxu0 %v556_v46  ;;  %1102 = vmatmul.mubr.f32.gmra.mxu1 %v4498_v47  ;;  %v606_v46 = vld [vmem:[%s7037_s1 + $0x668] sm:$0xff] }
  0x4f   : > { %1190 = vmatprep.subr.mxu1 %v453_v48  ;;  %903 = vmatpush2.msra.mxu0 %v555_v49  ;;  %v4684_v48 = vld [vmem:[%s4343_s26 + $0x40] sm:$0xff]  ;;  %v600_v49 = vld [vmem:[%s7037_s1 + $0x638] sm:$0xff] }
  0x50   : > { %1191 = vmatpush1.msra.mxu1 %v452_v50  ;;  %904 = vmatprep.subr.mxu0 %v549_v51  ;;  %v719_v50 = vld [vmem:[%s7037_s1 + $0x9f0] sm:$0xff]  ;;  %v4695_v51 = vld [vmem:[%s4343_s26 + $0x158] sm:$0xff] }
  0x51   : > { %1192 = vmatprep.subr.mxu1 %v446_v52  ;;  %905 = vmatpush2.msra.mxu0 %v548_v53  ;;  %v599_v52 = vld [vmem:[%s7037_s1 + $0x630] sm:$0xff]  ;;  %v718_v53 = vld [vmem:[%s7037_s1 + $0x9e8] sm:$0xff] }
  0x52   : > { %3271 = vmatprep.mubr.msk.f32.mxu1 %vm781_vm1, %v4522_v54  ;;  %1193 = vmatpush1.msra.mxu1 %v445_v55  ;;  %v4705_v55 = vld [vmem:[%s4343_s26 + $0x150] sm:$0xff] }
  0x53   : > { %906 = vmatprep.subr.mxu0 %v542_v56  ;;  %1108 = vmatmul.mubr.f32.gmra.mxu1 %v4531_v57  ;;  %v593_v56 = vld [vmem:[%s7037_s1 + $0x600] sm:$0xff] }
  0x54   : > { %1194 = vmatprep.subr.mxu1 %v439_v58  ;;  %907 = vmatpush2.msra.mxu0 %v541_v59  ;;  %v4711_v58 = vld [vmem:[%s4343_s26 + $0x68] sm:$0xff]  ;;  %v592_v59 = vld [vmem:[%s7037_s1 + $0x5f8] sm:$0xff] }
  0x55   : > { %1195 = vmatpush1.msra.mxu1 %v438_v60  ;;  %908 = vmatprep.subr.mxu0 %v535_v61  ;;  %v4719_v60 = vld [vmem:[%s4343_s26 + $0x60] sm:$0xff]  ;;  %v586_v61 = vld [vmem:[%s7037_s1 + $0x5c8] sm:$0xff] }
  0x56   : > { %1196 = vmatprep.subr.mxu1 %v432_v62  ;;  %909 = vmatpush2.msra.mxu0 %v534_v63  ;;  %v712_v62 = vld [vmem:[%s7037_s1 + $0x9b8] sm:$0xff] }
  0x57   : > { %3272 = vmatprep.mubr.msk.f32.mxu1 %vm781_vm1, %v4555_v0  ;;  %1197 = vmatpush1.msra.mxu1 %v431_v1  ;;  %v4730_v63 = vld [vmem:[%s4343_s26 + $0x178] sm:$0xff]  ;;  %v585_v1 = vld [vmem:[%s7037_s1 + $0x5c0] sm:$0xff] }
  0x58   : > { %910 = vmatprep.subr.mxu0 %v528_v2  ;;  %1114 = vmatmul.mubr.f32.gmra.mxu1 %v4564_v3  ;;  %v711_v2 = vld [vmem:[%s7037_s1 + $0x9b0] sm:$0xff] }
  0x59   : > { %1198 = vmatprep.subr.mxu1 %v425_v4  ;;  %911 = vmatpush2.msra.mxu0 %v527_v6  ;;  %v4740_v4 = vld [vmem:[%s4343_s26 + $0x170] sm:$0xff] }
  0x5a   : > { %1199 = vmatpush1.msra.mxu1 %v424_v8  ;;  %912 = vmatprep.subr.mxu0 %v521_v9  ;;  %v579_v6 = vld [vmem:[%s7037_s1 + $0x590] sm:$0xff]  ;;  %v4746_v8 = vld [vmem:[%s4343_s26 + $0x88] sm:$0xff] }
  0x5b   : > { %1200 = vmatprep.subr.mxu1 %v418_v10  ;;  %913 = vmatpush2.msra.mxu0 %v520_v11  ;;  %v578_v9 = vld [vmem:[%s7037_s1 + $0x588] sm:$0xff]  ;;  %v4754_v10 = vld [vmem:[%s4343_s26 + $0x80] sm:$0xff]  ;;  %v572_v11 = vld [vmem:[%s7037_s1 + $0x558] sm:$0xff] }
  0x5c   : > { %3273 = vmatprep.mubr.msk.f32.mxu1 %vm781_vm1, %v4588_v12  ;;  %1201 = vmatpush1.msra.mxu1 %v417_v13  ;;  %v705_v13 = vld [vmem:[%s7037_s1 + $0x980] sm:$0xff] }
  0x5d   : > { %914 = vmatprep.subr.mxu0 %v514_v15  ;;  %1120 = vmatmul.mubr.f32.gmra.mxu1 %v4597_v16  ;;  %v4765_v15 = vld [vmem:[%s4343_s26 + $0x198] sm:$0xff] }
  0x5e   : > { %1202 = vmatprep.subr.mxu1 %v411_v18  ;;  %915 = vmatpush2.msra.mxu0 %v513_v19  ;;  %v571_v18 = vld [vmem:[%s7037_s1 + $0x550] sm:$0xff]  ;;  %v704_v19 = vld [vmem:[%s7037_s1 + $0x978] sm:$0xff] }
  0x5f   : > { %916 = vmatprep.mubr.f32.mxu0 %v4608_v20  ;;  %1203 = vmatpush1.msra.mxu1 %v410_v21  ;;  %v4775_v21 = vld [vmem:[%s4343_s26 + $0x190] sm:$0xff] }
  0x60   : > { %917 = vmatmul.mubr.f32.vlgmr.msra.gmra.mxu0 %v4614_v22  ;;  %1204 = vmatprep.subr.mxu1 %v404_v23  ;;  %v565_v23 = vld [vmem:[%s7037_s1 + $0x520] sm:$0xff] }
  0x61   : > { %1335 = vmatprep.subr.mxu0 %v733_v25  ;;  %3274 = vmatprep.mubr.msk.f32.mxu1 %vm781_vm1, %v4625_v26  ;;  %v4781_v25 = vld [vmem:[%s4343_s26 + $0xa8] sm:$0xff] }
  0x62   : > { %1205 = vmatpush1.msra.mxu1 %v403_v28  ;;  %1336 = vmatpush1.msra.mxu0 %v732_v29  ;;  %v564_v28 = vld [vmem:[%s7037_s1 + $0x518] sm:$0xff]  ;;  %v698_v29 = vld [vmem:[%s7037_s1 + $0x948] sm:$0xff] }
  0x63   : > { %1126 = vmatmul.mubr.f32.gmra.mxu1 %v4635_v30  ;;  %1206 = vmatprep.subr.mxu1 %v621_v31  ;;  %v4793_v31 = vld [vmem:[%s4343_s26 + $0xa0] sm:$0xff] }
  0x64   : > { %922 = vmatprep.mubr.f32.mxu0 %v4641_v32  ;;  %1207 = vmatpush2.msra.mxu1 %v620_v33  ;;  %7060 = vst [vmem:[#allocation6_spill] sm:$0xff] %v4793_v31  ;;  %v558_v33 = vld [vmem:[%s7037_s1 + $0x4e8] sm:$0xff] }
  0x65   : > { %923 = vmatmul.mubr.f32.gmra.mxu0 %v4649_v35  ;;  %1208 = vmatprep.subr.mxu1 %v614_v36  ;;  %v697_v36 = vld [vmem:[%s7037_s1 + $0x940] sm:$0xff] }
  0x66   : > { %1337 = vmatprep.subr.mxu0 %v726_v38  ;;  %3275 = vmatprep.mubr.msk.f32.mxu1 %vm781_vm1, %v4660_v39  ;;  %v4803_v38 = vld [vmem:[%s4343_s26 + $0x1b8] sm:$0xff] }
  0x67   : > { %1209 = vmatpush2.msra.mxu1 %v613_v40  ;;  %1338 = vmatpush1.msra.mxu0 %v725_v41  ;;  %v557_v40 = vld [vmem:[%s7037_s1 + $0x4e0] sm:$0xff]  ;;  %v4809_v41 = vld [vmem:[%s4343_s26 + $0xc8] sm:$0xff] }
  0x68   : > { %1132 = vmatmul.mubr.f32.gmra.mxu1 %v4670_v42  ;;  %1210 = vmatprep.subr.mxu1 %v607_v43  ;;  %v4813_v43 = vld [vmem:[%s4343_s26 + $0x1b0] sm:$0xff] }
  0x69   : > { %928 = vmatprep.mubr.f32.mxu0 %v4676_v45  ;;  %1211 = vmatpush2.msra.mxu1 %v606_v46  ;;  %7061 = vst [vmem:[#allocation7_spill] sm:$0xff] %v4813_v43  ;;  %v551_v46 = vld [vmem:[%s7037_s1 + $0x4b0] sm:$0xff] }
  0x6a   : > { %929 = vmatmul.mubr.f32.gmra.mxu0 %v4684_v48  ;;  %1212 = vmatprep.subr.mxu1 %v600_v49  ;;  %v550_v49 = vld [vmem:[%s7037_s1 + $0x4a8] sm:$0xff] }
  0x6b   : > { %1339 = vmatprep.subr.mxu0 %v719_v50  ;;  %3276 = vmatprep.mubr.msk.f32.mxu1 %vm781_vm1, %v4695_v51  ;;  %v691_v50 = vld [vmem:[%s7037_s1 + $0x910] sm:$0xff] }
  0x6c   : > { %1213 = vmatpush2.msra.mxu1 %v599_v52  ;;  %1340 = vmatpush1.msra.mxu0 %v718_v53  ;;  %v4828_v52 = vld [vmem:[%s4343_s26 + $0xc0] sm:$0xff]  ;;  %v544_v53 = vld [vmem:[%s7037_s1 + $0x478] sm:$0xff] }
  0x6d   : > { %1138 = vmatmul.mubr.f32.gmra.mxu1 %v4705_v55  ;;  %1214 = vmatprep.subr.mxu1 %v593_v56  ;;  %v690_v56 = vld [vmem:[%s7037_s1 + $0x908] sm:$0xff] }
  0x6e   : > { %934 = vmatprep.mubr.f32.mxu0 %v4711_v58  ;;  %1215 = vmatpush2.msra.mxu1 %v592_v59  ;;  %v4838_v59 = vld [vmem:[%s4343_s26 + $0x1d8] sm:$0xff] }
  0x6f   : > { %935 = vmatmul.mubr.f32.gmra.mxu0 %v4719_v60  ;;  %1216 = vmatprep.subr.mxu1 %v586_v61  ;;  %7062 = vst [vmem:[#allocation8_spill] sm:$0xff] %v4838_v59  ;;  %v543_v61 = vld [vmem:[%s7037_s1 + $0x470] sm:$0xff] }
  0x70   : > { %1341 = vmatprep.subr.mxu0 %v712_v62  ;;  %3277 = vmatprep.mubr.msk.f32.mxu1 %vm781_vm1, %v4730_v63  ;;  %v4844_v62 = vld [vmem:[%s4343_s26 + $0xe8] sm:$0xff] }
  0x71   : > { %1217 = vmatpush2.msra.mxu1 %v585_v1  ;;  %1342 = vmatpush1.msra.mxu0 %v711_v2  ;;  %7063 = vst [vmem:[#allocation9_spill] sm:$0xff] %v4844_v62  ;;  %v4848_v1 = vld [vmem:[%s4343_s26 + $0x1d0] sm:$0xff]  ;;  %v537_v2 = vld [vmem:[%s7037_s1 + $0x440] sm:$0xff] }
  0x72   : > { %1144 = vmatmul.mubr.f32.gmra.mxu1 %v4740_v4  ;;  %1218 = vmatprep.subr.mxu1 %v579_v6  ;;  %7064 = vst [vmem:[#allocation10_spill] sm:$0xff] %v4848_v1  ;;  %v536_v6 = vld [vmem:[%s7037_s1 + $0x438] sm:$0xff] }
  0x73   : > { %940 = vmatprep.mubr.f32.mxu0 %v4746_v8  ;;  %1219 = vmatpush2.msra.mxu1 %v578_v9  ;;  %v684_v9 = vld [vmem:[%s7037_s1 + $0x8d8] sm:$0xff] }
  0x74   : > { %941 = vmatmul.mubr.f32.gmra.mxu0 %v4754_v10  ;;  %1220 = vmatprep.subr.mxu1 %v572_v11  ;;  %v4863_v11 = vld [vmem:[%s4343_s26 + $0xe0] sm:$0xff] }
  0x75   : > { %1343 = vmatprep.subr.mxu0 %v705_v13  ;;  %3278 = vmatprep.mubr.msk.f32.mxu1 %vm781_vm1, %v4765_v15  ;;  %v530_v13 = vld [vmem:[%s7037_s1 + $0x408] sm:$0xff] }
  0x76   : > { %1221 = vmatpush2.msra.mxu1 %v571_v18  ;;  %1344 = vmatpush1.msra.mxu0 %v704_v19  ;;  %v683_v18 = vld [vmem:[%s7037_s1 + $0x8d0] sm:$0xff]  ;;  %v4873_v19 = vld [vmem:[%s4343_s26 + $0x1f8] sm:$0xff] }
  0x77   : > { %1150 = vmatmul.mubr.f32.gmra.mxu1 %v4775_v21  ;;  %1222 = vmatprep.subr.mxu1 %v565_v23  ;;  %7065 = vst [vmem:[#allocation11_spill] sm:$0xff] %v4873_v19  ;;  %v529_v23 = vld [vmem:[%s7037_s1 + $0x400] sm:$0xff] }
  0x78   : > { %946 = vmatprep.mubr.f32.mxu0 %v4781_v25  ;;  %1223 = vmatpush2.msra.mxu1 %v564_v28  ;;  %v4879_v28 = vld [vmem:[%s4343_s26 + $0x108] sm:$0xff] }
  0x79   : > { %1345 = vmatprep.subr.mxu0 %v698_v29  ;;  %947 = vmatmul.mubr.f32.gmra.mxu0 %v4793_v31  ;;  %v4883_v29 = vld [vmem:[%s4343_s26 + $0x1f0] sm:$0xff] }
  0x7a   : > { %1224 = vmatprep.subr.mxu1 %v558_v33  ;;  %1346 = vmatpush1.msra.mxu0 %v697_v36  ;;  %7066 = vst [vmem:[#allocation12_spill] sm:$0xff] %v4883_v29  ;;  %v523_v33 = vld [vmem:[%s7037_s1 + $0x3d0] sm:$0xff]  ;;  %v522_v36 = vld [vmem:[%s7037_s1 + $0x3c8] sm:$0xff] }
  0x7b   : > { %3279 = vmatprep.mubr.msk.f32.mxu1 %vm781_vm1, %v4803_v38  ;;  %1225 = vmatpush2.msra.mxu1 %v557_v40  ;;  %v677_v40 = vld [vmem:[%s7037_s1 + $0x8a0] sm:$0xff] }
  0x7c   : > { %952 = vmatprep.mubr.f32.mxu0 %v4809_v41  ;;  %1156 = vmatmul.mubr.f32.gmra.mxu1 %v4813_v43  ;;  %v5096_v43 = vld [vmem:[%s4343_s26 + $0x1e0] sm:$0xff] }
  0x7d   : > { %1226 = vmatprep.subr.mxu1 %v551_v46  ;;  %1347 = vmatprep.subr.mxu0 %v691_v50  ;;  %v4898_v46 = vld [vmem:[%s4343_s26 + $0x100] sm:$0xff]  ;;  %v676_v50 = vld [vmem:[%s7037_s1 + $0x898] sm:$0xff] }
  0x7e   : > { %1227 = vmatpush2.msra.mxu1 %v550_v49  ;;  %953 = vmatmul.mubr.f32.gmra.mxu0 %v4828_v52  ;;  %v516_v49 = vld [vmem:[%s7037_s1 + $0x398] sm:$0xff] }
  0x7f   : > { %1228 = vmatprep.subr.mxu1 %v544_v53  ;;  %1348 = vmatpush1.msra.mxu0 %v690_v56  ;;  %v515_v53 = vld [vmem:[%s7037_s1 + $0x390] sm:$0xff]  ;;  %v670_v56 = vld [vmem:[%s7037_s1 + $0x868] sm:$0xff] }
  0x80   : > { %3280 = vmatprep.mubr.msk.f32.mxu1 %vm781_vm1, %v4838_v59  ;;  %1229 = vmatpush2.msra.mxu1 %v543_v61  ;;  %v511_v61 = vld [vmem:[%s7037_s1 + $0x370] sm:$0xff]  ;;  %v5068_v59 = vld [vmem:[%s4343_s26 + $0x1c0] sm:$0xff] }
  0x81   : > { %958 = vmatprep.mubr.f32.mxu0 %v4844_v62  ;;  %1162 = vmatmul.mubr.f32.gmra.mxu1 %v4848_v1  ;;  %v5062_v1 = vld [vmem:[%s4343_s26 + $0x1c8] sm:$0xff] }
  0x82   : > { %1230 = vmatprep.subr.mxu1 %v537_v2  ;;  %1349 = vmatprep.subr.mxu0 %v684_v9  ;;  %v4918_v2 = vld [vmem:[%s4343_s26 + $0x128] sm:$0xff] }
  0x83   : > { %1231 = vmatpush2.msra.mxu1 %v536_v6  ;;  %959 = vmatmul.mubr.f32.gmra.mxu0 %v4863_v11  ;;  %v669_v6 = vld [vmem:[%s7037_s1 + $0x860] sm:$0xff]  ;;  %v510_v9 = vld [vmem:[%s7037_s1 + $0x368] sm:$0xff] }
  0x84   : > { %1232 = vmatprep.subr.mxu1 %v530_v13  ;;  %1350 = vmatpush1.msra.mxu0 %v683_v18  ;;  %v4928_v13 = vld [vmem:[%s4343_s26 + $0x120] sm:$0xff]  ;;  %v504_v18 = vld [vmem:[%s7037_s1 + $0x338] sm:$0xff] }
  0x85   : > { %3281 = vmatprep.mubr.msk.f32.mxu1 %vm781_vm1, %v4873_v19  ;;  %1233 = vmatpush2.msra.mxu1 %v529_v23  ;;  %v503_v23 = vld [vmem:[%s7037_s1 + $0x330] sm:$0xff]  ;;  %v5040_v19 = vld [vmem:[%s4343_s26 + $0x1a0] sm:$0xff] }
  0x86   : > { %964 = vmatprep.mubr.f32.mxu0 %v4879_v28  ;;  %1168 = vmatmul.mubr.f32.gmra.mxu1 %v4883_v29  ;;  %v5034_v29 = vld [vmem:[%s4343_s26 + $0x1a8] sm:$0xff] }
  0x87   : > { %1234 = vmatprep.subr.mxu1 %v523_v33  ;;  %1351 = vmatprep.subr.mxu0 %v677_v40  ;;  %v663_v33 = vld [vmem:[%s7037_s1 + $0x830] sm:$0xff]  ;;  %v4947_v40 = vld [vmem:[%s4343_s26 + $0x148] sm:$0xff] }
  0x88   : > { %1235 = vmatpush2.msra.mxu1 %v522_v36  ;;  %965 = vmatmul.mubr.f32.gmra.mxu0 %v4898_v46  ;;  %v497_v36 = vld [vmem:[%s7037_s1 + $0x300] sm:$0xff] }
  0x89   : > { %1236 = vmatprep.subr.mxu1 %v516_v49  ;;  %1352 = vmatpush1.msra.mxu0 %v676_v50  ;;  %v662_v49 = vld [vmem:[%s7037_s1 + $0x828] sm:$0xff]  ;;  %v496_v50 = vld [vmem:[%s7037_s1 + $0x2f8] sm:$0xff] }
  0x8a   : > { %1237 = vmatpush2.msra.mxu1 %v515_v53  ;;  %1238 = vmatprep.mubr.f32.mxu1 %v4608_v20  ;;  %v4956_v53 = vld [vmem:[%s4343_s26 + $0x140] sm:$0xff] }
  0x8b   : > { %1353 = vmatprep.subr.mxu0 %v670_v56  ;;  %1239 = vmatmul.mubr.f32.vlgmr.msra.gmra.mxu1 %v4614_v22  ;;  %v490_v56 = vld [vmem:[%s7037_s1 + $0x2c8] sm:$0xff] }
  0x8c   : > { %1496 = vmatprep.subr.mxu1 %v511_v61  ;;  %970 = vmatprep.mubr.f32.mxu0 %v4918_v2  ;;  %v489_v61 = vld [vmem:[%s7037_s1 + $0x2c0] sm:$0xff] }
  0x8d   : > { %1354 = vmatpush1.msra.mxu0 %v669_v6  ;;  %1497 = vmatpush1.msra.mxu1 %v510_v9  ;;  %v656_v6 = vld [vmem:[%s7037_s1 + $0x7f8] sm:$0xff]  ;;  %v483_v9 = vld [vmem:[%s7037_s1 + $0x290] sm:$0xff] }
  0x8e   : > { %971 = vmatmul.mubr.f32.gmra.mxu0 %v4928_v13  ;;  %1498 = vmatprep.subr.mxu1 %v504_v18  ;;  %v4975_v18 = vld [vmem:[%s4343_s26 + $0x168] sm:$0xff] }
  0x8f   : > { %1244 = vmatprep.mubr.f32.mxu1 %v4641_v32  ;;  %1499 = vmatpush1.msra.mxu1 %v503_v23  ;;  %v655_v23 = vld [vmem:[%s7037_s1 + $0x7f0] sm:$0xff] }
  0x90   : > { %1355 = vmatprep.subr.mxu0 %v663_v33  ;;  %1245 = vmatmul.mubr.f32.gmra.mxu1 %v4649_v35  ;;  %v482_v33 = vld [vmem:[%s7037_s1 + $0x288] sm:$0xff] }
  0x91   : > { %1500 = vmatprep.subr.mxu1 %v497_v36  ;;  %976 = vmatprep.mubr.f32.mxu0 %v4947_v40  ;;  %v4984_v36 = vld [vmem:[%s4343_s26 + $0x160] sm:$0xff] }
  0x92   : > { %1356 = vmatpush1.msra.mxu0 %v662_v49  ;;  %1501 = vmatpush1.msra.mxu1 %v496_v50  ;;  %v476_v49 = vld [vmem:[%s7037_s1 + $0x258] sm:$0xff]  ;;  %v475_v50 = vld [vmem:[%s7037_s1 + $0x250] sm:$0xff] }
  0x93   : > { %977 = vmatmul.mubr.f32.gmra.mxu0 %v4956_v53  ;;  %1502 = vmatprep.subr.mxu1 %v490_v56  ;;  %v649_v56 = vld [vmem:[%s7037_s1 + $0x7c0] sm:$0xff] }
  0x94   : > { %1250 = vmatprep.mubr.f32.mxu1 %v4676_v45  ;;  %1503 = vmatpush1.msra.mxu1 %v489_v61  ;;  %v469_v61 = vld [vmem:[%s7037_s1 + $0x220] sm:$0xff] }
  0x95   : > { %1357 = vmatprep.subr.mxu0 %v656_v6  ;;  %1251 = vmatmul.mubr.f32.gmra.mxu1 %v4684_v48  ;;  %v5003_v6 = vld [vmem:[%s4343_s26 + $0x188] sm:$0xff] }
  0x96   : > { %1504 = vmatprep.subr.mxu1 %v483_v9  ;;  %982 = vmatprep.mubr.f32.mxu0 %v4975_v18  ;;  %v648_v9 = vld [vmem:[%s7037_s1 + $0x7b8] sm:$0xff] }
  0x97   : > { %1358 = vmatpush1.msra.mxu0 %v655_v23  ;;  %1505 = vmatpush1.msra.mxu1 %v482_v33  ;;  %v468_v23 = vld [vmem:[%s7037_s1 + $0x218] sm:$0xff]  ;;  %v5012_v33 = vld [vmem:[%s4343_s26 + $0x180] sm:$0xff] }
  0x98   : > { %983 = vmatmul.mubr.f32.gmra.mxu0 %v4984_v36  ;;  %1506 = vmatprep.subr.mxu1 %v476_v49  ;;  %v462_v49 = vld [vmem:[%s7037_s1 + $0x1e8] sm:$0xff] }
  0x99   : > { %1256 = vmatprep.mubr.f32.mxu1 %v4711_v58  ;;  %1507 = vmatpush1.msra.mxu1 %v475_v50  ;;  %v642_v50 = vld [vmem:[%s7037_s1 + $0x788] sm:$0xff] }
  0x9a   : > { %1359 = vmatprep.subr.mxu0 %v649_v56  ;;  %1257 = vmatmul.mubr.f32.gmra.mxu1 %v4719_v60  ;;  %v461_v56 = vld [vmem:[%s7037_s1 + $0x1e0] sm:$0xff] }
  0x9b   : > { %1508 = vmatprep.subr.mxu1 %v469_v61  ;;  %988 = vmatprep.mubr.f32.mxu0 %v5003_v6  ;;  %v641_v61 = vld [vmem:[%s7037_s1 + $0x780] sm:$0xff] }
  0x9c   : > { %1360 = vmatpush1.msra.mxu0 %v648_v9  ;;  %1509 = vmatpush1.msra.mxu1 %v468_v23  ;;  %v455_v9 = vld [vmem:[%s7037_s1 + $0x1b0] sm:$0xff]  ;;  %v454_v23 = vld [vmem:[%s7037_s1 + $0x1a8] sm:$0xff] }
  0x9d   : > { %989 = vmatmul.mubr.f32.gmra.mxu0 %v5012_v33  ;;  %1510 = vmatprep.subr.mxu1 %v462_v49  ;;  %v448_v49 = vld [vmem:[%s7037_s1 + $0x178] sm:$0xff] }
  0x9e   : > { %1262 = vmatprep.mubr.f32.mxu1 %v4746_v8  ;;  %1361 = vmatprep.subr.mxu0 %v642_v50  ;;  %v635_v50 = vld [vmem:[%s7037_s1 + $0x750] sm:$0xff] }
  0x9f   : > { %1511 = vmatpush1.msra.mxu1 %v461_v56  ;;  %1362 = vmatpush1.msra.mxu0 %v641_v61  ;;  %v447_v56 = vld [vmem:[%s7037_s1 + $0x170] sm:$0xff]  ;;  %v634_v61 = vld [vmem:[%s7037_s1 + $0x748] sm:$0xff] }
  0xa0   : > { %1263 = vmatmul.mubr.f32.gmra.mxu1 %v4754_v10  ;;  %1512 = vmatprep.subr.mxu1 %v455_v9  ;;  %v441_v9 = vld [vmem:[%s7037_s1 + $0x140] sm:$0xff] }
  0xa1   : > { %994 = vmatprep.mubr.f32.mxu0 %v5034_v29  ;;  %1513 = vmatpush1.msra.mxu1 %v454_v23  ;;  %v440_v23 = vld [vmem:[%s7037_s1 + $0x138] sm:$0xff] }
  0xa2   : > { %995 = vmatmul.mubr.f32.gmra.mxu0 %v5040_v19  ;;  %1514 = vmatprep.subr.mxu1 %v448_v49  ;;  %v434_v49 = vld [vmem:[%s7037_s1 + $0x108] sm:$0xff] }
  0xa3   : > { %1268 = vmatprep.mubr.f32.mxu1 %v4781_v25  ;;  %1363 = vmatprep.subr.mxu0 %v635_v50  ;;  %v628_v50 = vld [vmem:[%s7037_s1 + $0x718] sm:$0xff] }
  0xa4   : > { %1515 = vmatpush1.msra.mxu1 %v447_v56  ;;  %1364 = vmatpush1.msra.mxu0 %v634_v61  ;;  %v433_v56 = vld [vmem:[%s7037_s1 + $0x100] sm:$0xff]  ;;  %v627_v61 = vld [vmem:[%s7037_s1 + $0x710] sm:$0xff] }
  0xa5   : > { %1269 = vmatmul.mubr.f32.gmra.mxu1 %v4793_v31  ;;  %1516 = vmatprep.subr.mxu1 %v441_v9  ;;  %v427_v9 = vld [vmem:[%s7037_s1 + $0xd0] sm:$0xff]  ;;  %v5090_v31 = vld [vmem:[%s4343_s26 + $0x1e8] sm:$0xff] }
  0xa6   : > { %1000 = vmatprep.mubr.f32.mxu0 %v5062_v1  ;;  %1517 = vmatpush1.msra.mxu1 %v440_v23  ;;  %v426_v23 = vld [vmem:[%s7037_s1 + $0xc8] sm:$0xff] }
  0xa7   : > { %1001 = vmatmul.mubr.f32.gmra.mxu0 %v5068_v59  ;;  %1518 = vmatprep.subr.mxu1 %v434_v49  ;;  %v420_v49 = vld [vmem:[%s7037_s1 + $0x98] sm:$0xff] }
  0xa8   : > { %1274 = vmatprep.mubr.f32.mxu1 %v4809_v41  ;;  %1365 = vmatprep.subr.mxu0 %v628_v50  ;;  %v740_v50 = vld [vmem:[%s7037_s1 + $0xa98] sm:$0xf] }
  0xa9   : > { %1519 = vmatpush1.msra.mxu1 %v433_v56  ;;  %1366 = vmatpush1.msra.mxu0 %v627_v61  ;;  %v419_v56 = vld [vmem:[%s7037_s1 + $0x90] sm:$0xff] }
  0xaa   : > { %1275 = vmatmul.mubr.f32.gmra.mxu1 %v4828_v52  ;;  %1520 = vmatprep.subr.mxu1 %v427_v9  ;;  %v739_v61 = vld [vmem:[%s7037_s1 + $0xa90] sm:$0xf]  ;;  %v413_v9 = vld [vmem:[%s7037_s1 + $0x60] sm:$0xff] }
  0xab   : > { %1006 = vmatprep.mubr.f32.mxu0 %v5090_v31  ;;  %1521 = vmatpush1.msra.mxu1 %v426_v23  ;;  %v412_v23 = vld [vmem:[%s7037_s1 + $0x58] sm:$0xff] }
  0xac   : > { %1007 = vmatmul.mubr.f32.gmra.mxu0 %v5096_v43  ;;  %1522 = vmatprep.subr.mxu1 %v420_v49  ;;  %v406_v49 = vld [vmem:[%s7037_s1 + $0x28] sm:$0xff] }
  0xad   : > { %1280 = vmatprep.mubr.f32.mxu1 %v4844_v62  ;;  %3282 = vmatprep.subr.msk.mxu0 %vm830_vm0, %v740_v50  ;;  %v735_v62 = vld [vmem:[%s7037_s1 + $0xa70] sm:$0xff]  ;;  %v405_v50 = vld [vmem:[%s7037_s1 + $0x20] sm:$0xff] }
  0xae   : > { %1523 = vmatpush1.msra.mxu1 %v419_v56  ;;  %3283 = vmatpush2.msk.msra.mxu0 %vm830_vm0, %v739_v61  ;;  %v734_v56 = vld [vmem:[%s7037_s1 + $0xa68] sm:$0xff]  ;;  %v623_v61 = vld [vmem:[%s7037_s1 + $0x6f0] sm:$0xff] }
  0xaf   : > { %1281 = vmatmul.mubr.f32.gmra.mxu1 %v4863_v11  ;;  %1524 = vmatprep.subr.mxu1 %v413_v9  ;;  %v615_v9 = vld [vmem:[%s7037_s1 + $0x6b0] sm:$0xff] }
  0xb0   : > { %3284 = vmatprep.mubr.msk.f32.mxu0 %vm781_vm1, %v4358_v5  ;;  %1525 = vmatpush1.msra.mxu1 %v412_v23  ;;  %v622_v5 = vld [vmem:[%s7037_s1 + $0x6e8] sm:$0xff]  ;;  %v727_v23 = vld [vmem:[%s7037_s1 + $0xa30] sm:$0xff] }
  0xb1   : > { %1400 = vmatmul.mubr.f32.vlgmr.msra.gmra.mxu0 %v4365_v7  ;;  %1526 = vmatprep.subr.mxu1 %v406_v49  ;;  %v616_v7 = vld [vmem:[%s7037_s1 + $0x6b8] sm:$0xff]  ;;  %v609_v49 = vld [vmem:[%s7037_s1 + $0x680] sm:$0xff] }
  0xb2   : > { %1657 = vmatprep.subr.mxu0 %v735_v62  ;;  %1286 = vmatprep.mubr.f32.mxu1 %v4879_v28  ;;  %v728_v62 = vld [vmem:[%s7037_s1 + $0xa38] sm:$0xff] }
  0xb3   : > { %1527 = vmatpush1.msra.mxu1 %v405_v50  ;;  %1658 = vmatpush1.msra.mxu0 %v734_v56  ;;  %v721_v50 = vld [vmem:[%s7037_s1 + $0xa00] sm:$0xff] }
  0xb4   : > { %1287 = vmatmul.mubr.f32.gmra.mxu1 %v4898_v46  ;;  %1528 = vmatprep.subr.mxu1 %v623_v61  ;;  %v601_v56 = vld [vmem:[%s7037_s1 + $0x640] sm:$0xff]  ;;  %v720_v61 = vld [vmem:[%s7037_s1 + $0x9f8] sm:$0xff] }
  0xb5   : > { %3285 = vmatprep.mubr.msk.f32.mxu0 %vm781_vm1, %v4390_v14  ;;  %1529 = vmatpush2.msra.mxu1 %v622_v5  ;;  %v608_v14 = vld [vmem:[%s7037_s1 + $0x678] sm:$0xff]  ;;  %v595_v5 = vld [vmem:[%s7037_s1 + $0x610] sm:$0xff] }
  0xb6   : > { %1406 = vmatmul.mubr.f32.gmra.mxu0 %v4399_v17  ;;  %1530 = vmatprep.subr.mxu1 %v616_v7  ;;  %v602_v17 = vld [vmem:[%s7037_s1 + $0x648] sm:$0xff] }
  0xb7   : > { %1659 = vmatprep.subr.mxu0 %v728_v62  ;;  %1292 = vmatprep.mubr.f32.mxu1 %v4918_v2  ;;  %v714_v7 = vld [vmem:[%s7037_s1 + $0x9c8] sm:$0xff]  ;;  %v587_v62 = vld [vmem:[%s7037_s1 + $0x5d0] sm:$0xff] }
  0xb8   : > { %1531 = vmatpush2.msra.mxu1 %v615_v9  ;;  %1660 = vmatpush1.msra.mxu0 %v727_v23  ;;  %v713_v9 = vld [vmem:[%s7037_s1 + $0x9c0] sm:$0xff] }
  0xb9   : > { %1293 = vmatmul.mubr.f32.gmra.mxu1 %v4928_v13  ;;  %1532 = vmatprep.subr.mxu1 %v609_v49  ;;  %v581_v23 = vld [vmem:[%s7037_s1 + $0x5a0] sm:$0xff]  ;;  %v707_v49 = vld [vmem:[%s7037_s1 + $0x990] sm:$0xff] }
  0xba   : > { %3286 = vmatprep.mubr.msk.f32.mxu0 %vm781_vm1, %v4423_v24  ;;  %1533 = vmatpush2.msra.mxu1 %v608_v14  ;;  %v594_v24 = vld [vmem:[%s7037_s1 + $0x608] sm:$0xff]  ;;  %v573_v14 = vld [vmem:[%s7037_s1 + $0x560] sm:$0xff] }
  0xbb   : > { %1412 = vmatmul.mubr.f32.gmra.mxu0 %v4432_v27  ;;  %1534 = vmatprep.subr.mxu1 %v602_v17  ;;  %v588_v27 = vld [vmem:[%s7037_s1 + $0x5d8] sm:$0xff]  ;;  %v706_v17 = vld [vmem:[%s7037_s1 + $0x988] sm:$0xff] }
  0xbc   : > { %1661 = vmatprep.subr.mxu0 %v721_v50  ;;  %1298 = vmatprep.mubr.f32.mxu1 %v4947_v40  ;;  %v567_v50 = vld [vmem:[%s7037_s1 + $0x530] sm:$0xff] }
  0xbd   : > { %1535 = vmatpush2.msra.mxu1 %v601_v56  ;;  %1662 = vmatpush1.msra.mxu0 %v720_v61  ;;  %v560_v56 = vld [vmem:[%s7037_s1 + $0x4f8] sm:$0xff]  ;;  %v699_v61 = vld [vmem:[%s7037_s1 + $0x950] sm:$0xff] }
  0xbe   : > { %1299 = vmatmul.mubr.f32.gmra.mxu1 %v4956_v53  ;;  %1536 = vmatprep.subr.mxu1 %v595_v5  ;;  %v559_v5 = vld [vmem:[%s7037_s1 + $0x4f0] sm:$0xff] }
  0xbf   : > { %3287 = vmatprep.mubr.msk.f32.mxu0 %vm781_vm1, %v4456_v34  ;;  %1537 = vmatpush2.msra.mxu1 %v594_v24  ;;  %v580_v34 = vld [vmem:[%s7037_s1 + $0x598] sm:$0xff]  ;;  %v553_v24 = vld [vmem:[%s7037_s1 + $0x4c0] sm:$0xff] }
  0xc0   : > { %1418 = vmatmul.mubr.f32.gmra.mxu0 %v4465_v37  ;;  %1538 = vmatprep.subr.mxu1 %v588_v27  ;;  %v574_v37 = vld [vmem:[%s7037_s1 + $0x568] sm:$0xff]  ;;  %v693_v27 = vld [vmem:[%s7037_s1 + $0x920] sm:$0xff] }
  0xc1   : > { %1663 = vmatprep.subr.mxu0 %v714_v7  ;;  %1304 = vmatprep.mubr.f32.mxu1 %v4975_v18  ;;  %v692_v7 = vld [vmem:[%s7037_s1 + $0x918] sm:$0xff] }
  0xc2   : > { %1539 = vmatpush2.msra.mxu1 %v587_v62  ;;  %1664 = vmatpush1.msra.mxu0 %v713_v9  ;;  %v545_v62 = vld [vmem:[%s7037_s1 + $0x480] sm:$0xff]  ;;  %v538_v9 = vld [vmem:[%s7037_s1 + $0x448] sm:$0xff] }
  0xc3   : > { %1305 = vmatmul.mubr.f32.gmra.mxu1 %v4984_v36  ;;  %1540 = vmatprep.subr.mxu1 %v581_v23  ;;  %v686_v23 = vld [vmem:[%s7037_s1 + $0x8e8] sm:$0xff] }
  0xc4   : > { %3288 = vmatprep.mubr.msk.f32.mxu0 %vm781_vm1, %v4489_v44  ;;  %1541 = vmatpush2.msra.mxu1 %v580_v34  ;;  %v566_v44 = vld [vmem:[%s7037_s1 + $0x528] sm:$0xff]  ;;  %v685_v34 = vld [vmem:[%s7037_s1 + $0x8e0] sm:$0xff] }
  0xc5   : > { %1424 = vmatmul.mubr.f32.gmra.mxu0 %v4498_v47  ;;  %1542 = vmatprep.subr.mxu1 %v574_v37  ;;  %v700_v47 = vld [vmem:[%s7037_s1 + $0x958] sm:$0xff]  ;;  %v531_v37 = vld [vmem:[%s7037_s1 + $0x410] sm:$0xff] }
  0xc6   : > { %1665 = vmatprep.subr.mxu0 %v707_v49  ;;  %1310 = vmatprep.mubr.f32.mxu1 %v5003_v6  ;;  %v524_v49 = vld [vmem:[%s7037_s1 + $0x3d8] sm:$0xff] }
  0xc7   : > { %1543 = vmatpush2.msra.mxu1 %v573_v14  ;;  %1666 = vmatpush1.msra.mxu0 %v706_v17  ;;  %v679_v14 = vld [vmem:[%s7037_s1 + $0x8b0] sm:$0xff]  ;;  %v678_v17 = vld [vmem:[%s7037_s1 + $0x8a8] sm:$0xff] }
  0xc8   : > { %1311 = vmatmul.mubr.f32.gmra.mxu1 %v5012_v33  ;;  %1544 = vmatprep.subr.mxu1 %v567_v50  ;;  %v517_v50 = vld [vmem:[%s7037_s1 + $0x3a0] sm:$0xff] }
  0xc9   : > { %3289 = vmatprep.mubr.msk.f32.mxu0 %vm781_vm1, %v4522_v54  ;;  %1545 = vmatpush2.msra.mxu1 %v566_v44  ;;  %v552_v54 = vld [vmem:[%s7037_s1 + $0x4b8] sm:$0xff]  ;;  %v671_v44 = vld [vmem:[%s7037_s1 + $0x870] sm:$0xff] }
  0xca   : > { %1667 = vmatprep.subr.mxu0 %v700_v47  ;;  %1430 = vmatmul.mubr.f32.gmra.mxu0 %v4531_v57  ;;  %v546_v57 = vld [vmem:[%s7037_s1 + $0x488] sm:$0xff]  ;;  %v665_v47 = vld [vmem:[%s7037_s1 + $0x840] sm:$0xff] }
  0xcb   : > { %1546 = vmatprep.subr.mxu1 %v560_v56  ;;  %1668 = vmatpush1.msra.mxu0 %v699_v61  ;;  %v7068_v56 = vld [vmem:[#allocation8_spill] sm:$0xff]  ;;  %v7069_v61 = vld [vmem:[#allocation6_spill] sm:$0xff] }
  0xcc   : > { %1316 = vmatprep.mubr.f32.mxu1 %v5034_v29  ;;  %1547 = vmatpush2.msra.mxu1 %v559_v5  ;;  %v603_v5 = vld [vmem:[%s7037_s1 + $0x650] sm:$0xff] }
  0xcd   : > { %3290 = vmatprep.mubr.msk.f32.mxu0 %vm781_vm1, %v4555_v0  ;;  %1317 = vmatmul.mubr.f32.gmra.mxu1 %v5040_v19  ;;  %v539_v0 = vld [vmem:[%s7037_s1 + $0x450] sm:$0xff] }
  0xce   : > { %1548 = vmatprep.subr.mxu1 %v553_v24  ;;  %1669 = vmatprep.subr.mxu0 %v693_v27  ;;  %v7070_v24 = vld [vmem:[#allocation10_spill] sm:$0xff]  ;;  %v7071_v27 = vld [vmem:[#allocation11_spill] sm:$0xff] }
  0xcf   : > { %1549 = vmatpush2.msra.mxu1 %v552_v54  ;;  %1436 = vmatmul.mubr.f32.gmra.mxu0 %v4564_v3  ;;  %v532_v3 = vld [vmem:[%s7037_s1 + $0x418] sm:$0xff]  ;;  %v491_v54 = vld [vmem:[%s7037_s1 + $0x2d0] sm:$0xff] }
  0xd0   : > { %1550 = vmatprep.subr.mxu1 %v546_v57  ;;  %1670 = vmatpush1.msra.mxu0 %v692_v7  ;;  %v596_v57 = vld [vmem:[%s7037_s1 + $0x618] sm:$0xff] }
  0xd1   : > { %1322 = vmatprep.mubr.f32.mxu1 %v5062_v1  ;;  %1551 = vmatpush2.msra.mxu1 %v545_v62  ;;  %v7072_v7 = vld [vmem:[#allocation9_spill] sm:$0xff] }
  0xd2   : > { %3291 = vmatprep.mubr.msk.f32.mxu0 %vm781_vm1, %v4588_v12  ;;  %1323 = vmatmul.mubr.f32.gmra.mxu1 %v5068_v59  ;;  %v525_v12 = vld [vmem:[%s7037_s1 + $0x3e0] sm:$0xff] }
  0xd3   : > { %1552 = vmatprep.subr.mxu1 %v539_v0  ;;  %1671 = vmatprep.subr.mxu0 %v686_v23  ;;  %v589_v62 = vld [vmem:[%s7037_s1 + $0x5e0] sm:$0xff]  ;;  %v7073_v0 = vld [vmem:[#allocation12_spill] sm:$0xff]  ;;  %v582_v23 = vld [vmem:[%s7037_s1 + $0x5a8] sm:$0xff] }
  0xd4   : > { %1553 = vmatpush2.msra.mxu1 %v538_v9  ;;  %1442 = vmatmul.mubr.f32.gmra.mxu0 %v4597_v16  ;;  %v518_v16 = vld [vmem:[%s7037_s1 + $0x3a8] sm:$0xff]  ;;  %v477_v9 = vld [vmem:[%s7037_s1 + $0x260] sm:$0xff] }
  0xd5   : > { %1554 = vmatprep.subr.mxu1 %v532_v3  ;;  %1672 = vmatpush1.msra.mxu0 %v685_v34  ;;  %v736_v3 = vld [vmem:[%s7037_s1 + $0xa78] sm:$0xff]  ;;  %v5459_v34 = vld [vmem:[%s4343_s26 + $0x10] sm:$0xff] }
  0xd6   : > { %1328 = vmatprep.mubr.f32.mxu1 %v5090_v31  ;;  %1555 = vmatpush2.msra.mxu1 %v531_v37  ;;  %v729_v37 = vld [vmem:[%s7037_s1 + $0xa40] sm:$0xff] }
  0xd7   : > { %3292 = vmatprep.mubr.msk.f32.mxu0 %vm781_vm1, %v4625_v26  ;;  %1329 = vmatmul.mubr.f32.gmra.mxu1 %v5096_v43  ;;  %v672_v26 = vld [vmem:[%s7037_s1 + $0x878] sm:$0xff] }
  0xd8   : > { %1556 = vmatprep.subr.mxu1 %v525_v12  ;;  %1673 = vmatprep.subr.mxu0 %v679_v14  ;;  %v5468_v12 = vld [vmem:[%s4343_s26 + $0x38] sm:$0xff]  ;;  %v5481_v14 = vld [vmem:[%s4343_s26 + $0x30] sm:$0xff] }
  0xd9   : > { %1557 = vmatpush2.msra.mxu1 %v524_v49  ;;  %1448 = vmatmul.mubr.f32.gmra.mxu0 %v4635_v30  ;;  %v664_v30 = vld [vmem:[%s7037_s1 + $0x838] sm:$0xff] }
  0xda   : > { %1558 = vmatprep.subr.mxu1 %v518_v16  ;;  %1674 = vmatpush1.msra.mxu0 %v678_v17  ;;  %v5489_v16 = vld [vmem:[%s4343_s26 + $0x58] sm:$0xff] }
  0xdb   : > { %1559 = vmatpush2.msra.mxu1 %v517_v50  ;;  %1560 = vmatprep.mubr.f32.mxu1 %v4608_v20  ;;  %v658_v20 = vld [vmem:[%s7037_s1 + $0x808] sm:$0xff]  ;;  %v575_v50 = vld [vmem:[%s7037_s1 + $0x570] sm:$0xff] }
  0xdc   : > { %1675 = vmatprep.subr.mxu0 %v672_v26  ;;  %1561 = vmatmul.mubr.f32.vlgmr.msra.gmra.mxu1 %v4614_v22  ;;  %v657_v22 = vld [vmem:[%s7037_s1 + $0x800] sm:$0xff] }
  0xdd   : > { %3293 = vmatprep.mubr.msk.f32.mxu0 %vm781_vm1, %v4660_v39  ;;  %1676 = vmatpush1.msra.mxu0 %v671_v44  ;;  %v651_v39 = vld [vmem:[%s7037_s1 + $0x7d0] sm:$0xff] }
  0xde   : > { %1566 = vmatprep.mubr.f32.mxu1 %v4641_v32  ;;  %1454 = vmatmul.mubr.f32.gmra.mxu0 %v4670_v42  ;;  %v650_v32 = vld [vmem:[%s7037_s1 + $0x7c8] sm:$0xff]  ;;  %v644_v42 = vld [vmem:[%s7037_s1 + $0x798] sm:$0xff]  ;;  %v5507_v44 = vld [vmem:[%s4343_s26 + $0x50] sm:$0xff] }
  0xdf   : > { %1677 = vmatprep.subr.mxu0 %v665_v47  ;;  %3294 = vmatprep.mubr.msk.f32.mxu0 %vm781_vm1, %v4695_v51  ;;  %v643_v51 = vld [vmem:[%s7037_s1 + $0x790] sm:$0xff]  ;;  %v5514_v47 = vld [vmem:[%s4343_s26 + $0x78] sm:$0xff] }
  0xe0   : > { %1678 = vmatpush1.msra.mxu0 %v664_v30  ;;  %1567 = vmatmul.mubr.f32.gmra.mxu1 %v4649_v35  ;;  %v637_v35 = vld [vmem:[%s7037_s1 + $0x760] sm:$0xff]  ;;  %v708_v30 = vld [vmem:[%s7037_s1 + $0x998] sm:$0xff] }
  0xe1   : > { %1679 = vmatprep.subr.mxu0 %v658_v20  ;;  %1572 = vmatprep.mubr.f32.mxu1 %v4676_v45  ;;  %v636_v45 = vld [vmem:[%s7037_s1 + $0x758] sm:$0xff] }
  0xe2   : > { %1680 = vmatpush1.msra.mxu0 %v657_v22  ;;  %v5530_v22 = vld [vmem:[%s4343_s26 + $0x70] sm:$0xff] }
  0xe3   : > { %1460 = vmatmul.mubr.f32.gmra.mxu0 %v4705_v55  ;;  %1681 = vmatprep.subr.mxu0 %v651_v39  ;;  %v630_v55 = vld [vmem:[%s7037_s1 + $0x728] sm:$0xff] }
  0xe4   : > { %3295 = vmatprep.mubr.msk.f32.mxu0 %vm781_vm1, %v4730_v63  ;;  %1682 = vmatpush1.msra.mxu0 %v650_v32  ;;  %v629_v63 = vld [vmem:[%s7037_s1 + $0x720] sm:$0xff]  ;;  %v5539_v32 = vld [vmem:[%s4343_s26 + $0x98] sm:$0xff] }
  0xe5   : > { %1573 = vmatmul.mubr.f32.gmra.mxu1 %v4684_v48  ;;  %1683 = vmatprep.subr.mxu0 %v644_v42  ;;  %v624_v48 = vld [vmem:[%s7037_s1 + $0x6f8] sm:$0xff]  ;;  %v701_v42 = vld [vmem:[%s7037_s1 + $0x960] sm:$0xff] }
  0xe6   : > { %1578 = vmatprep.mubr.f32.mxu1 %v4711_v58  ;;  %1684 = vmatpush1.msra.mxu0 %v643_v51  ;;  %v512_v58 = vld [vmem:[%s7037_s1 + $0x378] sm:$0xff] }
  0xe7   : > { %1466 = vmatmul.mubr.f32.gmra.mxu0 %v4740_v4  ;;  %1685 = vmatprep.subr.mxu0 %v637_v35  ;;  %v742_v4 = vld [vmem:[%s7037_s1 + $0xaa8] sm:$0xf]  ;;  %v5555_v35 = vld [vmem:[%s4343_s26 + $0x90] sm:$0xff] }
  0xe8   : > { %3296 = vmatprep.mubr.msk.f32.mxu0 %vm781_vm1, %v4765_v15  ;;  %1686 = vmatpush1.msra.mxu0 %v636_v45  ;;  %v741_v15 = vld [vmem:[%s7037_s1 + $0xaa0] sm:$0xf]  ;;  %v5562_v45 = vld [vmem:[%s4343_s26 + $0xb8] sm:$0xff] }
  0xe9   : > { %1579 = vmatmul.mubr.f32.gmra.mxu1 %v4719_v60  ;;  %1687 = vmatprep.subr.mxu0 %v630_v55  ;;  %v617_v60 = vld [vmem:[%s7037_s1 + $0x6c0] sm:$0xff] }
  0xea   : > { %1584 = vmatprep.mubr.f32.mxu1 %v4746_v8  ;;  %1688 = vmatpush1.msra.mxu0 %v629_v63  ;;  %v505_v8 = vld [vmem:[%s7037_s1 + $0x340] sm:$0xff]  ;;  %v442_v63 = vld [vmem:[%s7037_s1 + $0x148] sm:$0xff] }
  0xeb   : > { %1472 = vmatmul.mubr.f32.gmra.mxu0 %v4775_v21  ;;  %3392 = vmatprep.subr.mxu1 %v624_v48  ;;  %v7067_v21 = vld [vmem:[#allocation7_spill] sm:$0xff] }
  0xec   : > { %3297 = vmatprep.mubr.msk.f32.mxu0 %vm781_vm1, %v4803_v38  ;;  %3393 = vmatpush3.msra.mxu1 %v512_v58  ;;  %v610_v38 = vld [vmem:[%s7037_s1 + $0x688] sm:$0xff]  ;;  %v547_v48 = vld [vmem:[%s7037_s1 + $0x490] sm:$0xff] }
  0xed   : > { %1585 = vmatmul.mubr.f32.gmra.mxu1 %v4754_v10  ;;  %3300 = vmatprep.subr.msk.mxu0 %vm830_vm0, %v742_v4  ;;  %v498_v10 = vld [vmem:[%s7037_s1 + $0x308] sm:$0xff]  ;;  %v5581_v58 = vld [vmem:[%s4343_s26 + $0xb0] sm:$0xff] }
  0xee   : > { %1590 = vmatprep.mubr.f32.mxu1 %v4781_v25  ;;  %3301 = vmatpush2.msk.msra.mxu0 %vm830_vm0, %v741_v15  ;;  %v7053_v25 = vmov 0.0   ;;  %v5590_v15 = vld [vmem:[%s4343_s26 + $0xd8] sm:$0xff] }
  0xef   : > { %1478 = vmatmul.mubr.f32.gmra.mxu0 %v7067_v21  ;;  %3394 = vmatprep.subr.mxu1 %v617_v60  ;;  %v540_v60 = vld [vmem:[%s7037_s1 + $0x458] sm:$0xff]  ;;  %v5605_v21 = vld [vmem:[%s4343_s26 + $0xd0] sm:$0xff] }
  0xf0   : > { %3298 = vmatprep.mubr.msk.f32.mxu0 %vm781_vm1, %v7068_v56  ;;  %3395 = vmatpush3.msra.mxu1 %v505_v8  ;;  %v5615_v56 = vld [vmem:[%s4343_s26 + $0xf8] sm:$0xff] }
  0xf1   : > { %1591 = vmatmul.mubr.f32.gmra.mxu1 %v7069_v61  ;;  %1963 = vmatprep.subr.mxu0 %v7053_v25  ;;  %v421_v61 = vld [vmem:[%s7037_s1 + $0xa0] sm:$0xff] }
  0xf2   : > { %1596 = vmatprep.mubr.f32.mxu1 %v4809_v41  ;;  %3396 = vmatprep.subr.mxu1 %v610_v38  ;;  %v484_v41 = vld [vmem:[%s7037_s1 + $0x298] sm:$0xff]  ;;  %v687_v38 = vld [vmem:[%s7037_s1 + $0x8f0] sm:$0xff] }
  0xf3   : > { %1484 = vmatmul.mubr.f32.gmra.mxu0 %v7070_v24  ;;  %3397 = vmatpush3.msra.mxu1 %v498_v10 }
  0xf4   : > { %3299 = vmatprep.mubr.msk.f32.mxu0 %vm781_vm1, %v7071_v27  ;;  %3398 = vmatprep.subr.mxu1 %v603_v5  ;;  %v526_v5 = vld [vmem:[%s7037_s1 + $0x3e8] sm:$0xff]  ;;  %v519_v27 = vld [vmem:[%s7037_s1 + $0x3b0] sm:$0xff] }
  0xf5   : > { %1597 = vmatmul.mubr.f32.gmra.mxu1 %v4828_v52  ;;  %v5446_v52 = vld [vmem:[%s4343_s26 + $0x18] sm:$0xff] }
  0xf6   : > { %1602 = vmatprep.mubr.f32.mxu1 %v7072_v7  ;;  %3399 = vmatpush3.msra.mxu1 %v491_v54  ;;  %v5635_v54 = vld [vmem:[%s4343_s26 + $0xf0] sm:$0xff]  ;;  %v5652_v7 = vld [vmem:[%s4343_s26 + $0x118] sm:$0xff] }
  0xf7   : > { %1490 = vmatmul.mubr.f32.gmra.mxu0 %v7073_v0  ;;  %3400 = vmatprep.subr.mxu1 %v596_v57  ;;  %v680_v57 = vld [vmem:[%s7037_s1 + $0x8b8] sm:$0xff]  ;;  %v673_v0 = vld [vmem:[%s7037_s1 + $0x880] sm:$0xff] }
  0xf8   : > { %3302 = vmatprep.mubr.msk.f32.mxu0 %vm781_vm1, %v5446_v52  ;;  %3401 = vmatpush3.msra.mxu1 %v484_v41 }
  0xf9   : > { %1603 = vmatmul.mubr.f32.gmra.mxu1 %v4863_v11  ;;  %3402 = vmatprep.subr.mxu1 %v589_v62 }
  0xfa   : > { %1608 = vmatprep.mubr.f32.mxu1 %v4879_v28  ;;  %3403 = vmatpush3.msra.mxu1 %v477_v9  ;;  %v5465_v11 = vpop.f32.mrf.mxu1  ;;  %v722_v28 = vld [vmem:[%s7037_s1 + $0xa08] sm:$0xff] }
  0xfb   : > { %1722 = vmatmul.mubr.f32.vlgmr.msra.gmra.mxu0 %v5459_v34  ;;  %3404 = vmatprep.subr.mxu1 %v582_v23  ;;  %v3924_v9 = vld [vmem:[%s4343_s26 + $0x8] sm:$0xff]  ;;  %v3925_v23 = vld [vmem:[%s4343_s26] sm:$0xff] }
  0xfc   : > { %1964 = vmatpush1.msra.mxu0 %v736_v3  ;;  %3303 = vmatprep.mubr.msk.f32.mxu0 %vm781_vm1, %v5468_v12  ;;  %v5477_v49 = vpop.f32.mrf.mxu1 }
  0xfd   : > { %1609 = vmatmul.mubr.f32.gmra.mxu1 %v4898_v46  ;;  %1965 = vmatprep.subr.mxu0 %v7053_v25  ;;  %v715_v46 = vld [vmem:[%s7037_s1 + $0x9d0] sm:$0xff] }
  0xfe   : > { %1614 = vmatprep.mubr.f32.mxu1 %v4918_v2  ;;  %1966 = vmatpush1.msra.mxu0 %v729_v37  ;;  %v470_v2 = vld [vmem:[%s7037_s1 + $0x228] sm:$0xff]  ;;  %v5675_v37 = vld [vmem:[%s4343_s26 + $0x138] sm:$0xff] }
  0xff   : > { %1728 = vmatmul.mubr.f32.gmra.mxu0 %v5481_v14  ;;  %1967 = vmatprep.subr.mxu0 %v7053_v25  ;;  %v5496_v17 = vpop.f32.mrf.mxu1 }
 0x100   : > { %3304 = vmatprep.mubr.msk.f32.mxu0 %vm781_vm1, %v5489_v16  ;;  %1968 = vmatpush1.msra.mxu0 %v722_v28  ;;  %v666_v28 = vld [vmem:[%s7037_s1 + $0x848] sm:$0xff] }
 0x101   : > { %1615 = vmatmul.mubr.f32.gmra.mxu1 %v4928_v13  ;;  %1969 = vmatprep.subr.mxu0 %v7053_v25  ;;  %v5504_v26 = vpop.f32.mrf.mxu1  ;;  %v463_v13 = vld [vmem:[%s7037_s1 + $0x1f0] sm:$0xff] }
 0x102   : > { %1620 = vmatprep.mubr.f32.mxu1 %v4947_v40  ;;  %1970 = vmatpush1.msra.mxu0 %v715_v46  ;;  %v568_v40 = vld [vmem:[%s7037_s1 + $0x538] sm:$0xff]  ;;  %v5683_v46 = vld [vmem:[%s4343_s26 + $0x130] sm:$0xff] }
 0x103   : > { %1734 = vmatmul.mubr.f32.gmra.mxu0 %v5507_v44  ;;  %3405 = vmatpush3.msra.mxu1 %v470_v2  ;;  %v3928_v2 = vld [vmem:[%s4343_s26 + $0x28] sm:$0xff] }
 0x104   : > { %3305 = vmatprep.mubr.msk.f32.mxu0 %vm781_vm1, %v5514_v47  ;;  %3406 = vmatprep.subr.mxu1 %v575_v50  ;;  %v5526_v20 = vpop.f32.mrf.mxu1 }
 0x105   : > { %1621 = vmatmul.mubr.f32.gmra.mxu1 %v4956_v53  ;;  %1971 = vmatprep.subr.mxu0 %v7053_v25  ;;  %v456_v53 = vld [vmem:[%s7037_s1 + $0x1b8] sm:$0xff] }
 0x106   : > { %1626 = vmatprep.mubr.f32.mxu1 %v4975_v18  ;;  %3407 = vmatpush3.msra.mxu1 %v463_v13  ;;  %v5536_v39 = vpop.f32.mrf.mxu1  ;;  %v561_v18 = vld [vmem:[%s7037_s1 + $0x500] sm:$0xff] }
 0x107   : > { %1740 = vmatmul.mubr.f32.gmra.mxu0 %v5530_v22  ;;  %3408 = vmatprep.subr.mxu1 %v568_v40  ;;  %v5693_v40 = vld [vmem:[%s4343_s26 + $0x158] sm:$0xff] }
 0x108   : > { %3306 = vmatprep.mubr.msk.f32.mxu0 %vm781_vm1, %v5539_v32  ;;  %1972 = vmatpush1.msra.mxu0 %v708_v30  ;;  %v2139_v30 = vld [vmem:[%s7039_s3 + $0xf8] sm:$0xff] }
 0x109   : > { %1627 = vmatmul.mubr.f32.gmra.mxu1 %v4984_v36  ;;  %1973 = vmatprep.subr.mxu0 %v7053_v25  ;;  %v5552_v51 = vpop.f32.mrf.mxu1  ;;  %v449_v36 = vld [vmem:[%s7037_s1 + $0x180] sm:$0xff] }
 0x10a   : > { %1632 = vmatprep.mubr.f32.mxu1 %v5003_v6  ;;  %3409 = vmatpush3.msra.mxu1 %v456_v53  ;;  %v554_v6 = vld [vmem:[%s7037_s1 + $0x4c8] sm:$0xff]  ;;  %v3930_v53 = vld [vmem:[%s4343_s26 + $0x20] sm:$0xff] }
 0x10b   : > { %1746 = vmatmul.mubr.f32.gmra.mxu0 %v5555_v35  ;;  %3410 = vmatprep.subr.mxu1 %v561_v18  ;;  %v5569_v55 = vpop.f32.mrf.mxu1  ;;  %v659_v18 = vld [vmem:[%s7037_s1 + $0x810] sm:$0xff] }
 0x10c   : > { %3307 = vmatprep.mubr.msk.f32.mxu0 %vm781_vm1, %v5562_v45  ;;  %1974 = vmatpush1.msra.mxu0 %v701_v42 }
 0x10d   : > { %1633 = vmatmul.mubr.f32.gmra.mxu1 %v5012_v33  ;;  %1975 = vmatprep.subr.mxu0 %v7053_v25  ;;  %v694_v33 = vld [vmem:[%s7037_s1 + $0x928] sm:$0xff] }
 0x10e   : > { %1638 = vmatprep.mubr.f32.mxu1 %v5034_v29  ;;  %3411 = vmatpush3.msra.mxu1 %v449_v36  ;;  %v5587_v4 = vpop.f32.mrf.mxu1  ;;  %v435_v29 = vld [vmem:[%s7037_s1 + $0x110] sm:$0xff]  ;;  %v3931_v36 = vld [vmem:[%s4343_s26 + $0x48] sm:$0xff] }
 0x10f   : > { %1752 = vmatmul.mubr.f32.gmra.mxu0 %v5581_v58  ;;  %3412 = vmatprep.subr.mxu1 %v554_v6 }
 0x110   : > { %3308 = vmatprep.mubr.msk.f32.mxu0 %vm781_vm1, %v5590_v15  ;;  %3413 = vmatpush3.msra.mxu1 %v442_v63  ;;  %v5601_v8 = vpop.f32.mrf.mxu1  ;;  %v5711_v63 = vld [vmem:[%s4343_s26 + $0x150] sm:$0xff] }
 0x111   : > { %1639 = vmatmul.mubr.f32.gmra.mxu1 %v5040_v19  ;;  %3414 = vmatprep.subr.mxu1 %v547_v48  ;;  %v428_v19 = vld [vmem:[%s7037_s1 + $0xd8] sm:$0xff] }
 0x112   : > { %1976 = vmatpush1.msra.mxu0 %v694_v33  ;;  %1644 = vmatprep.mubr.f32.mxu1 %v5062_v1  ;;  %v533_v1 = vld [vmem:[%s7037_s1 + $0x420] sm:$0xff]  ;;  %v652_v48 = vld [vmem:[%s7037_s1 + $0x7d8] sm:$0xff] }
 0x113   : > { %1758 = vmatmul.mubr.f32.gmra.mxu0 %v5605_v21  ;;  %3415 = vmatpush3.msra.mxu1 %v435_v29  ;;  %v5622_v10 = vpop.f32.mrf.mxu1  ;;  %v5718_v33 = vld [vmem:[%s4343_s26 + $0x178] sm:$0xff] }
 0x114   : > { %3416 = vmatprep.subr.mxu1 %v540_v60  ;;  %3309 = vmatprep.mubr.msk.f32.mxu0 %vm781_vm1, %v5615_v56 }
 0x115   : > { %1645 = vmatmul.mubr.f32.gmra.mxu1 %v5068_v59  ;;  %1977 = vmatprep.subr.mxu0 %v7053_v25  ;;  %v5632_v24 = vpop.f32.mrf.mxu1  ;;  %v414_v59 = vld [vmem:[%s7037_s1 + $0x68] sm:$0xff] }
 0x116   : > { %3417 = vmatpush3.msra.mxu1 %v428_v19  ;;  %1978 = vmatpush1.msra.mxu0 %v687_v38  ;;  %v3934_v19 = vld [vmem:[%s4343_s26 + $0x40] sm:$0xff] }
 0x117   : > { %1764 = vmatmul.mubr.f32.gmra.mxu0 %v5635_v54  ;;  %3418 = vmatprep.subr.mxu1 %v533_v1  ;;  %v645_v38 = vld [vmem:[%s7037_s1 + $0x7a0] sm:$0xff]  ;;  %v3935_v1 = vld [vmem:[%s4343_s26 + $0x68] sm:$0xff] }
 0x118   : > { %1650 = vmatprep.mubr.f32.mxu1 %v5090_v31  ;;  %3419 = vmatpush3.msra.mxu1 %v421_v61  ;;  %v5649_v41 = vpop.f32.mrf.mxu1  ;;  %v407_v31 = vld [vmem:[%s7037_s1 + $0x30] sm:$0xff] }
 0x119   : > { %1651 = vmatmul.mubr.f32.gmra.mxu1 %v5096_v43  ;;  %3420 = vmatprep.subr.mxu1 %v526_v5  ;;  %v5661_v43 = vld [vmem:[%s4343_s26 + $0x110] sm:$0xff] }
 0x11a   : > { %3310 = vmatprep.mubr.msk.f32.mxu0 %vm781_vm1, %v5652_v7  ;;  %3421 = vmatpush3.msra.mxu1 %v414_v59  ;;  %v5664_v62 = vpop.f32.mrf.mxu1  ;;  %v5735_v5 = vld [vmem:[%s4343_s26 + $0x170] sm:$0xff]  ;;  %v638_v59 = vld [vmem:[%s7037_s1 + $0x768] sm:$0xff] }
 0x11b   : > { %1979 = vmatprep.subr.mxu0 %v7053_v25  ;;  %1770 = vmatmul.mubr.f32.gmra.mxu0 %v5661_v43 }
 0x11c   : > { %3422 = vmatprep.subr.mxu1 %v519_v27  ;;  %1980 = vmatpush1.msra.mxu0 %v680_v57  ;;  %v5745_v57 = vld [vmem:[%s4343_s26 + $0x198] sm:$0xff] }
 0x11d   : > { %3423 = vmatpush3.msra.mxu1 %v407_v31  ;;  %1882 = vmatprep.mubr.f32.mxu1 %v3924_v9  ;;  %v5672_v3 = vpop.f32.mrf.mxu1  ;;  %v3938_v31 = vld [vmem:[%s4343_s26 + $0x60] sm:$0xff] }
 0x11e   : > { %1883 = vmatmul.mubr.f32.vlgmr.msra.gmra.mxu1 %v3925_v23  ;;  %1981 = vmatprep.subr.mxu0 %v7053_v25  ;;  %7074 = vst [vmem:[#allocation7_spill] sm:$0xff] %v5672_v3 }
 0x11f   : > { %3311 = vmatprep.mubr.msk.f32.mxu0 %vm781_vm1, %v5675_v37  ;;  %1982 = vmatpush1.msra.mxu0 %v673_v0  ;;  %v5689_v13 = vpop.f32.mrf.mxu1  ;;  %v631_v0 = vld [vmem:[%s7037_s1 + $0x730] sm:$0xff] }
 0x120   : > { %1776 = vmatmul.mubr.f32.gmra.mxu0 %v5683_v46  ;;  %1887 = vmatprep.mubr.f32.mxu1 %v3928_v2  ;;  %v5687_v50 = vpop.f32.mrf.mxu0  ;;  %v5760_v2 = vld [vmem:[%s4343_s26 + $0x190] sm:$0xff] }
 0x121   : > { %1983 = vmatprep.subr.mxu0 %v7053_v25  ;;  %3312 = vmatprep.mubr.msk.f32.mxu0 %vm781_vm1, %v5693_v40 }
 0x122   : > { %1888 = vmatmul.mubr.f32.gmra.mxu1 %v3930_v53  ;;  %1984 = vmatpush1.msra.mxu0 %v666_v28  ;;  %v5704_v42 = vpop.f32.mrf.mxu0  ;;  %v3939_v28 = vld [vmem:[%s4343_s26 + $0x88] sm:$0xff] }
 0x123   : > { %1892 = vmatprep.mubr.f32.mxu1 %v3931_v36  ;;  %1985 = vmatprep.subr.mxu0 %v7053_v25  ;;  %v5708_v6 = vpop.f32.mrf.mxu1  ;;  %v2123_v36 = vld [vmem:[%s7039_s3 + $0x78] sm:$0xff] }
 0x124   : > { %7075 = vst [vmem:[#allocation8_spill] sm:$0xff] %v5708_v6  ;;  %1782 = vmatmul.mubr.f32.gmra.mxu0 %v5711_v63  ;;  %3472 = vmatprep.subr.mxu1 %v2139_v30  ;;  %v743_v30 = vld [vmem:[%s7037_s1 + $0xab0] sm:$0xf]  ;;  %v2119_v6 = vld [vmem:[%s7039_s3 + $0x58] sm:$0xff] }
 0x125   : > { %3313 = vmatprep.mubr.msk.f32.mxu0 %vm781_vm1, %v5718_v33  ;;  %1986 = vmatpush1.msra.mxu0 %v659_v18  ;;  %v5722_v29 = vpop.f32.mrf.mxu0  ;;  %v5724_v60 = vpop.f32.mrf.mxu1  ;;  %v5770_v18 = vld [vmem:[%s4343_s26 + $0x1b8] sm:$0xff] }
 0x126   : > { %7076 = vst [vmem:[#allocation6_spill] sm:$0xff] %v5724_v60  ;;  %1893 = vmatmul.mubr.f32.gmra.mxu1 %v3934_v19  ;;  %1987 = vmatprep.subr.mxu0 %v7053_v25  ;;  %v3942_v19 = vld [vmem:[%s4343_s26 + $0x80] sm:$0xff] }
 0x127   : > { %1897 = vmatprep.mubr.f32.mxu1 %v3935_v1  ;;  %1988 = vmatpush1.msra.mxu0 %v652_v48  ;;  %v5732_v61 = vpop.f32.mrf.mxu0  ;;  %v3943_v1 = vld [vmem:[%s4343_s26 + $0xa8] sm:$0xff] }
 0x128   : > { %1788 = vmatmul.mubr.f32.gmra.mxu0 %v5735_v5  ;;  %1989 = vmatprep.subr.mxu0 %v7053_v25  ;;  %v5742_v27 = vpop.f32.mrf.mxu1 }
 0x129   : > { %7077 = vst [vmem:[#allocation10_spill] sm:$0xff] %v5742_v27  ;;  %3314 = vmatprep.mubr.msk.f32.mxu0 %vm781_vm1, %v5745_v57  ;;  %1990 = vmatpush1.msra.mxu0 %v645_v38  ;;  %v2138_v38 = vld [vmem:[%s7039_s3 + $0xf0] sm:$0xff]  ;;  %v3947_v27 = vld [vmem:[%s4343_s26 + $0xc8] sm:$0xff] }
 0x12a   : > { %1898 = vmatmul.mubr.f32.gmra.mxu1 %v3938_v31  ;;  %1991 = vmatprep.subr.mxu0 %v7053_v25  ;;  %v5754_v9 = vpop.f32.mrf.mxu0  ;;  %v5756_v23 = vpop.f32.mrf.mxu1 }
 0x12b   : > { %7078 = vst [vmem:[#allocation11_spill] sm:$0xff] %v5756_v23  ;;  %1902 = vmatprep.mubr.f32.mxu1 %v3939_v28  ;;  %1992 = vmatpush1.msra.mxu0 %v638_v59  ;;  %v5794_v28 = vld [vmem:[%s4343_s26 + $0x1b0] sm:$0xff] }
 0x12c   : > { %1794 = vmatmul.mubr.f32.gmra.mxu0 %v5760_v2  ;;  %1993 = vmatprep.subr.mxu0 %v7053_v25  ;;  %v5767_v53 = vpop.f32.mrf.mxu0  ;;  %v5821_v23 = vld [vmem:[%s4343_s26 + $0x1d0] sm:$0xff] }
 0x12d   : > { %3315 = vmatprep.mubr.msk.f32.mxu0 %vm781_vm1, %v5770_v18  ;;  %1994 = vmatpush1.msra.mxu0 %v631_v0  ;;  %v5777_v48 = vpop.f32.mrf.mxu1  ;;  %v2171_v0 = vld [vmem:[%s7039_s3 + $0x1f8] sm:$0xff] }
 0x12e   : > { %7079 = vst [vmem:[#allocation9_spill] sm:$0xff] %v5777_v48  ;;  %1903 = vmatmul.mubr.f32.gmra.mxu1 %v3942_v19  ;;  %2025 = vmatprep.subr.mxu0 %v7053_v25  ;;  %v2122_v19 = vld [vmem:[%s7039_s3 + $0x70] sm:$0xff]  ;;  %v3946_v48 = vld [vmem:[%s4343_s26 + $0xa0] sm:$0xff] }
 0x12f   : > { %1907 = vmatprep.mubr.f32.mxu1 %v3943_v1  ;;  %3318 = vmatpush2.msk.msra.mxu0 %vm830_vm0, %v743_v30  ;;  %v5786_v59 = vpop.f32.mrf.mxu0  ;;  %v5788_v31 = vpop.f32.mrf.mxu1  ;;  %v5801_v30 = vld [vmem:[%s4343_s26 + $0x1d8] sm:$0xff]  ;;  %v2137_v1 = vld [vmem:[%s7039_s3 + $0xe8] sm:$0xff] }
 0x130   : > { %7080 = vst [vmem:[#allocation12_spill] sm:$0xff] %v5788_v31  ;;  %1800 = vmatmul.mubr.f32.gmra.mxu0 %v5794_v28  ;;  %3473 = vmatpush3.msra.mxu1 %v2123_v36  ;;  %v2121_v36 = vld [vmem:[%s7039_s3 + $0x68] sm:$0xff] }
 0x131   : > { %3316 = vmatprep.mubr.msk.f32.mxu0 %vm781_vm1, %v5801_v30  ;;  %3474 = vmatprep.subr.mxu1 %v2138_v38  ;;  %v5808_v25 = vpop.f32.mrf.mxu0  ;;  %v2136_v38 = vld [vmem:[%s7039_s3 + $0xe0] sm:$0xff] }
 0x132   : > { %1908 = vmatmul.mubr.f32.gmra.mxu1 %v3946_v48  ;;  %v5814_v31 = vpop.f32.mrf.mxu1  ;;  %3552 = vmatprep.subr.mxu0 %v2171_v0  ;;  %v2120_v48 = vld [vmem:[%s7039_s3 + $0x60] sm:$0xff] }
 0x133   : > { %7081 = vst [vmem:[#allocation13_spill] sm:$0xff] %v5814_v31  ;;  %1912 = vmatprep.mubr.f32.mxu1 %v3947_v27  ;;  %3475 = vmatpush3.msra.mxu1 %v2122_v19  ;;  %v5832_v27 = vld [vmem:[%s4343_s26 + $0x1f8] sm:$0xff] }
 0x134   : > { %1806 = vmatmul.mubr.f32.gmra.mxu0 %v5821_v23  ;;  %3476 = vmatprep.subr.mxu1 %v2137_v1  ;;  %v5827_v31 = vpop.f32.mrf.mxu0  ;;  %v5829_v0 = vpop.f32.mrf.mxu1  ;;  %7083 = vst [vmem:[#allocation15_spill] sm:$0xff] %v5832_v27  ;;  %v2135_v19 = vld [vmem:[%s7039_s3 + $0xd8] sm:$0xff]  ;;  %v3950_v1 = vld [vmem:[%s4343_s26 + $0xc0] sm:$0xff] }
 0x135   : > { %7082 = vst [vmem:[#allocation14_spill] sm:$0xff] %v5829_v0  ;;  %3317 = vmatprep.mubr.msk.f32.mxu0 %vm781_vm1, %v5832_v27  ;;  %3477 = vmatpush3.msra.mxu1 %v2121_v36  ;;  %v3951_v0 = vld [vmem:[%s4343_s26 + $0xe8] sm:$0xff]  ;;  %v2134_v36 = vld [vmem:[%s7039_s3 + $0xd0] sm:$0xff] }
 0x136   : > { %1913 = vmatmul.mubr.f32.gmra.mxu1 %v3950_v1  ;;  %3478 = vmatprep.subr.mxu1 %v2136_v38  ;;  %v5843_v60 = vpop.f32.mrf.mxu0  ;;  %v5852_v27 = vld [vmem:[%s4343_s26 + $0x1f0] sm:$0xff]  ;;  %v3953_v1 = vld [vmem:[%s4343_s26 + $0xe0] sm:$0xff] }
 0x137   : > { %1917 = vmatprep.mubr.f32.mxu1 %v3951_v0  ;;  %3479 = vmatpush3.msra.mxu1 %v2120_v48  ;;  %v5849_v3 = vpop.f32.mrf.mxu1  ;;  %7085 = vst [vmem:[#allocation17_spill] sm:$0xff] %v5852_v27  ;;  %v2118_v38 = vld [vmem:[%s7039_s3 + $0x50] sm:$0xff]  ;;  %v2133_v48 = vld [vmem:[%s7039_s3 + $0xc8] sm:$0xff] }
 0x138   : > { %7084 = vst [vmem:[#allocation16_spill] sm:$0xff] %v5849_v3  ;;  %1812 = vmatmul.mubr.f32.gmra.mxu0 %v5852_v27  ;;  %3480 = vmatprep.subr.mxu1 %v2135_v19  ;;  %v2117_v19 = vld [vmem:[%s7039_s3 + $0x48] sm:$0xff] }
 0x139   : > { %3319 = vmatprep.mubr.msk.f32.mxu0 %vm781_vm1, %v5446_v52  ;;  %3481 = vmatpush3.msra.mxu1 %v2119_v6  ;;  %v5863_v0 = vpop.f32.mrf.mxu1  ;;  %v5869_v3 = vpop.f32.mrf.mxu0  ;;  %v3954_v27 = vld [vmem:[%s4343_s26 + $0x108] sm:$0xff]  ;;  %v2132_v52 = vld [vmem:[%s7039_s3 + $0xc0] sm:$0xff] }
 0x13a   : > { %7086 = vst [vmem:[#allocation18_spill] sm:$0xff] %v5863_v0  ;;  %1918 = vmatmul.mubr.f32.gmra.mxu1 %v3953_v1  ;;  %3482 = vmatprep.subr.mxu1 %v2134_v36  ;;  %v2116_v6 = vld [vmem:[%s7039_s3 + $0x40] sm:$0xff] }
 0x13b   : > { %1922 = vmatprep.mubr.f32.mxu1 %v3954_v27  ;;  %3483 = vmatpush3.msra.mxu1 %v2118_v38  ;;  %v5879_v36 = vpop.f32.mrf.mxu0  ;;  %v2131_v27 = vld [vmem:[%s7039_s3 + $0xb8] sm:$0xff]  ;;  %v3955_v1 = vld [vmem:[%s4343_s26 + $0x100] sm:$0xff] }
 0x13c   : > { %2028 = vmatmul.mubr.f32.vlgmr.msra.gmra.mxu0 %v5459_v34  ;;  %3484 = vmatprep.subr.mxu1 %v2133_v48  ;;  %v5886_v38 = vpop.f32.mrf.mxu1  ;;  %v2115_v34 = vld [vmem:[%s7039_s3 + $0x38] sm:$0xff]  ;;  %v3956_v48 = vld [vmem:[%s4343_s26 + $0x128] sm:$0xff] }
 0x13d   : > { %3320 = vmatprep.mubr.msk.f32.mxu0 %vm781_vm1, %v5468_v12  ;;  %3485 = vmatpush3.msra.mxu1 %v2117_v19  ;;  %7087 = vst [vmem:[#allocation19_spill] sm:$0xff] %v5886_v38  ;;  %v2130_v12 = vld [vmem:[%s7039_s3 + $0xb0] sm:$0xff]  ;;  %v3958_v38 = vld [vmem:[%s4343_s26 + $0x148] sm:$0xff] }
 0x13e   : > { %1923 = vmatmul.mubr.f32.gmra.mxu1 %v3955_v1  ;;  %3486 = vmatprep.subr.mxu1 %v2132_v52  ;;  %v5896_v19 = vpop.f32.mrf.mxu0  ;;  %v5898_v0 = vpop.f32.mrf.mxu1  ;;  %v2114_v52 = vld [vmem:[%s7039_s3 + $0x30] sm:$0xff] }
 0x13f   : > { %1927 = vmatprep.mubr.f32.mxu1 %v3956_v48  ;;  %3487 = vmatpush3.msra.mxu1 %v2116_v6  ;;  %7088 = vst [vmem:[#allocation20_spill] sm:$0xff] %v5898_v0  ;;  %v2129_v6 = vld [vmem:[%s7039_s3 + $0xa8] sm:$0xff]  ;;  %v3957_v48 = vld [vmem:[%s4343_s26 + $0x120] sm:$0xff] }
 0x140   : > { %2033 = vmatmul.mubr.f32.gmra.mxu0 %v5481_v14  ;;  %3488 = vmatprep.subr.mxu1 %v2131_v27  ;;  %v5909_v1 = vpop.f32.mrf.mxu0  ;;  %v2113_v14 = vld [vmem:[%s7039_s3 + $0x28] sm:$0xff] }
 0x141   : > { %3321 = vmatprep.mubr.msk.f32.mxu0 %vm781_vm1, %v5489_v16  ;;  %3489 = vmatpush3.msra.mxu1 %v2115_v34  ;;  %v5915_v27 = vpop.f32.mrf.mxu1  ;;  %v2128_v16 = vld [vmem:[%s7039_s3 + $0xa0] sm:$0xff] }
 0x142   : > { %1928 = vmatmul.mubr.f32.gmra.mxu1 %v3957_v48  ;;  %3490 = vmatprep.subr.mxu1 %v2130_v12  ;;  %7089 = vst [vmem:[#allocation21_spill] sm:$0xff] %v5915_v27  ;;  %v2112_v34 = vld [vmem:[%s7039_s3 + $0x20] sm:$0xff]  ;;  %v746_v27 = vlaneseq }
 0x143   : > { %1932 = vmatprep.mubr.f32.mxu1 %v3958_v38  ;;  %3491 = vmatpush3.msra.mxu1 %v2114_v52  ;;  %v5925_v12 = vpop.f32.mrf.mxu0  ;;  %v5927_v48 = vpop.f32.mrf.mxu1  ;;  %v2127_v38 = vld [vmem:[%s7039_s3 + $0x98] sm:$0xff]  ;;  %v3959_v52 = vld [vmem:[%s4343_s26 + $0x140] sm:$0xff] }
 0x144   : > { %2038 = vmatmul.mubr.f32.gmra.mxu0 %v5507_v44  ;;  %3492 = vmatprep.subr.mxu1 %v2129_v6  ;;  %7090 = vst [vmem:[#allocation22_spill] sm:$0xff] %v5927_v48  ;;  %v2111_v44 = vld [vmem:[%s7039_s3 + $0x18] sm:$0xff]  ;;  %v3960_v48 = vld [vmem:[%s4343_s26 + $0x168] sm:$0xff] }
 0x145   : > { %3322 = vmatprep.mubr.msk.f32.mxu0 %vm781_vm1, %v5514_v47  ;;  %3493 = vmatpush3.msra.mxu1 %v2113_v14  ;;  %v5938_v6 = vpop.f32.mrf.mxu0  ;;  %v2126_v47 = vld [vmem:[%s7039_s3 + $0x90] sm:$0xff] }
 0x146   : > { %1933 = vmatmul.mubr.f32.gmra.mxu1 %v3959_v52  ;;  %3494 = vmatprep.subr.mxu1 %v2128_v16  ;;  %v5944_v14 = vpop.f32.mrf.mxu1  ;;  %v2110_v16 = vld [vmem:[%s7039_s3 + $0x10] sm:$0xff] }
 0x147   : > { %1937 = vmatprep.mubr.f32.mxu1 %v3960_v48  ;;  %3495 = vmatpush3.msra.mxu1 %v2112_v34  ;;  %7091 = vst [vmem:[#allocation23_spill] sm:$0xff] %v5944_v14  ;;  %v2125_v34 = vld [vmem:[%s7039_s3 + $0x88] sm:$0xff]  ;;  %v3961_v14 = vld [vmem:[%s4343_s26 + $0x160] sm:$0xff] }
 0x148   : > { %2043 = vmatmul.mubr.f32.gmra.mxu0 %v5530_v22  ;;  %3496 = vmatprep.subr.mxu1 %v2127_v38  ;;  %v5955_v48 = vpop.f32.mrf.mxu0  ;;  %v5957_v52 = vpop.f32.mrf.mxu1  ;;  %v2109_v22 = vld [vmem:[%s7039_s3 + $0x8] sm:$0xff]  ;;  %v5963_v38 = vshrl.u32 %v746_v27, 7 }
 0x149   : > { %3323 = vmatprep.mubr.msk.f32.mxu0 %vm781_vm1, %v5539_v32  ;;  %3497 = vmatpush3.msra.mxu1 %v2111_v44  ;;  %7092 = vst [vmem:[#allocation24_spill] sm:$0xff] %v5957_v52  ;;  %v3962_v32 = vld [vmem:[%s4343_s26 + $0x188] sm:$0xff]  ;;  %v2124_v44 = vld [vmem:[%s7039_s3 + $0x80] sm:$0xff]  ;;  %v2155_v52 = vld [vmem:[%s7039_s3 + $0x178] sm:$0xff] }
 0x14a   : > { %1938 = vmatmul.mubr.f32.gmra.mxu1 %v3961_v14  ;;  %3498 = vmatprep.subr.mxu1 %v2126_v47  ;;  %7093 = vst [vmem:[#allocation25_spill] sm:$0xff] %v5963_v38  ;;  %v5969_v0 = vpop.f32.mrf.mxu0  ;;  %v2108_v47 = vld [vmem:[%s7039_s3] sm:$0xff]  ;;  %v752_v27 = vsub.s32 1, %v5963_v38 }
 0x14b   : > { %1942 = vmatprep.mubr.f32.mxu1 %v3962_v32  ;;  %3499 = vmatpush3.msra.mxu1 %v2110_v16  ;;  %v5975_v14 = vpop.f32.mrf.mxu1  ;;  %v2203_v16 = vld [vmem:[%s7039_s3 + $0x2f8] sm:$0xff]  ;;  %v3963_v32 = vld [vmem:[%s4343_s26 + $0x180] sm:$0xff] }
 0x14c   : > { %2048 = vmatmul.mubr.f32.gmra.mxu0 %v5555_v35  ;;  %3500 = vmatprep.subr.mxu1 %v2125_v34  ;;  %7094 = vst [vmem:[#allocation26_spill] sm:$0xff] %v5975_v14  ;;  %v3964_v14 = vld [vmem:[%s4343_s26 + $0x1a8] sm:$0xff] }
 0x14d   : > { %3324 = vmatprep.mubr.msk.f32.mxu0 %vm781_vm1, %v5562_v45  ;;  %3501 = vmatpush3.msra.mxu1 %v2109_v22  ;;  %v5986_v34 = vpop.f32.mrf.mxu1  ;;  %v2170_v45 = vld [vmem:[%s7039_s3 + $0x1f0] sm:$0xff]  ;;  %v5998_v22 = vld [vmem:[%s7038_s2] sm:$0x7f] }
 0x14e   : > { %1943 = vmatmul.mubr.f32.gmra.mxu1 %v3963_v32  ;;  %3502 = vmatprep.subr.mxu1 %v2124_v44  ;;  %v5984_v35 = vpop.f32.mrf.mxu0  ;;  %v3965_v44 = vld [vmem:[%s4343_s26 + $0x1a0] sm:$0xff] }
 0x14f   : > { %7095 = vst [vmem:[#allocation27_spill] sm:$0xff] %v5984_v35  ;;  %1947 = vmatprep.mubr.f32.mxu1 %v3964_v14  ;;  %3503 = vmatpush3.msra.mxu1 %v2108_v47  ;;  %v2154_v47 = vld [vmem:[%s7039_s3 + $0x170] sm:$0xff]  ;;  %v6008_v14 = vrot.slane %v5998_v22, %v752_v27  ;;  %v3966_v27 = vld [vmem:[%s4343_s26 + $0x1c8] sm:$0xff] }
 0x150   : > { %2053 = vmatmul.mubr.f32.gmra.mxu0 %v5581_v58  ;;  %v6002_v32 = vpop.f32.mrf.mxu0  ;;  %3632 = vmatprep.subr.mxu1 %v2203_v16  ;;  %v6012_v35 = vpop.f32.mrf.mxu1  ;;  %v2169_v58 = vld [vmem:[%s7039_s3 + $0x1e8] sm:$0xff] }
 0x151   : > { %7096 = vst [vmem:[#allocation28_spill] sm:$0xff] %v6002_v32  ;;  %3325 = vmatprep.mubr.msk.f32.mxu0 %vm781_vm1, %v5590_v15  ;;  %7097 = vst [vmem:[#allocation29_spill] sm:$0xff] %v6012_v35  ;;  %3553 = vmatpush3.msra.mxu0 %v2155_v52  ;;  %v2153_v16 = vld [vmem:[%s7039_s3 + $0x168] sm:$0xff]  ;;  %v2168_v52 = vld [vmem:[%s7039_s3 + $0x1e0] sm:$0xff] }
 0x152   : > { %1948 = vmatmul.mubr.f32.gmra.mxu1 %v3965_v44  ;;  %3554 = vmatprep.subr.mxu0 %v2170_v45  ;;  %v6024_v15 = vpop.f32.mrf.mxu1  ;;  %v7099_v44 = vsub.s32 0, %v5963_v38  ;;  %v3967_v35 = vld [vmem:[%s4343_s26 + $0x1c0] sm:$0xff] }
 0x153   : > { %1952 = vmatprep.mubr.f32.mxu1 %v3966_v27  ;;  %v6022_v32 = vpop.f32.mrf.mxu0  ;;  %3555 = vmatpush3.msra.mxu0 %v2154_v47  ;;  %v2152_v27 = vld [vmem:[%s7039_s3 + $0x160] sm:$0xff]  ;;  %v921_v47 = vadd.f32 %v5704_v42, %v6008_v14  ;;  %v3968_v42 = vld [vmem:[%s4343_s26 + $0x1e8] sm:$0xff] }
 0x154   : > { %7098 = vst [vmem:[#allocation30_spill] sm:$0xff] %v6022_v32  ;;  %v6032_v45 = vrot.slane %v5998_v22, %v7099_v44  ;;  %2058 = vmatmul.mubr.f32.gmra.mxu0 %v5605_v21  ;;  %3556 = vmatprep.subr.mxu0 %v2169_v58  ;;  %v2167_v44 = vld [vmem:[%s7039_s3 + $0x1d8] sm:$0xff] }
 0x155   : > { %3326 = vmatprep.mubr.msk.f32.mxu0 %vm781_vm1, %v5615_v56  ;;  %v6042_v32 = vpop.f32.mrf.mxu0  ;;  %3557 = vmatpush3.msra.mxu0 %v2153_v16  ;;  %v6048_v21 = vpop.f32.mrf.mxu1  ;;  %v2151_v58 = vld [vmem:[%s7039_s3 + $0x158] sm:$0xff]  ;;  %v2166_v56 = vld [vmem:[%s7039_s3 + $0x1d0] sm:$0xff] }
 0x156   : > { %1953 = vmatmul.mubr.f32.gmra.mxu1 %v3967_v35  ;;  %7100 = vst [vmem:[#allocation31_spill] sm:$0xff] %v6048_v21  ;;  %3558 = vmatprep.subr.mxu0 %v2168_v52  ;;  %v919_v16 = vadd.f32 %v5687_v50, %v6032_v45  ;;  %v2150_v21 = vld [vmem:[%s7039_s3 + $0x150] sm:$0xff]  ;;  %v3969_v50 = vld [vmem:[%s4343_s26 + $0x1e0] sm:$0xff] }
 0x157   : > { %1957 = vmatprep.mubr.f32.mxu1 %v3968_v42  ;;  %3559 = vmatpush3.msra.mxu0 %v2152_v27  ;;  %v6062_v52 = vpop.f32.mrf.mxu1  ;;  %v1082_v27 = vadd.f32 %v5477_v49, %v921_v47  ;;  %v927_v42 = vadd.f32 %v5732_v61, %v6008_v14  ;;  %v2149_v49 = vld [vmem:[%s7039_s3 + $0x148] sm:$0xff] }
 0x158   : > { %2063 = vmatmul.mubr.f32.gmra.mxu0 %v5635_v54  ;;  %v6060_v35 = vpop.f32.mrf.mxu0  ;;  %3560 = vmatprep.subr.mxu0 %v2167_v44  ;;  %v2165_v54 = vld [vmem:[%s7039_s3 + $0x1c8] sm:$0xff]  ;;  %v1080_v61 = vadd.f32 %v5465_v11, %v919_v16  ;;  %v931_v16 = vadd.f32 %v5754_v9, %v6032_v45 }
 0x159   : > { %3327 = vmatprep.mubr.msk.f32.mxu0 %vm781_vm1, %v5652_v7  ;;  %3561 = vmatpush3.msra.mxu0 %v2151_v58  ;;  %v2164_v7 = vld [vmem:[%s7039_s3 + $0x1c0] sm:$0xff]  ;;  %v925_v58 = vadd.f32 %v5722_v29, %v6032_v45 }
 0x15a   : > { %1958 = vmatmul.mubr.f32.gmra.mxu1 %v3969_v50  ;;  %v6076_v44 = vpop.f32.mrf.mxu0  ;;  %3562 = vmatprep.subr.mxu0 %v2166_v56  ;;  %v6081_v47 = vpop.f32.mrf.mxu1  ;;  %v2148_v56 = vld [vmem:[%s7039_s3 + $0x140] sm:$0xff] }
 0x15b   : > { %2325 = vmatprep.mubr.f32.mxu1 %v1082_v27  ;;  %3563 = vmatpush3.msra.mxu0 %v2150_v21  ;;  %v1088_v27 = vadd.f32 %v5504_v26, %v927_v42  ;;  %v933_v21 = vadd.f32 %v5767_v53, %v6008_v14  ;;  %v2147_v26 = vld [vmem:[%s7039_s3 + $0x138] sm:$0xff]  ;;  %v1086_v53 = vadd.f32 %v5496_v17, %v925_v58  ;;  %v2161_v17 = vld [vmem:[%s7039_s3 + $0x1a8] sm:$0xff] }
 0x15c   : > { %2068 = vmatmul.mubr.f32.gmra.mxu0 %v5661_v43  ;;  %3564 = vmatprep.subr.mxu0 %v2165_v54  ;;  %v6100_v11 = vpop.f32.mrf.mxu1  ;;  %v2163_v43 = vld [vmem:[%s7039_s3 + $0x1b8] sm:$0xff]  ;;  %v2146_v54 = vld [vmem:[%s7039_s3 + $0x130] sm:$0xff] }
 0x15d   : > { %3328 = vmatprep.mubr.msk.f32.mxu0 %vm781_vm1, %v5675_v37  ;;  %v6098_v50 = vpop.f32.mrf.mxu0  ;;  %3565 = vmatpush3.msra.mxu0 %v2149_v49  ;;  %v2162_v37 = vld [vmem:[%s7039_s3 + $0x1b0] sm:$0xff]  ;;  %v1094_v49 = vadd.f32 %v5536_v39, %v933_v21  ;;  %v2145_v39 = vld [vmem:[%s7039_s3 + $0x128] sm:$0xff]  ;;  %v945_v21 = vadd.f32 %v5843_v60, %v6008_v14 }
 0x15e   : > { %2326 = vmatmul.mubr.f32.vlgmr.msra.gmra.mxu1 %v1080_v61  ;;  %3566 = vmatprep.subr.mxu0 %v2164_v7  ;;  %v939_v7 = vadd.f32 %v5808_v25, %v6008_v14  ;;  %v2160_v25 = vld [vmem:[%s7039_s3 + $0x1a0] sm:$0xff]  ;;  %v937_v61 = vadd.f32 %v5786_v59, %v6032_v45  ;;  %v2143_v59 = vld [vmem:[%s7039_s3 + $0x118] sm:$0xff] }
 0x15f   : > { %2330 = vmatprep.mubr.f32.mxu1 %v1088_v27  ;;  %v6108_v29 = vpop.f32.mrf.mxu0  ;;  %3567 = vmatpush3.msra.mxu0 %v2148_v56  ;;  %v2144_v56 = vld [vmem:[%s7039_s3 + $0x120] sm:$0xff] }
 0x160   : > { %2073 = vmatmul.mubr.f32.gmra.mxu0 %v5683_v46  ;;  %v6117_v42 = vpop.f32.mrf.mxu1  ;;  %3568 = vmatprep.subr.mxu0 %v2163_v43  ;;  %v1100_v27 = vadd.f32 %v5569_v55, %v939_v7  ;;  %v1098_v43 = vadd.f32 %v5552_v51, %v937_v61  ;;  %v2157_v51 = vld [vmem:[%s7039_s3 + $0x188] sm:$0xff] }
 0x161   : > { %3329 = vmatprep.mubr.msk.f32.mxu0 %vm781_vm1, %v5693_v40  ;;  %3569 = vmatpush3.msra.mxu0 %v2147_v26  ;;  %v1092_v40 = vadd.f32 %v5526_v20, %v931_v16  ;;  %v943_v26 = vadd.f32 %v5827_v31, %v6032_v45  ;;  %v951_v16 = vadd.f32 %v5879_v36, %v6008_v14  ;;  %v760_v31 = vsub.s32 3, %v5963_v38 }
 0x162   : > { %2331 = vmatmul.mubr.f32.gmra.mxu1 %v1086_v53  ;;  %v6130_v46 = vpop.f32.mrf.mxu0  ;;  %v6132_v9 = vpop.f32.mrf.mxu1  ;;  %3570 = vmatprep.subr.mxu0 %v2162_v37  ;;  %v2142_v37 = vld [vmem:[%s7039_s3 + $0x110] sm:$0xff]  ;;  %v1106_v53 = vadd.f32 %v5601_v8, %v945_v21  ;;  %v2141_v8 = vld [vmem:[%s7039_s3 + $0x108] sm:$0xff] }
 0x163   : > { %2335 = vmatprep.mubr.f32.mxu1 %v1094_v49  ;;  %3571 = vmatpush3.msra.mxu0 %v2146_v54  ;;  %v1104_v36 = vadd.f32 %v5587_v4, %v943_v26  ;;  %v949_v49 = vadd.f32 %v5869_v3, %v6032_v45  ;;  %v2187_v4 = vld [vmem:[%s7039_s3 + $0x278] sm:$0xff]  ;;  %v2186_v21 = vld [vmem:[%s7039_s3 + $0x270] sm:$0xff]  ;;  %v961_v26 = vadd.f32 %v5925_v12, %v6032_v45 }
 0x164   : > { %2078 = vmatmul.mubr.f32.gmra.mxu0 %v5711_v63  ;;  %v6144_v58 = vpop.f32.mrf.mxu0  ;;  %3572 = vmatprep.subr.mxu0 %v2161_v17  ;;  %v2159_v63 = vld [vmem:[%s7039_s3 + $0x198] sm:$0xff] }
 0x165   : > { %3330 = vmatprep.mubr.msk.f32.mxu0 %vm781_vm1, %v5718_v33  ;;  %v6154_v20 = vpop.f32.mrf.mxu1  ;;  %3573 = vmatpush3.msra.mxu0 %v2145_v39  ;;  %v2158_v33 = vld [vmem:[%s7039_s3 + $0x190] sm:$0xff]  ;;  %v2140_v39 = vld [vmem:[%s7039_s3 + $0x100] sm:$0xff]  ;;  %v1110_v61 = vadd.f32 %v5622_v10, %v949_v49 }
 0x166   : > { %2336 = vmatmul.mubr.f32.gmra.mxu1 %v1092_v40  ;;  %3574 = vmatprep.subr.mxu0 %v2160_v25  ;;  %v1112_v25 = vadd.f32 %v5632_v24, %v951_v16  ;;  %v957_v40 = vadd.f32 %v5909_v1, %v6008_v14  ;;  %v6220_v24 = vrot.slane %v5998_v22, %v760_v31  ;;  %v7102_v49 = vld [vmem:[#allocation7_spill] sm:$0xff] }
 0x167   : > { %2340 = vmatprep.mubr.f32.mxu1 %v1100_v27  ;;  %v6162_v55 = vpop.f32.mrf.mxu0  ;;  %v6164_v60 = vpop.f32.mrf.mxu1  ;;  %3575 = vmatpush3.msra.mxu0 %v2144_v56  ;;  %v955_v56 = vadd.f32 %v5896_v19, %v6032_v45  ;;  %v756_v27 = vsub.s32 2, %v5963_v38 }
 0x168   : > { %2083 = vmatmul.mubr.f32.gmra.mxu0 %v5735_v5  ;;  %3576 = vmatprep.subr.mxu0 %v2159_v63  ;;  %v1118_v63 = vadd.f32 %v5664_v62, %v957_v40  ;;  %v1243_v62 = vadd.f32 %v5986_v34, %v6220_v24  ;;  %v2184_v34 = vld [vmem:[%s7039_s3 + $0x260] sm:$0xff] }
 0x169   : > { %3331 = vmatprep.mubr.msk.f32.mxu0 %vm781_vm1, %v5745_v57  ;;  %v6181_v54 = vpop.f32.mrf.mxu0  ;;  %3577 = vmatpush3.msra.mxu0 %v2143_v59  ;;  %v2156_v57 = vld [vmem:[%s7039_s3 + $0x180] sm:$0xff]  ;;  %v963_v59 = vadd.f32 %v5938_v6, %v6008_v14 }
 0x16a   : > { %2341 = vmatmul.mubr.f32.gmra.mxu1 %v1098_v43  ;;  %v6186_v5 = vpop.f32.mrf.mxu1  ;;  %3578 = vmatprep.subr.mxu0 %v2158_v33  ;;  %v2185_v33 = vld [vmem:[%s7039_s3 + $0x268] sm:$0xff]  ;;  %v2200_v6 = vld [vmem:[%s7039_s3 + $0x2e0] sm:$0xff]  ;;  %v1116_v43 = vadd.f32 %v5649_v41, %v955_v56  ;;  %v969_v41 = vadd.f32 %v5969_v0, %v6008_v14  ;;  %v967_v0 = vadd.f32 %v5955_v48, %v6032_v45  ;;  %v2182_v48 = vld [vmem:[%s7039_s3 + $0x250] sm:$0xff] }
 0x16b   : > { %2345 = vmatprep.mubr.f32.mxu1 %v1106_v53  ;;  %3579 = vmatpush3.msra.mxu0 %v2142_v37  ;;  %v6260_v37 = vrot.slane %v5998_v22, %v756_v27  ;;  %v1124_v16 = vadd.f32 %v5689_v13, %v963_v59  ;;  %v2183_v13 = vld [vmem:[%s7039_s3 + $0x258] sm:$0xff]  ;;  %v2197_v59 = vld [vmem:[%s7039_s3 + $0x2c8] sm:$0xff] }
 0x16c   : > { %2088 = vmatmul.mubr.f32.gmra.mxu0 %v5760_v2  ;;  %v6199_v7 = vpop.f32.mrf.mxu0  ;;  %v6201_v17 = vpop.f32.mrf.mxu1  ;;  %3580 = vmatprep.subr.mxu0 %v2157_v51  ;;  %v2202_v2 = vld [vmem:[%s7039_s3 + $0x2f0] sm:$0xff] }
 0x16d   : > { %3332 = vmatprep.mubr.msk.f32.mxu0 %vm781_vm1, %v5770_v18  ;;  %3581 = vmatpush3.msra.mxu0 %v2141_v8  ;;  %v6227_v18 = vld [vmem:[%s7039_s3 + $0x300] sm:$0xff]  ;;  %v7101_v51 = vld [vmem:[#allocation15_spill] sm:$0xff]  ;;  %v7106_v56 = vld [vmem:[#allocation28_spill] sm:$0xff] }
 0x16e   : > { %2346 = vmatmul.mubr.f32.gmra.mxu1 %v1104_v36  ;;  %v6214_v3 = vpop.f32.mrf.mxu0  ;;  %3582 = vmatprep.subr.mxu0 %v2156_v57  ;;  %v1249_v57 = vadd.f32 %v6024_v15, %v6220_v24  ;;  %v2198_v36 = vld [vmem:[%s7039_s3 + $0x2d0] sm:$0xff]  ;;  %v7105_v15 = vld [vmem:[#allocation6_spill] sm:$0xff]  ;;  %v975_v27 = vadd.f32 %v7106_v56, %v6008_v14 }
 0x16f   : > { %2350 = vmatprep.mubr.f32.mxu1 %v1112_v25  ;;  %v6222_v1 = vpop.f32.mrf.mxu1  ;;  %3583 = vmatpush3.msra.mxu0 %v2140_v39  ;;  %v1122_v39 = vadd.f32 %v7102_v49, %v961_v26  ;;  %v7103_v25 = vld [vmem:[#allocation26_spill] sm:$0xff] }
 0x170   : > { %2093 = vmatmul.mubr.f32.gmra.mxu0 %v5794_v28  ;;  %3633 = vmatpush3.msra.mxu1 %v2187_v4  ;;  %v2201_v28 = vld [vmem:[%s7039_s3 + $0x2e8] sm:$0xff]  ;;  %v1241_v40 = vadd.f32 %v7103_v25, %v6260_v37  ;;  %v7104_v4 = vld [vmem:[#allocation17_spill] sm:$0xff] }
 0x171   : > { %3333 = vmatprep.mubr.msk.f32.mxu0 %vm781_vm1, %v5801_v30  ;;  %v6242_v10 = vpop.f32.mrf.mxu1  ;;  %v1401_v19 = vpop.f32.mrf.mxu0  ;;  %3634 = vmatprep.subr.mxu1 %v2202_v2  ;;  %v2196_v26 = vld [vmem:[%s7039_s3 + $0x2c0] sm:$0xff]  ;;  %v2179_v25 = vld [vmem:[%s7039_s3 + $0x238] sm:$0xff] }
 0x172   : > { %2351 = vmatmul.mubr.f32.gmra.mxu1 %v1110_v61  ;;  %3766 = vmatprep.subr.mxu0 %v6227_v18  ;;  %v1130_v61 = vadd.f32 %v7105_v15, %v969_v41 }
 0x173   : > { %2355 = vmatprep.mubr.f32.mxu1 %v1118_v63  ;;  %v1403_v30 = vpop.f32.mrf.mxu0  ;;  %3635 = vmatpush3.msra.mxu1 %v2186_v21 }
 0x174   : > { %2098 = vmatmul.mubr.f32.gmra.mxu0 %v5821_v23  ;;  %v6263_v53 = vpop.f32.mrf.mxu1  ;;  %3636 = vmatprep.subr.mxu1 %v2201_v28  ;;  %v1404_v12 = vadd.f32 %v1403_v30, %v1243_v62  ;;  %v2199_v23 = vld [vmem:[%s7039_s3 + $0x2d8] sm:$0xff]  ;;  %v1402_v28 = vadd.f32 %v1401_v19, %v1241_v40  ;;  %v7111_v40 = vld [vmem:[#allocation10_spill] sm:$0xff] }
 0x175   : > { %3334 = vmatprep.mubr.msk.f32.mxu0 %vm781_vm1, %v7101_v51  ;;  %3637 = vmatpush3.msra.mxu1 %v2185_v33  ;;  %v2181_v33 = vld [vmem:[%s7039_s3 + $0x248] sm:$0xff]  ;;  %v7107_v62 = vld [vmem:[#allocation8_spill] sm:$0xff]  ;;  %v7109_v19 = vld [vmem:[#allocation29_spill] sm:$0xff]  ;;  %v1255_v51 = vadd.f32 %v6062_v52, %v6220_v24 }
 0x176   : > { %2356 = vmatmul.mubr.f32.gmra.mxu1 %v1116_v43  ;;  %v6276_v8 = vpop.f32.mrf.mxu1  ;;  %v1407_v31 = vpop.f32.mrf.mxu0  ;;  %3638 = vmatprep.subr.mxu1 %v2200_v6  ;;  %v1128_v30 = vadd.f32 %v7107_v62, %v967_v0  ;;  %v1247_v41 = vadd.f32 %v7109_v19, %v6260_v37  ;;  %v981_v0 = vadd.f32 %v6042_v32, %v6008_v14  ;;  %v2194_v32 = vld [vmem:[%s7039_s3 + $0x2b0] sm:$0xff]  ;;  %v2193_v62 = vld [vmem:[%s7039_s3 + $0x2a8] sm:$0xff]  ;;  %v2192_v19 = vld [vmem:[%s7039_s3 + $0x2a0] sm:$0xff] }
 0x177   : > { %2360 = vmatprep.mubr.f32.mxu1 %v1124_v16  ;;  %3639 = vmatpush3.msra.mxu1 %v2184_v34  ;;  %v7108_v34 = vld [vmem:[#allocation27_spill] sm:$0xff] }
 0x178   : > { %2103 = vmatmul.mubr.f32.gmra.mxu0 %v7104_v4  ;;  %v1409_v2 = vpop.f32.mrf.mxu0  ;;  %3640 = vmatprep.subr.mxu1 %v2199_v23  ;;  %v973_v16 = vadd.f32 %v7108_v34, %v6032_v45  ;;  %v7110_v23 = vld [vmem:[#allocation11_spill] sm:$0xff]  ;;  %v1408_v52 = vadd.f32 %v1407_v31, %v1247_v41  ;;  %v7115_v41 = vld [vmem:[#allocation9_spill] sm:$0xff] }
 0x179   : > { %2470 = vmatprep.mubr.f32.mxu0 %v1404_v12  ;;  %v6298_v21 = vpop.f32.mrf.mxu1  ;;  %v1410_v63 = vadd.f32 %v1409_v2, %v1249_v57  ;;  %3641 = vmatpush3.msra.mxu1 %v2183_v13  ;;  %v2180_v12 = vld [vmem:[%s7039_s3 + $0x240] sm:$0xff]  ;;  %v1136_v13 = vadd.f32 %v7110_v23, %v975_v27  ;;  %v7113_v31 = vld [vmem:[#allocation31_spill] sm:$0xff] }
 0x17a   : > { %2361 = vmatmul.mubr.f32.gmra.mxu1 %v1122_v39  ;;  %3642 = vmatprep.subr.mxu1 %v2198_v36  ;;  %v2195_v36 = vld [vmem:[%s7039_s3 + $0x2b8] sm:$0xff]  ;;  %v1134_v4 = vadd.f32 %v7111_v40, %v973_v16  ;;  %v7112_v2 = vld [vmem:[#allocation30_spill] sm:$0xff]  ;;  %v1253_v15 = vadd.f32 %v7113_v31, %v6260_v37  ;;  %v2178_v27 = vld [vmem:[%s7039_s3 + $0x230] sm:$0xff]  ;;  %v991_v40 = vadd.f32 %v6098_v50, %v6032_v45 }
 0x17b   : > { %2365 = vmatprep.mubr.f32.mxu1 %v1130_v61  ;;  %v6307_v6 = vpop.f32.mrf.mxu1  ;;  %v1413_v43 = vpop.f32.mrf.mxu0  ;;  %3643 = vmatpush3.msra.mxu1 %v2182_v48  ;;  %v979_v48 = vadd.f32 %v7112_v2, %v6032_v45  ;;  %v2177_v34 = vld [vmem:[%s7039_s3 + $0x228] sm:$0xff]  ;;  %v2174_v50 = vld [vmem:[%s7039_s3 + $0x210] sm:$0xff] }
 0x17c   : > { %2471 = vmatmul.mubr.f32.vlgmr.msra.gmra.mxu0 %v1402_v28  ;;  %3644 = vmatprep.subr.mxu1 %v2197_v59  ;;  %v987_v28 = vadd.f32 %v6076_v44, %v6008_v14  ;;  %v985_v44 = vadd.f32 %v6060_v35, %v6032_v45  ;;  %v2176_v35 = vld [vmem:[%s7039_s3 + $0x220] sm:$0xff] }
 0x17d   : > { %2475 = vmatprep.mubr.f32.mxu0 %v1410_v63  ;;  %v1415_v57 = vpop.f32.mrf.mxu0  ;;  %3645 = vmatpush3.msra.mxu1 %v2181_v33  ;;  %v7114_v63 = vld [vmem:[#allocation12_spill] sm:$0xff]  ;;  %v1261_v33 = vadd.f32 %v6100_v11, %v6220_v24  ;;  %v7118_v31 = vld [vmem:[#allocation18_spill] sm:$0xff] }
 0x17e   : > { %2366 = vmatmul.mubr.f32.gmra.mxu1 %v1128_v30  ;;  %v6327_v49 = vpop.f32.mrf.mxu1  ;;  %v1416_v39 = vadd.f32 %v1415_v57, %v1255_v51  ;;  %3646 = vmatprep.subr.mxu1 %v2196_v26  ;;  %v1142_v59 = vadd.f32 %v7114_v63, %v981_v0  ;;  %v1414_v30 = vadd.f32 %v1413_v43, %v1253_v15  ;;  %v2189_v63 = vld [vmem:[%s7039_s3 + $0x288] sm:$0xff] }
 0x17f   : > { %2370 = vmatprep.mubr.f32.mxu1 %v1136_v13  ;;  %3647 = vmatpush3.msra.mxu1 %v2180_v12  ;;  %v1140_v43 = vadd.f32 %v7115_v41, %v979_v48  ;;  %v1259_v51 = vadd.f32 %v6081_v47, %v6260_v37  ;;  %v7116_v12 = vld [vmem:[#allocation14_spill] sm:$0xff]  ;;  %v993_v13 = vadd.f32 %v6108_v29, %v6008_v14  ;;  %v2191_v47 = vld [vmem:[%s7039_s3 + $0x298] sm:$0xff]  ;;  %v2190_v48 = vld [vmem:[%s7039_s3 + $0x290] sm:$0xff] }
 0x180   : > { %2476 = vmatmul.mubr.f32.gmra.mxu0 %v1408_v52  ;;  %v6340_v61 = vpop.f32.mrf.mxu1  ;;  %v1419_v56 = vpop.f32.mrf.mxu0  ;;  %3648 = vmatprep.subr.mxu1 %v2195_v36  ;;  %v1148_v23 = vadd.f32 %v7116_v12, %v987_v28  ;;  %v1267_v36 = vadd.f32 %v6132_v9, %v6220_v24  ;;  %v7117_v29 = vld [vmem:[#allocation13_spill] sm:$0xff] }
 0x181   : > { %2480 = vmatprep.mubr.f32.mxu0 %v1416_v39  ;;  %3649 = vmatpush3.msra.mxu1 %v2179_v25  ;;  %v1420_v52 = vadd.f32 %v1419_v56, %v1259_v51  ;;  %v2175_v39 = vld [vmem:[%s7039_s3 + $0x218] sm:$0xff]  ;;  %v1146_v25 = vadd.f32 %v7117_v29, %v985_v44  ;;  %v1154_v15 = vadd.f32 %v7118_v31, %v993_v13  ;;  %v2172_v41 = vld [vmem:[%s7039_s3 + $0x200] sm:$0xff] }
 0x182   : > { %2371 = vmatmul.mubr.f32.gmra.mxu1 %v1134_v4  ;;  %v1421_v26 = vpop.f32.mrf.mxu0  ;;  %3650 = vmatprep.subr.mxu1 %v2194_v32  ;;  %v1265_v4 = vadd.f32 %v6117_v42, %v6260_v37  ;;  %v999_v56 = vadd.f32 %v6144_v58, %v6008_v14  ;;  %v7119_v58 = vld [vmem:[#allocation16_spill] sm:$0xff]  ;;  %v1005_v44 = vadd.f32 %v6181_v54, %v6008_v14 }
 0x183   : > { %2375 = vmatprep.mubr.f32.mxu1 %v1142_v59  ;;  %v6358_v16 = vpop.f32.mrf.mxu1  ;;  %v1422_v11 = vadd.f32 %v1421_v26, %v1261_v33  ;;  %3651 = vmatpush3.msra.mxu1 %v2178_v27  ;;  %v1152_v28 = vadd.f32 %v7119_v58, %v991_v40  ;;  %v997_v33 = vadd.f32 %v6130_v46, %v6032_v45  ;;  %v2188_v46 = vld [vmem:[%s7039_s3 + $0x280] sm:$0xff] }
 0x184   : > { %2481 = vmatmul.mubr.f32.gmra.mxu0 %v1414_v30  ;;  %3652 = vmatprep.subr.mxu1 %v2193_v62  ;;  %v2173_v62 = vld [vmem:[%s7039_s3 + $0x208] sm:$0xff]  ;;  %v7120_v30 = vld [vmem:[#allocation20_spill] sm:$0xff]  ;;  %v1003_v54 = vadd.f32 %v6162_v55, %v6032_v45 }
 0x185   : > { %v6372_v0 = vpop.f32.mrf.mxu1  ;;  %v1425_v57 = vpop.f32.mrf.mxu0  ;;  %2485 = vmatprep.mubr.f32.mxu0 %v1422_v11  ;;  %3653 = vmatpush3.msra.mxu1 %v2177_v34  ;;  %v1160_v26 = vadd.f32 %v7120_v30, %v999_v56  ;;  %v1271_v34 = vadd.f32 %v6154_v20, %v6260_v37  ;;  %v7121_v20 = vld [vmem:[#allocation19_spill] sm:$0xff]  ;;  %v1297_v30 = vadd.f32 %v6307_v6, %v6220_v24 }
 0x186   : > { %2376 = vmatmul.mubr.f32.gmra.mxu1 %v1140_v43  ;;  %3654 = vmatprep.subr.mxu1 %v2192_v19  ;;  %v1426_v42 = vadd.f32 %v1425_v57, %v1265_v4  ;;  %v1158_v51 = vadd.f32 %v7121_v20, %v997_v33  ;;  %v1279_v57 = vadd.f32 %v6201_v17, %v6220_v24 }
 0x187   : > { %2380 = vmatprep.mubr.f32.mxu1 %v1148_v23  ;;  %v1427_v32 = vpop.f32.mrf.mxu0  ;;  %3655 = vmatpush3.msra.mxu1 %v2176_v35  ;;  %v7122_v23 = vld [vmem:[#allocation22_spill] sm:$0xff]  ;;  %v1009_v17 = vadd.f32 %v6199_v7, %v6032_v45 }
 0x188   : > { %v6387_v2 = vpop.f32.mrf.mxu1  ;;  %v1428_v9 = vadd.f32 %v1427_v32, %v1267_v36  ;;  %2486 = vmatmul.mubr.f32.gmra.mxu0 %v1420_v52  ;;  %3656 = vmatprep.subr.mxu1 %v2191_v47  ;;  %v1166_v13 = vadd.f32 %v7122_v23, %v1005_v44  ;;  %v1011_v47 = vadd.f32 %v6214_v3, %v6008_v14  ;;  %v7123_v52 = vmov 0.0   ;;  %v7125_v14 = vld [vmem:[#allocation24_spill] sm:$0xff] }
 0x189   : > { %3657 = vmatpush3.msra.mxu1 %v2175_v39  ;;  %3767 = vmatpush3.msra.mxu0 %v6227_v18  ;;  %v1273_v18 = vadd.f32 %v6164_v60, %v6220_v24  ;;  %v1277_v36 = vadd.f32 %v6186_v5, %v6260_v37  ;;  %v1285_v5 = vadd.f32 %v6242_v10, %v6220_v24 }
 0x18a   : > { %2381 = vmatmul.mubr.f32.gmra.mxu1 %v1146_v25  ;;  %v6399_v27 = vpop.f32.mrf.mxu1  ;;  %2490 = vmatprep.mubr.f32.mxu0 %v1428_v9  ;;  %v1431_v59 = vpop.f32.mrf.mxu0  ;;  %v7124_v25 = vld [vmem:[#allocation21_spill] sm:$0xff]  ;;  %v1172_v3 = vadd.f32 %v7125_v14, %v1011_v47  ;;  %v1291_v10 = vadd.f32 %v6276_v8, %v6220_v24  ;;  %v1295_v8 = vadd.f32 %v6298_v21, %v6260_v37 }
 0x18b   : > { %2385 = vmatprep.mubr.f32.mxu1 %v1154_v15  ;;  %3658 = vmatprep.subr.mxu1 %v2190_v48  ;;  %v1432_v43 = vadd.f32 %v1431_v59, %v1271_v34  ;;  %v1164_v32 = vadd.f32 %v7124_v25, %v1003_v54  ;;  %v1283_v48 = vadd.f32 %v6222_v1, %v6260_v37  ;;  %v7126_v15 = vld [vmem:[#allocation23_spill] sm:$0xff] }
 0x18c   : > { %2491 = vmatmul.mubr.f32.gmra.mxu0 %v1426_v42  ;;  %3659 = vmatpush3.msra.mxu1 %v2174_v50  ;;  %v1433_v11 = vpop.f32.mrf.mxu0  ;;  %v1170_v56 = vadd.f32 %v7126_v15, %v1009_v17  ;;  %v1289_v1 = vadd.f32 %v6263_v53, %v6260_v37 }
 0x18d   : > { %3660 = vmatprep.subr.mxu1 %v2189_v63  ;;  %v6420_v60 = vpop.f32.mrf.mxu1  ;;  %v1434_v19 = vadd.f32 %v1433_v11, %v1273_v18 }
 0x18e   : > { %2386 = vmatmul.mubr.f32.gmra.mxu1 %v1152_v28 }
 0x18f   : > { %2390 = vmatprep.mubr.f32.mxu1 %v1160_v26  ;;  %3661 = vmatpush3.msra.mxu1 %v2173_v62  ;;  %v6428_v35 = vpop.f32.mrf.mxu1  ;;  %v1437_v12 = vpop.f32.mrf.mxu0 }
 0x190   : > { %2495 = vmatprep.mubr.f32.mxu0 %v1434_v19  ;;  %3662 = vmatprep.subr.mxu1 %v2188_v46  ;;  %v1438_v40 = vadd.f32 %v1437_v12, %v1277_v36  ;;  %v1303_v19 = vadd.f32 %v6340_v61, %v6220_v24  ;;  %v1309_v12 = vadd.f32 %v6372_v0, %v6220_v24 }
 0x191   : > { %2496 = vmatmul.mubr.f32.gmra.mxu0 %v1432_v43  ;;  %3663 = vmatpush3.msra.mxu1 %v2172_v41  ;;  %v1439_v55 = vpop.f32.mrf.mxu0  ;;  %v1301_v41 = vadd.f32 %v6327_v49, %v6260_v37  ;;  %v1307_v61 = vadd.f32 %v6358_v16, %v6260_v37  ;;  %v1313_v0 = vadd.f32 %v6387_v2, %v6260_v37 }
 0x192   : > { %2391 = vmatmul.mubr.f32.gmra.mxu1 %v1158_v51  ;;  %3824 = vmatprep.subr.mxu1 %v7123_v52  ;;  %v6438_v39 = vpop.f32.mrf.mxu1  ;;  %v1440_v29 = vadd.f32 %v1439_v55, %v1279_v57  ;;  %v1315_v55 = vadd.f32 %v6399_v27, %v6220_v24  ;;  %v1321_v14 = vadd.f32 %v6428_v35, %v6220_v24 }
 0x193   : > { %2395 = vmatprep.mubr.f32.mxu1 %v1166_v13  ;;  %v1319_v27 = vadd.f32 %v6420_v60, %v6260_v37  ;;  %v1325_v35 = vadd.f32 %v6438_v39, %v6260_v37  ;;  %v764_v60 = vsub.s32 4, %v5963_v38 }
 0x194   : > { %v6444_v4 = vpop.f32.mrf.mxu1  ;;  %v1443_v9 = vpop.f32.mrf.mxu0  ;;  %2500 = vmatprep.mubr.f32.mxu0 %v1440_v29 }
 0x195   : > { %2501 = vmatmul.mubr.f32.gmra.mxu0 %v1438_v40  ;;  %v1444_v50 = vadd.f32 %v1443_v9, %v1283_v48  ;;  %v1327_v15 = vadd.f32 %v6444_v4, %v6220_v24 }
 0x196   : > { %2396 = vmatmul.mubr.f32.gmra.mxu1 %v1164_v32  ;;  %v1445_v31 = vpop.f32.mrf.mxu0 }
 0x197   : > { %2400 = vmatprep.mubr.f32.mxu1 %v1172_v3  ;;  %v6451_v45 = vpop.f32.mrf.mxu1  ;;  %v1446_v7 = vadd.f32 %v1445_v31, %v1285_v5 }
 0x198   : > { %v1331_v39 = vadd.f32 %v6451_v45, %v6260_v37 }
 0x199   : > { %v6453_v42 = vpop.f32.mrf.mxu1  ;;  %v1449_v63 = vpop.f32.mrf.mxu0  ;;  %2505 = vmatprep.mubr.f32.mxu0 %v1446_v7 }
 0x19a   : > { %2401 = vmatmul.mubr.f32.gmra.mxu1 %v1170_v56  ;;  %2506 = vmatmul.mubr.f32.gmra.mxu0 %v1444_v50  ;;  %v1450_v33 = vadd.f32 %v1449_v63, %v1289_v1  ;;  %v768_v56 = vsub.s32 5, %v5963_v38  ;;  %v1333_v4 = vadd.f32 %v6453_v42, %v6220_v24 }
 0x19b   : > { %v1451_v59 = vpop.f32.mrf.mxu0 }
 0x19c   : > { %v1452_v58 = vadd.f32 %v1451_v59, %v1291_v10  ;;  %v6459_v28 = vpop.f32.mrf.mxu1 }
 0x19e   : > { %v1455_v18 = vpop.f32.mrf.mxu0  ;;  %v6461_v62 = vpop.f32.mrf.mxu1  ;;  %2510 = vmatprep.mubr.f32.mxu0 %v1452_v58  ;;  %v6516_v58 = vrot.slane %v5998_v22, %v768_v56 }
 0x19f   : > { %2511 = vmatmul.mubr.f32.gmra.mxu0 %v1450_v33  ;;  %v1456_v44 = vadd.f32 %v1455_v18, %v1295_v8  ;;  %v6521_v33 = vrot.slane %v5998_v22, %v764_v60 }
 0x1a0   : > { %v1457_v26 = vpop.f32.mrf.mxu0  ;;  %v6467_v34 = vpop.f32.mrf.mxu1  ;;  %v1565_v24 = vadd.f32 %v6461_v62, %v6516_v58 }
 0x1a1   : > { %v1458_v53 = vadd.f32 %v1457_v26, %v1297_v30  ;;  %v1563_v42 = vadd.f32 %v6459_v28, %v6521_v33  ;;  %v1569_v62 = vadd.f32 %v6467_v34, %v6521_v33 }
 0x1a2   : > { %v6469_v46 = vpop.f32.mrf.mxu1 }
 0x1a3   : > { %v1461_v11 = vpop.f32.mrf.mxu0  ;;  %2515 = vmatprep.mubr.f32.mxu0 %v1458_v53 }
 0x1a4   : > { %2516 = vmatmul.mubr.f32.gmra.mxu0 %v1456_v44  ;;  %v1462_v20 = vadd.f32 %v1461_v11, %v1301_v41 }
 0x1a5   : > { %v1463_v6 = vpop.f32.mrf.mxu0  ;;  %v6475_v43 = vpop.f32.mrf.mxu1 }
 0x1a6   : > { %v1464_v21 = vadd.f32 %v1463_v6, %v1303_v19  ;;  %v1571_v6 = vadd.f32 %v6469_v46, %v6516_v58  ;;  %v1575_v46 = vadd.f32 %v6475_v43, %v6521_v33 }
 0x1a7   : > { %v1467_v51 = vpop.f32.mrf.mxu0  ;;  %v6477_v54 = vpop.f32.mrf.mxu1 }
 0x1a8   : > { %2520 = vmatprep.mubr.f32.mxu0 %v1464_v21  ;;  %v1468_v57 = vadd.f32 %v1467_v51, %v1307_v61 }
 0x1a9   : > { %v1469_v23 = vpop.f32.mrf.mxu0  ;;  %v6483_v13 = vpop.f32.mrf.mxu1  ;;  %2521 = vmatmul.mubr.f32.gmra.mxu0 %v1462_v20 }
 0x1aa   : > { %v1470_v49 = vadd.f32 %v1469_v23, %v1309_v12  ;;  %v1577_v23 = vadd.f32 %v6477_v54, %v6516_v58  ;;  %v1581_v54 = vadd.f32 %v6483_v13, %v6521_v33 }
 0x1ab   : > { %v1473_v47 = vpop.f32.mrf.mxu0  ;;  %v6485_v36 = vpop.f32.mrf.mxu1 }
 0x1ac   : > { %2525 = vmatprep.mubr.f32.mxu0 %v1470_v49  ;;  %v1474_v32 = vadd.f32 %v1473_v47, %v1313_v0 }
 0x1ad   : > { %v1475_v29 = vpop.f32.mrf.mxu0  ;;  %v6491_v25 = vpop.f32.mrf.mxu1  ;;  %2526 = vmatmul.mubr.f32.gmra.mxu0 %v1468_v57 }
 0x1ae   : > { %v1476_v16 = vadd.f32 %v1475_v29, %v1315_v55  ;;  %v1583_v29 = vadd.f32 %v6485_v36, %v6516_v58  ;;  %v1587_v36 = vadd.f32 %v6491_v25, %v6521_v33 }
 0x1af   : > { %v1479_v17 = vpop.f32.mrf.mxu0  ;;  %v6493_v40 = vpop.f32.mrf.mxu1 }
 0x1b0   : > { %2530 = vmatprep.mubr.f32.mxu0 %v1476_v16  ;;  %v1480_v5 = vadd.f32 %v1479_v17, %v1319_v27 }
 0x1b1   : > { %v1481_v3 = vpop.f32.mrf.mxu0  ;;  %v6499_v9 = vpop.f32.mrf.mxu1  ;;  %2531 = vmatmul.mubr.f32.gmra.mxu0 %v1474_v32 }
 0x1b2   : > { %v1482_v2 = vadd.f32 %v1481_v3, %v1321_v14  ;;  %v1589_v3 = vadd.f32 %v6493_v40, %v6516_v58  ;;  %v1593_v40 = vadd.f32 %v6499_v9, %v6521_v33 }
 0x1b3   : > { %v1485_v48 = vpop.f32.mrf.mxu0  ;;  %v6501_v31 = vpop.f32.mrf.mxu1 }
 0x1b4   : > { %2535 = vmatprep.mubr.f32.mxu0 %v1482_v2  ;;  %v1486_v10 = vadd.f32 %v1485_v48, %v1325_v35  ;;  %v1595_v35 = vadd.f32 %v6501_v31, %v6516_v58 }
 0x1b5   : > { %v1487_v7 = vpop.f32.mrf.mxu0  ;;  %v6509_v50 = vpop.f32.mrf.mxu1  ;;  %2536 = vmatmul.mubr.f32.gmra.mxu0 %v1480_v5 }
 0x1b6   : > { %v1488_v63 = vadd.f32 %v1487_v7, %v1327_v15  ;;  %v1599_v31 = vadd.f32 %v6509_v50, %v6521_v33 }
 0x1b7   : > { %v1491_v1 = vpop.f32.mrf.mxu0  ;;  %v6511_v59 = vpop.f32.mrf.mxu1 }
 0x1b8   : > { %2540 = vmatprep.mubr.f32.mxu0 %v1488_v63  ;;  %v1492_v26 = vadd.f32 %v1491_v1, %v1331_v39 }
 0x1b9   : > { %v1493_v18 = vpop.f32.mrf.mxu0  ;;  %v6523_v30 = vpop.f32.mrf.mxu1  ;;  %2541 = vmatmul.mubr.f32.gmra.mxu0 %v1486_v10 }
 0x1ba   : > { %v1494_v8 = vadd.f32 %v1493_v18, %v1333_v4  ;;  %v1601_v4 = vadd.f32 %v6511_v59, %v6516_v58  ;;  %v1605_v59 = vadd.f32 %v6523_v30, %v6521_v33 }
 0x1bb   : > { %v6525_v53 = vpop.f32.mrf.mxu1  ;;  %v1723_v44 = vpop.f32.mrf.mxu0 }
 0x1bc   : > { %2545 = vmatprep.mubr.f32.mxu0 %v1494_v8  ;;  %v1724_v11 = vadd.f32 %v1723_v44, %v1563_v42 }
 0x1bd   : > { %v6531_v37 = vpop.f32.mrf.mxu1  ;;  %v1725_v22 = vpop.f32.mrf.mxu0  ;;  %2546 = vmatmul.mubr.f32.gmra.mxu0 %v1492_v26 }
 0x1be   : > { %v1726_v45 = vadd.f32 %v1725_v22, %v1565_v24  ;;  %v1607_v24 = vadd.f32 %v6525_v53, %v6516_v58  ;;  %v1611_v53 = vadd.f32 %v6531_v37, %v6521_v33 }
 0x1bf   : > { %v6533_v19 = vpop.f32.mrf.mxu1  ;;  %v1729_v41 = vpop.f32.mrf.mxu0 }
 0x1c0   : > { %2615 = vmatprep.mubr.f32.mxu1 %v1726_v45  ;;  %v1730_v51 = vadd.f32 %v1729_v41, %v1569_v62 }
 0x1c1   : > { %v6539_v21 = vpop.f32.mrf.mxu1  ;;  %v1731_v20 = vpop.f32.mrf.mxu0  ;;  %2616 = vmatmul.mubr.f32.vlgmr.msra.gmra.mxu1 %v1724_v11 }
 0x1c2   : > { %v1732_v28 = vadd.f32 %v1731_v20, %v1571_v6  ;;  %v1613_v6 = vadd.f32 %v6533_v19, %v6516_v58 }
 0x1c3   : > { %v6541_v12 = vpop.f32.mrf.mxu1  ;;  %v1735_v61 = vpop.f32.mrf.mxu0 }
 0x1c4   : > { %2620 = vmatprep.mubr.f32.mxu1 %v1732_v28  ;;  %v1736_v47 = vadd.f32 %v1735_v61, %v1575_v46  ;;  %v1617_v46 = vadd.f32 %v6539_v21, %v6521_v33 }
 0x1c5   : > { %v6547_v49 = vpop.f32.mrf.mxu1  ;;  %v1737_v57 = vpop.f32.mrf.mxu0  ;;  %2621 = vmatmul.mubr.f32.gmra.mxu1 %v1730_v51 }
 0x1c6   : > { %v1738_v34 = vadd.f32 %v1737_v57, %v1577_v23  ;;  %v1619_v23 = vadd.f32 %v6541_v12, %v6516_v58 }
 0x1c7   : > { %v6549_v55 = vpop.f32.mrf.mxu1  ;;  %v1741_v0 = vpop.f32.mrf.mxu0 }
 0x1c8   : > { %2625 = vmatprep.mubr.f32.mxu1 %v1738_v34  ;;  %v1742_v17 = vadd.f32 %v1741_v0, %v1581_v54  ;;  %v1623_v54 = vadd.f32 %v6547_v49, %v6521_v33 }
 0x1c9   : > { %v6555_v16 = vpop.f32.mrf.mxu1  ;;  %v1743_v32 = vpop.f32.mrf.mxu0  ;;  %2626 = vmatmul.mubr.f32.gmra.mxu1 %v1736_v47 }
 0x1ca   : > { %v1744_v43 = vadd.f32 %v1743_v32, %v1583_v29  ;;  %v1625_v29 = vadd.f32 %v6549_v55, %v6516_v58  ;;  %v1629_v55 = vadd.f32 %v6555_v16, %v6521_v33 }
 0x1cb   : > { %v6557_v14 = vpop.f32.mrf.mxu1  ;;  %v1747_v27 = vpop.f32.mrf.mxu0 }
 0x1cc   : > { %2630 = vmatprep.mubr.f32.mxu1 %v1744_v43  ;;  %v1748_v48 = vadd.f32 %v1747_v27, %v1587_v36 }
 0x1cd   : > { %v6563_v2 = vpop.f32.mrf.mxu1  ;;  %v1749_v5 = vpop.f32.mrf.mxu0  ;;  %2631 = vmatmul.mubr.f32.gmra.mxu1 %v1742_v17 }
 0x1ce   : > { %v1750_v13 = vadd.f32 %v1749_v5, %v1589_v3  ;;  %v1631_v3 = vadd.f32 %v6557_v14, %v6516_v58 }
 0x1cf   : > { %v6565_v15 = vpop.f32.mrf.mxu1  ;;  %v1753_v56 = vpop.f32.mrf.mxu0 }
 0x1d0   : > { %2635 = vmatprep.mubr.f32.mxu1 %v1750_v13  ;;  %v1754_v63 = vadd.f32 %v1753_v56, %v1593_v40  ;;  %v1635_v40 = vadd.f32 %v6563_v2, %v6521_v33  ;;  %v772_v2 = vsub.s32 6, %v5963_v38 }
 0x1d1   : > { %v6571_v60 = vpop.f32.mrf.mxu1  ;;  %v1755_v7 = vpop.f32.mrf.mxu0  ;;  %2636 = vmatmul.mubr.f32.gmra.mxu1 %v1748_v48 }
 0x1d2   : > { %v1756_v25 = vadd.f32 %v1755_v7, %v1595_v35  ;;  %v1637_v35 = vadd.f32 %v6565_v15, %v6516_v58 }
 0x1d3   : > { %v6573_v10 = vpop.f32.mrf.mxu1  ;;  %v1759_v1 = vpop.f32.mrf.mxu0 }
 0x1d4   : > { %2640 = vmatprep.mubr.f32.mxu1 %v1756_v25  ;;  %v1760_v8 = vadd.f32 %v1759_v1, %v1599_v31  ;;  %v1641_v31 = vadd.f32 %v6571_v60, %v6521_v33 }
 0x1d5   : > { %v6579_v39 = vpop.f32.mrf.mxu1  ;;  %v1761_v18 = vpop.f32.mrf.mxu0  ;;  %2641 = vmatmul.mubr.f32.gmra.mxu1 %v1754_v63 }
 0x1d6   : > { %v1762_v9 = vadd.f32 %v1761_v18, %v1601_v4  ;;  %v1643_v4 = vadd.f32 %v6573_v10, %v6516_v58  ;;  %v1647_v10 = vadd.f32 %v6579_v39, %v6521_v33 }
 0x1d7   : > { %v6581_v26 = vpop.f32.mrf.mxu1  ;;  %v1765_v44 = vpop.f32.mrf.mxu0 }
 0x1d8   : > { %2645 = vmatprep.mubr.f32.mxu1 %v1762_v9  ;;  %v1766_v45 = vadd.f32 %v1765_v44, %v1605_v59  ;;  %v1649_v59 = vadd.f32 %v6581_v26, %v6516_v58 }
 0x1d9   : > { %v6587_v42 = vpop.f32.mrf.mxu1  ;;  %v1767_v22 = vpop.f32.mrf.mxu0  ;;  %2646 = vmatmul.mubr.f32.gmra.mxu1 %v1760_v8 }
 0x1da   : > { %v1768_v50 = vadd.f32 %v1767_v22, %v1607_v24  ;;  %v1653_v39 = vadd.f32 %v6587_v42, %v6521_v33 }
 0x1db   : > { %v6589_v11 = vpop.f32.mrf.mxu1  ;;  %v1771_v41 = vpop.f32.mrf.mxu0 }
 0x1dc   : > { %2650 = vmatprep.mubr.f32.mxu1 %v1768_v50  ;;  %v1772_v28 = vadd.f32 %v1771_v41, %v1611_v53  ;;  %v3970_v41 = vld [vmem:[%s7038_s2] sm:$0x7f]  ;;  %v1655_v26 = vadd.f32 %v6589_v11, %v6516_v58 }
 0x1dd   : > { %v1773_v62 = vpop.f32.mrf.mxu0  ;;  %2651 = vmatmul.mubr.f32.gmra.mxu1 %v1766_v45 }
 0x1de   : > { %v1774_v20 = vadd.f32 %v1773_v62, %v1613_v6  ;;  %v3424_v30 = vpop.f32.mrf.mxu1  ;;  %v6633_v6 = vrot.slane %v3970_v41, %v772_v2 }
 0x1e0   : > { %v1777_v51 = vpop.f32.mrf.mxu0  ;;  %v3425_v61 = vpop.f32.mrf.mxu1  ;;  %2655 = vmatprep.mubr.f32.mxu1 %v1774_v20 }
 0x1e1   : > { %2656 = vmatmul.mubr.f32.gmra.mxu1 %v1772_v28  ;;  %v1778_v37 = vadd.f32 %v1777_v51, %v1617_v46  ;;  %v3426_v60 = vadd.f32 %v3425_v61, %v3424_v30 }
 0x1e2   : > { %v1779_v19 = vpop.f32.mrf.mxu0  ;;  %v6599_v57 = vpop.f32.mrf.mxu1 }
 0x1e3   : > { %v1780_v34 = vadd.f32 %v1779_v19, %v1619_v23  ;;  %v1885_v23 = vadd.f32 %v3426_v60, %v6633_v6 }
 0x1e4   : > { %v1783_v47 = vpop.f32.mrf.mxu0  ;;  %v3428_v0 = vpop.f32.mrf.mxu1 }
 0x1e5   : > { %2660 = vmatprep.mubr.f32.mxu1 %v1780_v34  ;;  %v1784_v21 = vadd.f32 %v1783_v47, %v1623_v54  ;;  %v3429_v30 = vadd.f32 %v3428_v0, %v6599_v57 }
 0x1e6   : > { %v1785_v32 = vpop.f32.mrf.mxu0  ;;  %v6605_v12 = vpop.f32.mrf.mxu1  ;;  %2661 = vmatmul.mubr.f32.gmra.mxu1 %v1778_v37 }
 0x1e7   : > { %v1786_v43 = vadd.f32 %v1785_v32, %v1625_v29  ;;  %v1890_v42 = vadd.f32 %v3429_v30, %v6633_v6 }
 0x1e8   : > { %v1789_v17 = vpop.f32.mrf.mxu0  ;;  %v6607_v27 = vpop.f32.mrf.mxu1 }
 0x1e9   : > { %2665 = vmatprep.mubr.f32.mxu1 %v1786_v43  ;;  %v1790_v13 = vadd.f32 %v1789_v17, %v1629_v55  ;;  %v3432_v33 = vadd.f32 %v6607_v27, %v6605_v12 }
 0x1ea   : > { %v1791_v36 = vpop.f32.mrf.mxu0  ;;  %v6613_v5 = vpop.f32.mrf.mxu1  ;;  %2666 = vmatmul.mubr.f32.gmra.mxu1 %v1784_v21 }
 0x1eb   : > { %v1792_v49 = vadd.f32 %v1791_v36, %v1631_v3  ;;  %v1895_v43 = vadd.f32 %v3432_v33, %v6633_v6 }
 0x1ec   : > { %v1795_v48 = vpop.f32.mrf.mxu0  ;;  %v3434_v56 = vpop.f32.mrf.mxu1 }
 0x1ed   : > { %2670 = vmatprep.mubr.f32.mxu1 %v1792_v49  ;;  %v1796_v25 = vadd.f32 %v1795_v48, %v1635_v40  ;;  %v3435_v32 = vadd.f32 %v3434_v56, %v6613_v5 }
 0x1ee   : > { %v1797_v14 = vpop.f32.mrf.mxu0  ;;  %v6619_v7 = vpop.f32.mrf.mxu1  ;;  %2671 = vmatmul.mubr.f32.gmra.mxu1 %v1790_v13 }
 0x1ef   : > { %v1798_v16 = vadd.f32 %v1797_v14, %v1637_v35  ;;  %v1900_v36 = vadd.f32 %v3435_v32, %v6633_v6 }
 0x1f0   : > { %v1801_v63 = vpop.f32.mrf.mxu0  ;;  %v3437_v1 = vpop.f32.mrf.mxu1 }
 0x1f1   : > { %2675 = vmatprep.mubr.f32.mxu1 %v1798_v16  ;;  %v1802_v8 = vadd.f32 %v1801_v63, %v1641_v31  ;;  %v3438_v27 = vadd.f32 %v3437_v1, %v6619_v7 }
 0x1f2   : > { %v1803_v15 = vpop.f32.mrf.mxu0  ;;  %v3439_v18 = vpop.f32.mrf.mxu1  ;;  %2676 = vmatmul.mubr.f32.gmra.mxu1 %v1796_v25 }
 0x1f3   : > { %v1804_v9 = vadd.f32 %v1803_v15, %v1643_v4  ;;  %v1905_v40 = vadd.f32 %v3438_v27, %v6633_v6 }
 0x1f4   : > { %v1807_v44 = vpop.f32.mrf.mxu0  ;;  %v3440_v24 = vpop.f32.mrf.mxu1 }
 0x1f5   : > { %2680 = vmatprep.mubr.f32.mxu1 %v1804_v9  ;;  %v1808_v53 = vadd.f32 %v1807_v44, %v1647_v10  ;;  %v3441_v56 = vadd.f32 %v3440_v24, %v3439_v18 }
 0x1f6   : > { %v1809_v22 = vpop.f32.mrf.mxu0  ;;  %v3442_v50 = vpop.f32.mrf.mxu1  ;;  %2681 = vmatmul.mubr.f32.gmra.mxu1 %v1802_v8 }
 0x1f7   : > { %v1810_v45 = vadd.f32 %v1809_v22, %v1649_v59  ;;  %v1910_v1 = vadd.f32 %v3441_v56, %v6633_v6 }
 0x1f8   : > { %v1813_v62 = vpop.f32.mrf.mxu0  ;;  %v3443_v20 = vpop.f32.mrf.mxu1 }
 0x1f9   : > { %2685 = vmatprep.mubr.f32.mxu1 %v1810_v45  ;;  %v1814_v46 = vadd.f32 %v1813_v62, %v1653_v39  ;;  %v3444_v7 = vadd.f32 %v3443_v20, %v3442_v50 }
 0x1fa   : > { %v1815_v28 = vpop.f32.mrf.mxu0  ;;  %v3445_v51 = vpop.f32.mrf.mxu1  ;;  %2686 = vmatmul.mubr.f32.gmra.mxu1 %v1808_v53 }
 0x1fb   : > { %v1816_v61 = vadd.f32 %v1815_v28, %v1655_v26  ;;  %v1915_v44 = vadd.f32 %v3444_v7, %v6633_v6 }
 0x1fc   : > { %v3446_v19 = vpop.f32.mrf.mxu1  ;;  %v2029_v34 = vpop.f32.mrf.mxu0 }
 0x1fd   : > { %v2030_v37 = vadd.f32 %v2029_v34, %v1885_v23  ;;  %2690 = vmatprep.mubr.f32.mxu1 %v1816_v61  ;;  %v3447_v18 = vadd.f32 %v3446_v19, %v3445_v51 }
 0x1fe   : > { %v3448_v47 = vpop.f32.mrf.mxu1  ;;  %v2031_v58 = vpop.f32.mrf.mxu0  ;;  %2691 = vmatmul.mubr.f32.gmra.mxu1 %v1814_v46 }
 0x1ff   : > { %3768 = vmatprep.mubr.msk.f32.mxu0 %vm2212_vm2, %v2030_v37  ;;  %v1920_v45 = vadd.f32 %v3447_v18, %v6633_v6 }
 0x200   : > { %v3449_v11 = vpop.f32.mrf.mxu1  ;;  %v2034_v57 = vpop.f32.mrf.mxu0 }
 0x201   : > { %v2035_v0 = vadd.f32 %v2034_v57, %v1890_v42  ;;  %v3450_v50 = vadd.f32 %v3449_v11, %v3448_v47 }
 0x202   : > { %v3451_v29 = vpop.f32.mrf.mxu1  ;;  %v2036_v54 = vpop.f32.mrf.mxu0 }
 0x203   : > { %3769 = vmatmul.mubr.msk.f32.vlgmr.msra.gmra.mxu0 %vm2212_vm2, %v2035_v0  ;;  %v1925_v28 = vadd.f32 %v3450_v50, %v6633_v6 }
 0x204   : > { %v3452_v21 = vpop.f32.mrf.mxu1  ;;  %v2039_v17 = vpop.f32.mrf.mxu0 }
 0x205   : > { %v2040_v3 = vadd.f32 %v2039_v17, %v1895_v43  ;;  %v3453_v39 = vadd.f32 %v3452_v21, %v3451_v29 }
 0x206   : > { %v3454_v55 = vpop.f32.mrf.mxu1  ;;  %v2041_v12 = vpop.f32.mrf.mxu0 }
 0x207   : > { %3771 = vmatprep.mubr.msk.f32.mxu0 %vm2212_vm2, %v2040_v3  ;;  %v1930_v34 = vadd.f32 %v3453_v39, %v6633_v6 }
 0x208   : > { %v3455_v49 = vpop.f32.mrf.mxu1  ;;  %v2044_v13 = vpop.f32.mrf.mxu0 }
 0x209   : > { %v2045_v48 = vadd.f32 %v2044_v13, %v1900_v36  ;;  %v3456_v19 = vadd.f32 %v3455_v49, %v3454_v55 }
 0x20a   : > { %v3457_v35 = vpop.f32.mrf.mxu1  ;;  %v2046_v5 = vpop.f32.mrf.mxu0 }
 0x20b   : > { %3772 = vmatmul.mubr.msk.f32.gmra.mxu0 %vm2212_vm2, %v2045_v48  ;;  %v1935_v57 = vadd.f32 %v3456_v19, %v6633_v6 }
 0x20c   : > { %v3458_v14 = vpop.f32.mrf.mxu1  ;;  %v2049_v16 = vpop.f32.mrf.mxu0 }
 0x20d   : > { %v2050_v25 = vadd.f32 %v2049_v16, %v1905_v40  ;;  %v3459_v11 = vadd.f32 %v3458_v14, %v3457_v35 }
 0x20e   : > { %v3460_v63 = vpop.f32.mrf.mxu1  ;;  %v2051_v4 = vpop.f32.mrf.mxu0 }
 0x20f   : > { %3774 = vmatprep.mubr.msk.f32.mxu0 %vm2212_vm2, %v2050_v25  ;;  %v1940_v17 = vadd.f32 %v3459_v11, %v6633_v6 }
 0x210   : > { %v3461_v31 = vpop.f32.mrf.mxu1  ;;  %v2054_v15 = vpop.f32.mrf.mxu0 }
 0x211   : > { %v2055_v9 = vadd.f32 %v2054_v15, %v1910_v1  ;;  %v3462_v21 = vadd.f32 %v3461_v31, %v3460_v63 }
 0x212   : > { %v3463_v2 = vpop.f32.mrf.mxu1  ;;  %v2056_v8 = vpop.f32.mrf.mxu0 }
 0x213   : > { %3775 = vmatmul.mubr.msk.f32.gmra.mxu0 %vm2212_vm2, %v2055_v9  ;;  %v1945_v13 = vadd.f32 %v3462_v21, %v6633_v6 }
 0x214   : > { %v3464_v24 = vpop.f32.mrf.mxu1  ;;  %v2059_v59 = vpop.f32.mrf.mxu0 }
 0x215   : > { %v2060_v10 = vadd.f32 %v2059_v59, %v1915_v44  ;;  %v3465_v49 = vadd.f32 %v3464_v24, %v3463_v2 }
 0x216   : > { %v3466_v22 = vpop.f32.mrf.mxu1  ;;  %v2061_v60 = vpop.f32.mrf.mxu0 }
 0x217   : > { %3777 = vmatprep.mubr.msk.f32.mxu0 %vm2212_vm2, %v2060_v10  ;;  %v1950_v16 = vadd.f32 %v3465_v49, %v6633_v6 }
 0x218   : > { %v3467_v41 = vpop.f32.mrf.mxu1  ;;  %v2064_v53 = vpop.f32.mrf.mxu0 }
 0x219   : > { %v2065_v62 = vadd.f32 %v2064_v53, %v1920_v45  ;;  %v3468_v14 = vadd.f32 %v3467_v41, %v3466_v22  ;;  %v2844_v41 = vld [vmem:[%s7041_s5 + $0x18] sm:$0xf] }
 0x21a   : > { %v3469_v20 = vpop.f32.mrf.mxu1  ;;  %v2066_v26 = vpop.f32.mrf.mxu0  ;;  %3792 = vmatprep.subr.msk.mxu0 %vm830_vm0, %v2844_v41 }
 0x21b   : > { %3778 = vmatmul.mubr.msk.f32.gmra.mxu0 %vm2212_vm2, %v2065_v62  ;;  %v1955_v15 = vadd.f32 %v3468_v14, %v6633_v6  ;;  %v2842_v62 = vld [vmem:[%s7041_s5 + $0x8] sm:$0xff]  ;;  %v2841_v26 = vld [vmem:[%s7041_s5] sm:$0xff] }
 0x21c   : > { %v3470_v51 = vpop.f32.mrf.mxu1  ;;  %v2069_v30 = vpop.f32.mrf.mxu0  ;;  %3793 = vmatpush3.msk.msra.mxu0 %vm830_vm0, %v2844_v41 }
 0x21d   : > { %v2070_v61 = vadd.f32 %v2069_v30, %v1925_v28  ;;  %v3471_v31 = vadd.f32 %v3470_v51, %v3469_v20 }
 0x21e   : > { %v2071_v23 = vpop.f32.mrf.mxu0  ;;  %v6661_v46 = vpop.f32.mrf.mxu1 }
 0x21f   : > { %3780 = vmatprep.mubr.msk.f32.mxu0 %vm2212_vm2, %v2070_v61  ;;  %v1960_v24 = vadd.f32 %v3471_v31, %v6633_v6  ;;  %v2843_v6 = vld [vmem:[%s7041_s5 + $0x10] sm:$0xff] }
 0x220   : > { %v2074_v37 = vpop.f32.mrf.mxu0  ;;  %v6665_v47 = vpop.f32.mrf.mxu1  ;;  %3794 = vmatprep.subr.mxu0 %v2843_v6 }
 0x221   : > { %v2075_v58 = vadd.f32 %v2074_v37, %v1930_v34  ;;  %3795 = vmatpush3.msra.mxu0 %v2843_v6 }
 0x222   : > { %v2076_v33 = vpop.f32.mrf.mxu0  ;;  %v6667_v42 = vpop.f32.mrf.mxu1  ;;  %3796 = vmatprep.subr.mxu0 %v2842_v62 }
 0x223   : > { %3781 = vmatmul.mubr.msk.f32.gmra.mxu0 %vm2212_vm2, %v2075_v58 }
 0x224   : > { %v2079_v0 = vpop.f32.mrf.mxu0  ;;  %v6671_v29 = vpop.f32.mrf.mxu1  ;;  %3797 = vmatpush3.msra.mxu0 %v2842_v62 }
 0x225   : > { %v2080_v54 = vadd.f32 %v2079_v0, %v1935_v57  ;;  %3798 = vmatprep.subr.mxu0 %v2841_v26 }
 0x226   : > { %v2081_v32 = vpop.f32.mrf.mxu0  ;;  %v6673_v43 = vpop.f32.mrf.mxu1  ;;  %3799 = vmatpush3.msra.mxu0 %v2841_v26 }
 0x227   : > { %3783 = vmatprep.mubr.msk.f32.mxu0 %vm2212_vm2, %v2080_v54 }
 0x228   : > { %v2084_v3 = vpop.f32.mrf.mxu0  ;;  %v6677_v55 = vpop.f32.mrf.mxu1 }
 0x229   : > { %v2085_v12 = vadd.f32 %v2084_v3, %v1940_v17 }
 0x22a   : > { %v2086_v27 = vpop.f32.mrf.mxu0  ;;  %v6679_v36 = vpop.f32.mrf.mxu1 }
 0x22b   : > { %3784 = vmatmul.mubr.msk.f32.gmra.mxu0 %vm2212_vm2, %v2085_v12 }
 0x22c   : > { %v2089_v48 = vpop.f32.mrf.mxu0  ;;  %v6683_v35 = vpop.f32.mrf.mxu1 }
 0x22d   : > { %v2090_v5 = vadd.f32 %v2089_v48, %v1945_v13 }
 0x22e   : > { %v2091_v56 = vpop.f32.mrf.mxu0  ;;  %v6685_v40 = vpop.f32.mrf.mxu1 }
 0x22f   : > { %3786 = vmatprep.mubr.msk.f32.mxu0 %vm2212_vm2, %v2090_v5 }
 0x230   : > { %v2094_v25 = vpop.f32.mrf.mxu0  ;;  %v6689_v63 = vpop.f32.mrf.mxu1 }
 0x231   : > { %v2095_v4 = vadd.f32 %v2094_v25, %v1950_v16 }
 0x232   : > { %v2096_v7 = vpop.f32.mrf.mxu0  ;;  %v6691_v1 = vpop.f32.mrf.mxu1 }
 0x233   : > { %3787 = vmatmul.mubr.msk.f32.gmra.mxu0 %vm2212_vm2, %v2095_v4 }
 0x234   : > { %v2099_v9 = vpop.f32.mrf.mxu0  ;;  %v6695_v2 = vpop.f32.mrf.mxu1 }
 0x235   : > { %v2100_v8 = vadd.f32 %v2099_v9, %v1955_v15 }
 0x236   : > { %v2101_v18 = vpop.f32.mrf.mxu0  ;;  %v6697_v44 = vpop.f32.mrf.mxu1 }
 0x237   : > { %3789 = vmatprep.mubr.msk.f32.mxu0 %vm2212_vm2, %v2100_v8 }
 0x238   : > { %v2104_v59 = vpop.f32.mrf.mxu0  ;;  %v6701_v10 = vpop.f32.mrf.mxu1 }
 0x239   : > { %v2105_v22 = vadd.f32 %v2104_v59, %v1960_v24 }
 0x23a   : > { %v2106_v60 = vpop.f32.mrf.mxu0  ;;  %v6703_v50 = vpop.f32.mrf.mxu1 }
 0x23b   : > { %3790 = vmatmul.mubr.msk.f32.gmra.mxu0 %vm2212_vm2, %v2105_v22 }
 0x23c   : > { %v6706_v45 = vpop.f32.mrf.mxu1  ;;  %v6721_v20 = vpop.f32.mrf.mxu0 }
 0x23e   : > { %v6716_v53 = vpop.f32.mrf.mxu1  ;;  %v6728_v28 = vpop.f32.mrf.mxu0 }
 0x240   : > { %v6726_v39 = vpop.f32.mrf.mxu1  ;;  %v6732_v30 = vpop.f32.mrf.mxu0 }
 0x242   : > { %v6730_v51 = vpop.f32.mrf.mxu1  ;;  %v3588_v23 = vpop.f32.mrf.mxu0 }
 0x244   : > { %v6734_v61 = vpop.f32.mrf.mxu1  ;;  %v6738_v34 = vpop.f32.mrf.mxu0 }
 0x246   : > { %v6736_v19 = vpop.f32.mrf.mxu1  ;;  %v6742_v58 = vpop.f32.mrf.mxu0 }
 0x247   : > { %7127 = vst [vmem:[#allocation15_spill] sm:$0xff] %v6736_v19 }
 0x248   : > { %v6740_v37 = vpop.f32.mrf.mxu1  ;;  %v6746_v11 = vpop.f32.mrf.mxu0 }
 0x249   : > { %7128 = vst [vmem:[#allocation7_spill] sm:$0xff] %v6740_v37 }
 0x24a   : > { %v6744_v33 = vpop.f32.mrf.mxu1  ;;  %v6750_v0 = vpop.f32.mrf.mxu0 }
 0x24b   : > { %7129 = vst [vmem:[#allocation26_spill] sm:$0xff] %v6744_v33 }
 0x24c   : > { %v6748_v57 = vpop.f32.mrf.mxu1  ;;  %v6754_v32 = vpop.f32.mrf.mxu0 }
 0x24d   : > { %7130 = vst [vmem:[#allocation17_spill] sm:$0xff] %v6748_v57 }
 0x24e   : > { %v6752_v54 = vpop.f32.mrf.mxu1  ;;  %v6758_v17 = vpop.f32.mrf.mxu0 }
 0x24f   : > { %7131 = vst [vmem:[#allocation6_spill] sm:$0xff] %v6752_v54 }
 0x250   : > { %v6756_v21 = vpop.f32.mrf.mxu1 }
 0x251   : > { %7132 = vst [vmem:[#allocation28_spill] sm:$0xff] %v6756_v21  ;;  %v6762_v12 = vpop.f32.mrf.mxu0 }
 0x252   : > { %v6760_v3 = vpop.f32.mrf.mxu1 }
 0x253   : > { %7133 = vst [vmem:[#allocation8_spill] sm:$0xff] %v6760_v3  ;;  %v6766_v49 = vpop.f32.mrf.mxu0 }
 0x254   : > { %v6764_v27 = vpop.f32.mrf.mxu1 }
 0x255   : > { %7134 = vst [vmem:[#allocation27_spill] sm:$0xff] %v6764_v27  ;;  %v6770_v48 = vpop.f32.mrf.mxu0 }
 0x256   : > { %v6768_v13 = vpop.f32.mrf.mxu1 }
 0x257   : > { %7135 = vst [vmem:[#allocation29_spill] sm:$0xff] %v6768_v13  ;;  %v6774_v56 = vpop.f32.mrf.mxu0 }
 0x258   : > { %v6772_v5 = vpop.f32.mrf.mxu1 }
 0x259   : > { %7136 = vst [vmem:[#allocation11_spill] sm:$0xff] %v6772_v5 }
 0x25a   : > { %v6776_v14 = vpop.f32.mrf.mxu1  ;;  %v6778_v16 = vpop.f32.mrf.mxu0 }
 0x25b   : > { %7137 = vst [vmem:[#allocation10_spill] sm:$0xff] %v6776_v14 }
 0x25c   : > { %v6780_v25 = vpop.f32.mrf.mxu1  ;;  %v6782_v4 = vpop.f32.mrf.mxu0 }
 0x25d   : > { %7138 = vst [vmem:[#allocation30_spill] sm:$0xff] %v6780_v25 }
 0x25f   : > { %v6784_v15 = vpop.f32.mrf.mxu0 }
 0x260   : > { %7139 = vst [vmem:[#allocation31_spill] sm:$0xff] %v6784_v15 }
 0x261   : > { %v6786_v18 = vpop.f32.mrf.mxu0 }
 0x262   : > { %7140 = vst [vmem:[#allocation12_spill] sm:$0xff] %v6786_v18 }
 0x264   : > { %v6788_v59 = vpop.f32.mrf.mxu0 }
 0x265   : > { %7141 = vst [vmem:[#allocation9_spill] sm:$0xff] %v6788_v59 }
 0x266   : > { %v6790_v60 = vpop.f32.mrf.mxu0 }
 0x267   : > { %7142 = vst [vmem:[#allocation14_spill] sm:$0xff] %v6790_v60 }
 0x269   : > { %v6792_v6 = vpop.f32.mrf.mxu0 }
 0x26a   : > { %7143 = vst [vmem:[#allocation13_spill] sm:$0xff] %v6792_v6 }
 0x26b   : > { %v6794_v26 = vpop.f32.mrf.mxu0 }
 0x26c   : > { %7144 = vst [vmem:[#allocation18_spill] sm:$0xff] %v6794_v26 }
 0x26d   : > { %v6798_v52 = vpop.f32.mrf.mxu0 }
 0x26e   : > { %7145 = vst [vmem:[#allocation16_spill] sm:$0xff] %v6798_v52 }
 0x26f   : > { %v6802_v14 = vpop.f32.mrf.mxu0 }
 0x270   : > { %7146 = vst [vmem:[#allocation20_spill] sm:$0xff] %v6802_v14 }
 0x271   : > { %v6806_v13 = vpop.f32.mrf.mxu0 }
 0x272   : > { %7147 = vst [vmem:[#allocation19_spill] sm:$0xff] %v6806_v13 }
 0x273   : > { %v6808_v3 = vpop.f32.mrf.mxu0 }
 0x274   : > { %7148 = vst [vmem:[#allocation22_spill] sm:$0xff] %v6808_v3  ;;  %v3506_v3 = vadd.f32 %v6665_v47, %v6661_v46 }
 0x275   : > { %v6812_v54 = vpop.f32.mrf.mxu0 }
 0x276   : > { %7149 = vst [vmem:[#allocation21_spill] sm:$0xff] %v6812_v54  ;;  %v6833_v54 = vld [vmem:[%s7040_s4] ss:$0 sm:$0xff] }
 0x277   : > { %v6816_v6 = vpop.f32.mrf.mxu0 }
 0x278   : > { %7150 = vst [vmem:[#allocation24_spill] sm:$0xff] %v6816_v6  ;;  %v3509_v6 = vadd.f32 %v6671_v29, %v6667_v42 }
 0x279   : > { %v6820_v57 = vpop.f32.mrf.mxu0 }
 0x27a   : > { %7151 = vst [vmem:[#allocation23_spill] sm:$0xff] %v6820_v57  ;;  %v3586_v57 = vadd.f32 %v6728_v28, %v6721_v20  ;;  %v2333_v47 = vadd.f32 %v3509_v6, %v6833_v54  ;;  %v3512_v20 = vadd.f32 %v6677_v55, %v6673_v43 }
 0x27b   : > { %v6824_v33 = vpop.f32.mrf.mxu0 }
 0x27c   : > { %7152 = vst [vmem:[#allocation32_spill] sm:$0xff] %v6824_v33  ;;  %v3589_v33 = vadd.f32 %v3588_v23, %v6732_v30  ;;  %v3515_v30 = vadd.f32 %v6683_v35, %v6679_v36 }
 0x27d   : > { %v6837_v37 = vpop.f32.mrf.mxu0 }
 0x27e   : > { %v2478_v42 = vadd.f32 %v3589_v33, %v2333_v47  ;;  %v3595_v33 = vadd.f32 %v6750_v0, %v6746_v11  ;;  %v2343_v55 = vadd.f32 %v3515_v30, %v6833_v54  ;;  %v3521_v0 = vadd.f32 %v6695_v2, %v6691_v1 }
 0x27f   : > { %v6846_v60 = vpop.f32.mrf.mxu0 }
 0x281   : > { %v3664_v7 = vpop.f32.mrf.mxu1 }
 0x283   : > { %v3665_v31 = vpop.f32.mrf.mxu1 }
 0x284   : > { %v3666_v46 = vadd.f32 %v3665_v31, %v3664_v7  ;;  %v3592_v7 = vadd.f32 %v6742_v58, %v6738_v34  ;;  %v2488_v34 = vadd.f32 %v3595_v33, %v2343_v55  ;;  %v7155_v33 = vld [vmem:[#allocation12_spill] sm:$0xff] }
 0x285   : > { %v3667_v9 = vpop.f32.mrf.mxu1 }
 0x287   : > { %v3668_v8 = vpop.f32.mrf.mxu1 }
 0x288   : > { %v3669_v59 = vadd.f32 %v3668_v8, %v3667_v9  ;;  %v2338_v9 = vadd.f32 %v3512_v20, %v6833_v54  ;;  %v3604_v20 = vadd.f32 %v6774_v56, %v6770_v48 }
 0x289   : > { %v3670_v24 = vpop.f32.mrf.mxu1 }
 0x28a   : > { %v2623_v23 = vadd.f32 %v3669_v59, %v2478_v42  ;;  %v2483_v35 = vadd.f32 %v3592_v7, %v2338_v9 }
 0x28b   : > { %v3671_v22 = vpop.f32.mrf.mxu1 }
 0x28c   : > { %v3672_v43 = vadd.f32 %v3671_v22, %v3670_v24  ;;  %v3598_v22 = vadd.f32 %v6758_v17, %v6754_v32 }
 0x28d   : > { %v3673_v41 = vpop.f32.mrf.mxu1 }
 0x28e   : > { %v2628_v11 = vadd.f32 %v3672_v43, %v2483_v35  ;;  %v7157_v43 = vld [vmem:[#allocation14_spill] sm:$0xff] }
 0x28f   : > { %v3674_v62 = vpop.f32.mrf.mxu1 }
 0x290   : > { %v3675_v36 = vadd.f32 %v3674_v62, %v3673_v41  ;;  %v3601_v62 = vadd.f32 %v6766_v49, %v6762_v12  ;;  %v3524_v12 = vadd.f32 %v6701_v10, %v6697_v44 }
 0x291   : > { %v6796_v38 = vpop.f32.mrf.mxu1 }
 0x292   : > { %v2633_v24 = vadd.f32 %v3675_v36, %v2488_v34 }
 0x293   : > { %v6800_v25 = vpop.f32.mrf.mxu1 }
 0x295   : > { %v6804_v5 = vpop.f32.mrf.mxu1 }
 0x297   : > { %v3680_v27 = vpop.f32.mrf.mxu1 }
 0x298   : > { %v3681_v1 = vadd.f32 %v3680_v27, %v6804_v5  ;;  %v3607_v5 = vadd.f32 %v6782_v4, %v6778_v16  ;;  %v3530_v16 = vadd.f32 %v6726_v39, %v6716_v53 }
 0x299   : > { %v6810_v21 = vpop.f32.mrf.mxu1 }
 0x29a   : > { %v2368_v35 = vadd.f32 %v3530_v16, %v6833_v54 }
 0x29b   : > { %v6814_v26 = vpop.f32.mrf.mxu1 }
 0x29c   : > { %v3684_v44 = vadd.f32 %v6814_v26, %v6810_v21  ;;  %v3533_v21 = vadd.f32 %v6734_v61, %v6730_v51 }
 0x29d   : > { %v6818_v52 = vpop.f32.mrf.mxu1 }
 0x29e   : > { %v2373_v39 = vadd.f32 %v3533_v21, %v6833_v54 }
 0x29f   : > { %v6822_v14 = vpop.f32.mrf.mxu1 }
 0x2a1   : > { %v6826_v13 = vpop.f32.mrf.mxu1 }
 0x2a2   : > { %7153 = vst [vmem:[#allocation33_spill] sm:$0xff] %v6826_v13  ;;  %v2328_v13 = vadd.f32 %v3506_v3, %v6833_v54 }
 0x2a3   : > { %v6841_v19 = vpop.f32.mrf.mxu1 }
 0x2a4   : > { %v2473_v18 = vadd.f32 %v3586_v57, %v2328_v13 }
 0x2a6   : > { %v6848_v15 = vpop.f32.mrf.mxu1  ;;  %v2618_v28 = vadd.f32 %v3666_v46, %v2473_v18  ;;  %v3518_v18 = vadd.f32 %v6689_v63, %v6685_v40  ;;  %v3678_v40 = vadd.f32 %v6800_v25, %v6796_v38  ;;  %v2353_v63 = vadd.f32 %v3521_v0, %v6833_v54  ;;  %v7159_v0 = vld [vmem:[#allocation15_spill] sm:$0xff] }
 0x2a8   : > { %v6856_v31 = vpop.f32.mrf.mxu1  ;;  %v2348_v47 = vadd.f32 %v3518_v18, %v6833_v54  ;;  %v2498_v17 = vadd.f32 %v3601_v62, %v2353_v63  ;;  %v7162_v62 = vld [vmem:[#allocation17_spill] sm:$0xff]  ;;  %v7164_v63 = vld [vmem:[#allocation18_spill] sm:$0xff] }
 0x2a9   : > { %v7158_v34 = vld [vmem:[#allocation33_spill] sm:$0xff]  ;;  %v3693_v51 = vadd.f32 %v6856_v31, %v6848_v15  ;;  %v7165_v31 = vld [vmem:[#allocation16_spill] sm:$0xff] }
 0x2aa   : > { %v6864_v8 = vpop.f32.mrf.mxu1  ;;  %v2493_v2 = vadd.f32 %v3598_v22, %v2348_v47  ;;  %v2643_v38 = vadd.f32 %v3681_v1, %v2498_v17  ;;  %v3690_v53 = vadd.f32 %v6841_v19, %v7158_v34  ;;  %v7166_v17 = vld [vmem:[#allocation20_spill] sm:$0xff] }
 0x2ac   : > { %v6872_v41 = vpop.f32.mrf.mxu1  ;;  %v2638_v49 = vadd.f32 %v3678_v40, %v2493_v2  ;;  %v7163_v40 = vld [vmem:[#allocation13_spill] sm:$0xff] }
 0x2ad   : > { %v3616_v1 = vadd.f32 %v7164_v63, %v7163_v40 }
 0x2ae   : > { %v3697_v32 = vpop.f32.mrf.mxu1 }
 0x2c3   : > { %v3770_v29 = vpop.f32.mrf.mxu0 }
 0x2c4   : > { %v2768_v13 = vadd.f32 %v3770_v29, %v2623_v23  ;;  %v3527_v29 = vadd.f32 %v6706_v45, %v6703_v50  ;;  %v2358_v23 = vadd.f32 %v3524_v12, %v6833_v54  ;;  %v3687_v50 = vadd.f32 %v6822_v14, %v6818_v52  ;;  %v7156_v14 = vld [vmem:[#allocation9_spill] sm:$0xff] }
 0x2c5   : > { %v2762_v3 = vpop.f32.mrf.mxu0  ;;  %v3613_v55 = vadd.f32 %v7157_v43, %v7156_v14 }
 0x2c6   : > { %v2763_v57 = vadd.f32 %v2762_v3, %v2618_v28  ;;  %v3698_v28 = vpop.f32.mrf.mxu1  ;;  %v2363_v10 = vadd.f32 %v3527_v29, %v6833_v54  ;;  %v2503_v45 = vadd.f32 %v3604_v20, %v2358_v23  ;;  %v3696_v29 = vadd.f32 %v6872_v41, %v6864_v8  ;;  %v7167_v23 = vld [vmem:[#allocation6_spill] sm:$0xff]  ;;  %v7171_v41 = vld [vmem:[#allocation19_spill] sm:$0xff] }
 0x2c7   : > { %v2518_v18 = vadd.f32 %v3613_v55, %v2373_v39  ;;  %v7176_v39 = vld [vmem:[#allocation11_spill] sm:$0xff] }
 0x2c8   : > { %3800 = vmatprep.mubr.msk.f32.mxu0 %vm2852_vm3, %v2763_v57  ;;  %v3700_v48 = vpop.f32.mrf.mxu1  ;;  %v2508_v56 = vadd.f32 %v3607_v5, %v2363_v10  ;;  %v2648_v4 = vadd.f32 %v3684_v44, %v2503_v45  ;;  %v7154_v57 = vld [vmem:[#allocation31_spill] sm:$0xff]  ;;  %v7168_v44 = vld [vmem:[#allocation28_spill] sm:$0xff] }
 0x2c9   : > { %3801 = vmatmul.mubr.msk.f32.vlgmr.msra.gmra.mxu0 %vm2852_vm3, %v2768_v13  ;;  %v3610_v13 = vadd.f32 %v7155_v33, %v7154_v57  ;;  %v3542_v10 = vadd.f32 %v7168_v44, %v7167_v23  ;;  %v7169_v45 = vld [vmem:[#allocation8_spill] sm:$0xff] }
 0x2ca   : > { %v2653_v26 = vadd.f32 %v3687_v50, %v2508_v56  ;;  %v3701_v9 = vpop.f32.mrf.mxu1  ;;  %v7170_v56 = vld [vmem:[#allocation27_spill] sm:$0xff] }
 0x2cb   : > { %v3773_v58 = vpop.f32.mrf.mxu0  ;;  %v2513_v61 = vadd.f32 %v3610_v13, %v2368_v35  ;;  %v2388_v13 = vadd.f32 %v3542_v10, %v6833_v54 }
 0x2cc   : > { %v2778_v46 = vadd.f32 %v3773_v58, %v2633_v24  ;;  %v3703_v58 = vpop.f32.mrf.mxu1  ;;  %v7160_v24 = vld [vmem:[#allocation7_spill] sm:$0xff] }
 0x2cd   : > { %v2772_v59 = vpop.f32.mrf.mxu0  ;;  %v2658_v22 = vadd.f32 %v3690_v53, %v2513_v61  ;;  %v7175_v53 = vld [vmem:[#allocation29_spill] sm:$0xff] }
 0x2ce   : > { %v2773_v6 = vadd.f32 %v2772_v59, %v2628_v11  ;;  %v3536_v59 = vadd.f32 %v7160_v24, %v7159_v0  ;;  %v3704_v2 = vpop.f32.mrf.mxu1 }
 0x2cf   : > { %v3705_v43 = vadd.f32 %v3704_v2, %v3703_v58 }
 0x2d0   : > { %3803 = vmatprep.mubr.msk.f32.mxu0 %vm2852_vm3, %v2773_v6  ;;  %v7161_v6 = vld [vmem:[#allocation26_spill] sm:$0xff] }
 0x2d1   : > { %3804 = vmatmul.mubr.msk.f32.gmra.mxu0 %vm2852_vm3, %v2778_v46  ;;  %v3539_v19 = vadd.f32 %v7162_v62, %v7161_v6  ;;  %v2663_v46 = vadd.f32 %v3693_v51, %v2518_v18  ;;  %v3548_v51 = vadd.f32 %v7176_v39, %v7175_v53  ;;  %v7177_v18 = vld [vmem:[#allocation10_spill] sm:$0xff]  ;;  %v3631_v62 = vadd.f32 %v6846_v60, %v6837_v37  ;;  %v3050_v60 = vld [vmem:[#allocation2] sm:$0x1] }
 0x2d2   : > { %v7181_v37 = vmov 0.0   ;;  %v3049_v53 = vld [vmem:[%s7043_s7] sm:$0x1] }
 0x2d3   : > { %v3776_v42 = vpop.f32.mrf.mxu0  ;;  %3856 = vmatprep.mubr.msk.f32.mxu1 %vm4034_vm4, %v7181_v37 }
 0x2d4   : > { %v2788_v30 = vadd.f32 %v3776_v42, %v2643_v38  ;;  %v3619_v42 = vadd.f32 %v7166_v17, %v7165_v31  ;;  %v2383_v38 = vadd.f32 %v3539_v19, %v6833_v54 }
 0x2d5   : > { %v2782_v25 = vpop.f32.mrf.mxu0 }
 0x2d6   : > { %v2783_v27 = vadd.f32 %v2782_v25, %v2638_v49  ;;  %v2378_v49 = vadd.f32 %v3536_v59, %v6833_v54  ;;  %v3699_v25 = vadd.f32 %v3698_v28, %v3697_v32  ;;  %v2528_v5 = vadd.f32 %v3619_v42, %v2383_v38  ;;  %v7173_v28 = vld [vmem:[#allocation21_spill] sm:$0xff]  ;;  %v7180_v59 = vld [vmem:[#allocation32_spill] sm:$0xff] }
 0x2d8   : > { %3806 = vmatprep.mubr.msk.f32.mxu0 %vm2852_vm3, %v2783_v27  ;;  %v2523_v20 = vadd.f32 %v3616_v1, %v2378_v49  ;;  %v3706_v27 = vpop.f32.mrf.mxu1  ;;  %v2673_v16 = vadd.f32 %v3699_v25, %v2528_v5 }
 0x2d9   : > { %3807 = vmatmul.mubr.msk.f32.gmra.mxu0 %vm2852_vm3, %v2788_v30 }
 0x2da   : > { %v2668_v50 = vadd.f32 %v3696_v29, %v2523_v20 }
 0x2db   : > { %v3779_v3 = vpop.f32.mrf.mxu0 }
 0x2dc   : > { %v2798_v36 = vadd.f32 %v3779_v3, %v2653_v26  ;;  %v3545_v3 = vadd.f32 %v7170_v56, %v7169_v45  ;;  %v3707_v26 = vpop.f32.mrf.mxu1 }
 0x2dd   : > { %v2792_v7 = vpop.f32.mrf.mxu0 }
 0x2de   : > { %v2793_v52 = vadd.f32 %v2792_v7, %v2648_v4  ;;  %v7172_v4 = vld [vmem:[#allocation22_spill] sm:$0xff]  ;;  %v7174_v7 = vld [vmem:[#allocation24_spill] sm:$0xff]  ;;  %v2393_v14 = vadd.f32 %v3545_v3, %v6833_v54 }
 0x2df   : > { %v3622_v21 = vadd.f32 %v7172_v4, %v7171_v41  ;;  %v3625_v57 = vadd.f32 %v7174_v7, %v7173_v28 }
 0x2e0   : > { %3809 = vmatprep.mubr.msk.f32.mxu0 %vm2852_vm3, %v2793_v52  ;;  %v3702_v52 = vadd.f32 %v3701_v9, %v3700_v48  ;;  %v7179_v9 = vld [vmem:[#allocation23_spill] sm:$0xff] }
 0x2e1   : > { %3810 = vmatmul.mubr.msk.f32.gmra.mxu0 %vm2852_vm3, %v2798_v36  ;;  %v2533_v55 = vadd.f32 %v3622_v21, %v2388_v13  ;;  %v3709_v36 = vpop.f32.mrf.mxu1  ;;  %v2538_v35 = vadd.f32 %v3625_v57, %v2393_v14 }
 0x2e3   : > { %v3782_v11 = vpop.f32.mrf.mxu0  ;;  %v2678_v61 = vadd.f32 %v3702_v52, %v2533_v55  ;;  %v2683_v24 = vadd.f32 %v3705_v43, %v2538_v35  ;;  %v3710_v6 = vpop.f32.mrf.mxu1 }
 0x2e4   : > { %v2808_v12 = vadd.f32 %v3782_v11, %v2663_v46  ;;  %v7178_v11 = vld [vmem:[#allocation30_spill] sm:$0xff]  ;;  %v2398_v46 = vadd.f32 %v3548_v51, %v6833_v54  ;;  %v3711_v63 = vadd.f32 %v3710_v6, %v3709_v36  ;;  %v7182_v51 = vld [vmem:[#allocation25_spill] sm:$0xff] }
 0x2e5   : > { %v2802_v47 = vpop.f32.mrf.mxu0  ;;  %v3551_v0 = vadd.f32 %v7178_v11, %v7177_v18 }
 0x2e6   : > { %v2803_v15 = vadd.f32 %v2802_v47, %v2658_v22  ;;  %v3628_v22 = vadd.f32 %v7180_v59, %v7179_v9  ;;  %v3708_v47 = vadd.f32 %v3707_v26, %v3706_v27 }
 0x2e7   : > { %v2403_v40 = vadd.f32 %v3551_v0, %v6833_v54  ;;  %v4035_v54 = vmov 0  }
 0x2e8   : > { %3812 = vmatprep.mubr.msk.f32.mxu0 %vm2852_vm3, %v2803_v15  ;;  %v2543_v1 = vadd.f32 %v3628_v22, %v2398_v46  ;;  %3901 = vset.pattern.permute.xlu0 %v4035_v54 }
 0x2e9   : > { %3813 = vmatmul.mubr.msk.f32.gmra.mxu0 %vm2852_vm3, %v2808_v12  ;;  %v2548_v2 = vadd.f32 %v3631_v62, %v2403_v40  ;;  %3053 = vperm.xlu0 %3901, %v3050_v60  }
 0x2ea   : > { %v2688_v31 = vadd.f32 %v3708_v47, %v2543_v1 }
 0x2eb   : > { %v3785_v30 = vpop.f32.mrf.mxu0  ;;  %v2693_v17 = vadd.f32 %v3711_v63, %v2548_v2 }
 0x2ec   : > { %v2818_v33 = vadd.f32 %v3785_v30, %v2673_v16  ;;  %v3352_v16 = vld [vmem:[%s7042_s6] ss:$0 sm:$0xff] }
 0x2ed   : > { %v2812_v8 = vpop.f32.mrf.mxu0 }
 0x2ee   : > { %v2813_v32 = vadd.f32 %v2812_v8, %v2668_v50 }
 0x2f0   : > { %3815 = vmatprep.mubr.msk.f32.mxu0 %vm2852_vm3, %v2813_v32 }
 0x2f1   : > { %3816 = vmatmul.mubr.msk.f32.gmra.mxu0 %vm2852_vm3, %v2818_v33 }
 0x2f3   : > { %v3788_v34 = vpop.f32.mrf.mxu0 }
 0x2f4   : > { %v2828_v19 = vadd.f32 %v3788_v34, %v2683_v24 }
 0x2f5   : > { %v2822_v48 = vpop.f32.mrf.mxu0 }
 0x2f6   : > { %v2823_v58 = vadd.f32 %v2822_v48, %v2678_v61  ;;  %v7183_v61 = vsub.s32 0, %v7182_v51 }
 0x2f8   : > { %3818 = vmatprep.mubr.msk.f32.mxu0 %vm2852_vm3, %v2823_v58 }
 0x2f9   : > { %3819 = vmatmul.mubr.msk.f32.gmra.mxu0 %vm2852_vm3, %v2828_v19 }
 0x2fb   : > { %v3791_v15 = vpop.f32.mrf.mxu0 }
 0x2fc   : > { %v2838_v49 = vadd.f32 %v3791_v15, %v2693_v17 }
 0x2fd   : > { %v2832_v42 = vpop.f32.mrf.mxu0 }
 0x2fe   : > { %v2833_v12 = vadd.f32 %v2832_v42, %v2688_v31 }
 0x300   : > { %3821 = vmatprep.mubr.msk.f32.mxu0 %vm2852_vm3, %v2833_v12 }
 0x301   : > { %3822 = vmatmul.mubr.msk.f32.gmra.mxu0 %vm2852_vm3, %v2838_v49 }
 0x364   : > { %v3054_v39 = vpop.permute.xlu0 %3053 }
 0x365   : > { %v3059_v18 = vrot.slane %v3054_v39, %v7183_v61 }
 0x389   : > { %v3802_v29 = vpop.f32.mrf.mxu0 }
 0x38a   : > { %v2976_v35 = vadd.f32 %v3802_v29, %v3352_v16 }
 0x38b   : > { %v2970_v38 = vpop.f32.mrf.mxu0 }
 0x38c   : > { %v2971_v34 = vadd.f32 %v3352_v16, %v2970_v38 }
 0x391   : > { %v3805_v25 = vpop.f32.mrf.mxu0 }
 0x392   : > { %v2986_v55 = vadd.f32 %v3805_v25, %v3352_v16 }
 0x393   : > { %v2980_v20 = vpop.f32.mrf.mxu0 }
 0x394   : > { %v2981_v36 = vadd.f32 %v3352_v16, %v2980_v20 }
 0x399   : > { %v3808_v27 = vpop.f32.mrf.mxu0 }
 0x39a   : > { %v2996_v14 = vadd.f32 %v3808_v27, %v3352_v16 }
 0x39b   : > { %v2990_v5 = vpop.f32.mrf.mxu0 }
 0x39c   : > { %v2991_v43 = vadd.f32 %v3352_v16, %v2990_v5 }
 0x3a1   : > { %v3811_v30 = vpop.f32.mrf.mxu0 }
 0x3a2   : > { %v3006_v13 = vadd.f32 %v3811_v30, %v3352_v16 }
 0x3a3   : > { %v3000_v23 = vpop.f32.mrf.mxu0 }
 0x3a4   : > { %v3001_v52 = vadd.f32 %v3352_v16, %v3000_v23 }
 0x3a9   : > { %v3814_v44 = vpop.f32.mrf.mxu0 }
 0x3aa   : > { %v3016_v57 = vadd.f32 %v3814_v44, %v3352_v16 }
 0x3ab   : > { %v3010_v10 = vpop.f32.mrf.mxu0 }
 0x3ac   : > { %v3011_v33 = vadd.f32 %v3352_v16, %v3010_v10 }
 0x3b1   : > { %v3817_v50 = vpop.f32.mrf.mxu0 }
 0x3b2   : > { %v3026_v28 = vadd.f32 %v3817_v50, %v3352_v16 }
 0x3b3   : > { %v3020_v45 = vpop.f32.mrf.mxu0 }
 0x3b4   : > { %v3021_v7 = vadd.f32 %v3352_v16, %v3020_v45 }
 0x3b9   : > { %v3820_v56 = vpop.f32.mrf.mxu0 }
 0x3ba   : > { %v3036_v26 = vadd.f32 %v3820_v56, %v3352_v16 }
 0x3bb   : > { %v3030_v3 = vpop.f32.mrf.mxu0 }
 0x3bc   : > { %v3031_v32 = vadd.f32 %v3352_v16, %v3030_v3 }
 0x3c1   : > { %v3823_v8 = vpop.f32.mrf.mxu0 }
 0x3c2   : > { %v3046_v41 = vadd.f32 %v3823_v8, %v3352_v16 }
 0x3c3   : > { %v3040_v4 = vpop.f32.mrf.mxu0 }
 0x3c4   : > { %3825 = vmatpush3.xpose.msk.msra.mxu1 %vm3060_vm5, %v3046_v41  ;;  %v3041_v21 = vadd.f32 %v3352_v16, %v3040_v4 }
 0x3c5   : > { %3826 = vmatprep.subr.mxu1 %v7181_v37 }
 0x3c8   : > { %3827 = vmatpush3.xpose.msk.msra.mxu1 %vm3060_vm5, %v3041_v21 }
 0x3c9   : > { %3828 = vmatprep.subr.mxu1 %v7181_v37 }
 0x3cc   : > { %3829 = vmatpush3.xpose.msk.msra.mxu1 %vm3060_vm5, %v3036_v26 }
 0x3cd   : > { %3830 = vmatprep.subr.mxu1 %v7181_v37 }
 0x3d0   : > { %3831 = vmatpush3.xpose.msk.msra.mxu1 %vm3060_vm5, %v3031_v32 }
 0x3d1   : > { %3832 = vmatprep.subr.mxu1 %v7181_v37 }
 0x3d4   : > { %3833 = vmatpush3.xpose.msk.msra.mxu1 %vm3060_vm5, %v3026_v28 }
 0x3d5   : > { %3834 = vmatprep.subr.mxu1 %v7181_v37 }
 0x3d8   : > { %3835 = vmatpush3.xpose.msk.msra.mxu1 %vm3060_vm5, %v3021_v7 }
 0x3d9   : > { %3836 = vmatprep.subr.mxu1 %v7181_v37 }
 0x3dc   : > { %3837 = vmatpush3.xpose.msk.msra.mxu1 %vm3060_vm5, %v3016_v57 }
 0x3dd   : > { %3838 = vmatprep.subr.mxu1 %v7181_v37 }
 0x3e0   : > { %3839 = vmatpush3.xpose.msk.msra.mxu1 %vm3060_vm5, %v3011_v33 }
 0x3e1   : > { %3840 = vmatprep.subr.mxu1 %v7181_v37 }
 0x3e4   : > { %3841 = vmatpush3.xpose.msk.msra.mxu1 %vm3060_vm5, %v3006_v13 }
 0x3e5   : > { %3842 = vmatprep.subr.mxu1 %v7181_v37 }
 0x3e8   : > { %3843 = vmatpush3.xpose.msk.msra.mxu1 %vm3060_vm5, %v3001_v52 }
 0x3e9   : > { %3844 = vmatprep.subr.mxu1 %v7181_v37 }
 0x3ec   : > { %3845 = vmatpush3.xpose.msk.msra.mxu1 %vm3060_vm5, %v2996_v14 }
 0x3ed   : > { %3846 = vmatprep.subr.mxu1 %v7181_v37 }
 0x3f0   : > { %3847 = vmatpush3.xpose.msk.msra.mxu1 %vm3060_vm5, %v2991_v43 }
 0x3f1   : > { %3848 = vmatprep.subr.mxu1 %v7181_v37 }
 0x3f4   : > { %3849 = vmatpush3.xpose.msk.msra.mxu1 %vm3060_vm5, %v2986_v55 }
 0x3f5   : > { %3850 = vmatprep.subr.mxu1 %v7181_v37 }
 0x3f8   : > { %3851 = vmatpush3.xpose.msk.msra.mxu1 %vm3060_vm5, %v2981_v36 }
 0x3f9   : > { %3852 = vmatprep.subr.mxu1 %v7181_v37 }
 0x3fc   : > { %3853 = vmatpush3.xpose.msk.msra.mxu1 %vm3060_vm5, %v2976_v35 }
 0x3fd   : > { %3854 = vmatprep.subr.mxu1 %v7181_v37 }
 0x400   : > { %3855 = vmatpush3.xpose.msk.msra.mxu1 %vm3060_vm5, %v2971_v34 }
 0x403   : > { %3857 = vmatmul.mubr.msk.f32.vlgmr.msra.gmra.mxu1 %vm3060_vm5, %v3049_v53 }
 0x4c3   : > { %v3178_v11 = vpop.f32.mrf.mxu1 }
 0x4c4   : > { %v3179_v0 = vadd.f32 %v3178_v11, %v3059_v18 }
 0x4c5   : > { %v3858_v24 = vpop.f32.mrf.mxu1 }
 0x4c6   : > { %v3387_v48 = vmul.f32 -1.442695, %v3179_v0 }
 0x4c8   : > { %3902 = vpow2.f32 %v3387_v48 }
 0x4d5   : > { %v3903_v9 = vpop.eup %3902 }
 0x4d6   : > { %v3185_v59 = vadd.f32 1.0, %v3903_v9 }
 0x4d8   : > { %3904 = vrcp.f32 %v3185_v59 }
 0x4e5   : > { %v3905_v22 = vpop.eup %3904 }
 0x4e6   : > { %3188 = vst [vmem:[%s329_s8] sm:$0x1] %v3905_v22 }
 0x4e7   : > { %3984 = shalt.err (!%p3981_p3)
}
 0x4e8   : > { %s3985_s29 = scalar_lea.hbm %s7001_s23, 16  ;;  %s3989_s15 = scalar_lea.hbm %s7045_s9, 32 }
 0x4e9   : > { %p3986_p4 = scmp.ne.s32.totalorder %s7001_s23, %s3985_s29  ;;  %p3990_p9 = scmp.lt.s32.totalorder %s7001_s23, %s7045_s9 }
 0x4ea   : > { %p3991_p10 = scmp.lt.s32.totalorder %s3989_s15, %s3985_s29 }
 0x4eb   : > { %p3987_p7 = pnand %p3986_p4, %p4127_p5 }
 0x4ec   : > { %p3992_p11 = por %p3991_p10, %p3990_p9 }
 0x4ed   : > { %p3988_p8 = pneg %p3987_p7 }
 0x4ef   : > { %p3993_p12 = pnand %p3992_p11, %p3988_p8 }
 0x4f1   : > { %3996 = shalt.err (!%p3993_p12)
}
 0x4f2   : > { %3859 = dma.vmem_to_hbm [thread:$0]  (%p4127_p5), %s3203_s18, 16, %s7001_s23, %s3190_s24  }
 0x4f3 PF: > { %p3865_p13 = scmp.ge.s32.totalorder %s4031_s14, 2  ;;  %s3214_s22 = sand.u32 1, %s4019_s11  }
 0x4f4   : > { %s3215_s25 = scalar_lea.sflag [#allocation4], %s3214_s22 }
 0x4f5   : > { %p3862_p0 = pnand %p3865_p13, %p4131_p6 }
 0x4f7   : > { %p3863_p1 = pneg %p3862_p0 }
 0x4f9   : > { %4014 = dma.done.wait (%p3863_p1), %s3215_s25, 16  }
 0x4fa   : > { %4016 = vsyncadd (%p3863_p1), %s3215_s25, 4294967280  ;;  %p21_p2 = scmp.ge.s32.totalorder %s4113_s16, 4   ;;  %s7184_s11 = smov %s4023_s12 }
 0x4fb   : > { %s7185_s12 = smov %s4027_s13  ;;  %s7186_s13 = smov %s4125_s19 }
 0x4fc   : > { %s7187_s14 = smov %s4113_s16  ;;  %23 = sbr.rel (!%p21_p2) target bundleno = 6 (0x6), region = 91 }
 0x501   :  { %3219 = vsyncpa [#allocation4], 1 }
 0x502   :  { %3221 = vsyncpa [#allocation4 + $0x1], 1 }

</bundles_post_ra>
